<compile_context>
chip_gen: v7x
topology: tpu7x:2x2x1
jax: 0.10.0
libtpu: 0.0.40
codegen_flags: <defaults>
</compile_context>

<pallas_src>
import functools

import jax
import jax.numpy as jnp
from jax.experimental import pallas as pl
from jax.experimental.pallas import tpu as pltpu

LANE = 128
EPS = 1e-5


def _rup(x, m):
    return (x + m - 1) // m * m


@functools.lru_cache(maxsize=1)
def _vmem_limit():
    """Generation-aware VMEM budget (v5e/v6e ~96 MiB, v7x ~48 MiB)."""
    try:
        cap = int(pltpu.get_tpu_info().vmem_capacity_bytes)
        return min((cap * 3) // 4, 100 * 1024 * 1024)
    except Exception:
        return 32 * 1024 * 1024


def _pick_rows(m, *, target=2048):
    """Row tile for the flat (M, K) cols path: divisor of m, mult of 8."""
    divs = [d for d in range(1, m + 1) if m % d == 0]
    good = [d for d in divs if d <= target and d % 8 == 0]
    th = max(good) if good else m
    # prefer >=2 grid steps so both v7x TensorCores get work
    if th == m and m % 16 == 0 and (m // 2) <= 4 * target:
        th = m // 2
    return th


def _pick_th(hout, wout, n, *, target=2048):
    """Output-row tile for the direct 3x3 path (must divide hout)."""
    divs = [d for d in range(1, hout + 1) if hout % d == 0]
    ok = [d for d in divs if d * wout <= target and (d * wout) % 8 == 0]
    th = max(ok) if ok else hout
    if n == 1 and th == hout and hout % 2 == 0 and ((hout // 2) * wout) % 8 == 0:
        th = hout // 2
    return th


# ----------------------------- Pallas kernels -----------------------------

def _cols_conv_kernel(x_ref, w_ref, *out_refs, with_stats):
    """One big matmul per row tile (im2col'd input).

    x_ref : (R, K)      bf16   per-tile block of the im2col slab
    w_ref : (K, CoutP)  bf16
    out_refs[0] : (R, CoutP)   bf16 conv output tile
    out_refs[1] : (1, 2, CoutP) f32 per-tile [sum, sum_sq]  (optional)
    """
    out_ref = out_refs[0]
    y = jnp.dot(x_ref[...], w_ref[...], preferred_element_type=jnp.float32)
    out_ref[...] = y.astype(out_ref.dtype)
    if with_stats:
        out_refs[1][0] = jnp.concatenate(
            [jnp.sum(y, axis=0, keepdims=True),
             jnp.sum(y * y, axis=0, keepdims=True)], axis=0)


def _direct_conv_kernel(xp_ref, w_ref, *out_refs, k, th, wout, with_stats):
    """Direct 3x3 stride-1 conv: grouped taps -> ONE large-K dot per tile.

    xp_ref : (1, Hp, Wp, CinP)      bf16 spatially padded image
    w_ref  : (k*k*CinP, CoutP)      bf16 taps stacked along K (dy, dx, cin)
    out_refs[0] : (1, 1, th*wout, CoutP) bf16
    out_refs[1] : (1, 1, 2, CoutP)  f32  per-tile [sum, sum_sq]  (optional)
    """
    out_ref = out_refs[0]
    j = pl.program_id(1)
    cinp = xp_ref.shape[3]
    row0 = j * th
    if th % 8 == 0:
        row0 = pl.multiple_of(row0, 8)
    taps = []
    for dy in range(k):
        for dx in range(k):
            p = xp_ref[0, pl.ds(row0 + dy, th), pl.ds(dx, wout), :]
            taps.append(p.reshape(th * wout, cinp))
    lhs = jnp.concatenate(taps, axis=-1)                 # (th*wout, k*k*CinP)
    y = jnp.dot(lhs, w_ref[...], preferred_element_type=jnp.float32)
    out_ref[0, 0] = y.astype(out_ref.dtype)
    if with_stats:
        out_refs[1][0, 0] = jnp.concatenate(
            [jnp.sum(y, axis=0, keepdims=True),
             jnp.sum(y * y, axis=0, keepdims=True)], axis=0)


def _finalize_kernel(*refs, affine, relu, tanh, has_res):
    """Fused BN scale/shift + ReLU (+ residual) (+ tanh) on one [tm, C] tile."""
    idx = 0
    y_ref = refs[idx]; idx += 1
    sc_ref = sh_ref = r_ref = None
    if affine:
        sc_ref = refs[idx]; sh_ref = refs[idx + 1]; idx += 2
    if has_res:
        r_ref = refs[idx]; idx += 1
    o_ref = refs[idx]

    y = y_ref[...].astype(jnp.float32)
    if affine:
        y = y * sc_ref[...] + sh_ref[...]
    if relu:
        y = jnp.maximum(y, 0.0)
    if has_res:
        y = y + r_ref[...].astype(jnp.float32)
    if tanh:
        y = jnp.tanh(y)
    o_ref[...] = y.astype(o_ref.dtype)


# ----------------------------- pallas_call wrappers -----------------------------

def conv_cols(xflat, w_mat, *, row_tile, with_stats=True):
    """xflat: [M, K] bf16 (im2col'd, batch folded in), w_mat: [K, CoutP] bf16."""
    m, kdim = xflat.shape
    coutp = w_mat.shape[1]
    n_t = m // row_tile
    out_shapes = [jax.ShapeDtypeStruct((m, coutp), jnp.bfloat16)]
    out_specs = [pl.BlockSpec((row_tile, coutp), lambda i: (i, 0))]
    if with_stats:
        out_shapes.append(jax.ShapeDtypeStruct((n_t, 2, coutp), jnp.float32))
        out_specs.append(pl.BlockSpec((1, 2, coutp), lambda i: (i, 0, 0)))
    res = pl.pallas_call(
        functools.partial(_cols_conv_kernel, with_stats=with_stats),
        out_shape=tuple(out_shapes),
        grid=(n_t,),
        in_specs=[pl.BlockSpec((row_tile, kdim), lambda i: (i, 0)),
                  pl.BlockSpec((kdim, coutp), lambda i: (0, 0))],
        out_specs=tuple(out_specs),
        compiler_params=pltpu.CompilerParams(
            dimension_semantics=("parallel",),
            vmem_limit_bytes=_vmem_limit()),
    )(xflat, w_mat)
    if with_stats:
        y, st = res
        return y, st
    y = res[0] if isinstance(res, (tuple, list)) else res
    return y, None


def conv_direct(xp, w_mat, *, k, hout, wout, th, with_stats=True):
    """xp: [N, Hp, Wp, CinP] bf16 (spatially padded), w_mat: [k*k*CinP, CoutP]."""
    n, hp, wp, cinp = xp.shape
    coutp = w_mat.shape[1]
    n_ht = hout // th
    out_shapes = [jax.ShapeDtypeStruct((n, n_ht, th * wout, coutp), jnp.bfloat16)]
    out_specs = [pl.BlockSpec((1, 1, th * wout, coutp), lambda i, j: (i, j, 0, 0))]
    if with_stats:
        out_shapes.append(jax.ShapeDtypeStruct((n, n_ht, 2, coutp), jnp.float32))
        out_specs.append(pl.BlockSpec((1, 1, 2, coutp), lambda i, j: (i, j, 0, 0)))
    res = pl.pallas_call(
        functools.partial(_direct_conv_kernel, k=k, th=th, wout=wout,
                          with_stats=with_stats),
        out_shape=tuple(out_shapes),
        grid=(n, n_ht),
        in_specs=[pl.BlockSpec((1, hp, wp, cinp), lambda i, j: (i, 0, 0, 0)),
                  pl.BlockSpec((k * k * cinp, coutp), lambda i, j: (0, 0))],
        out_specs=tuple(out_specs),
        compiler_params=pltpu.CompilerParams(
            dimension_semantics=("parallel", "parallel"),
            vmem_limit_bytes=_vmem_limit()),
    )(xp, w_mat)
    if with_stats:
        y, st = res
        return y.reshape(n * hout * wout, coutp), st.reshape(n * n_ht, 2, coutp)
    y = res[0] if isinstance(res, (tuple, list)) else res
    return y.reshape(n * hout * wout, coutp), None


def pallas_finalize(y2d, scale, shift, residual=None, *, affine=True,
                    relu=False, tanh=False, out_dtype=jnp.bfloat16):
    """Fused affine (BN) + ReLU (+ residual) (+ tanh), tiled over M (bf16 in)."""
    m, c = y2d.shape
    mp = _rup(m, 8)
    if mp != m:
        y2d = jnp.pad(y2d, ((0, mp - m), (0, 0)))
        if residual is not None:
            residual = jnp.pad(residual, ((0, mp - m), (0, 0)))
    tm = min(mp, 4096)
    has_res = residual is not None

    in_specs = [pl.BlockSpec((tm, c), lambda i: (i, 0))]
    args = [y2d]
    if affine:
        in_specs += [pl.BlockSpec((1, c), lambda i: (0, 0)),
                     pl.BlockSpec((1, c), lambda i: (0, 0))]
        args += [scale, shift]
    if has_res:
        in_specs.append(pl.BlockSpec((tm, c), lambda i: (i, 0)))
        args.append(residual)

    out = pl.pallas_call(
        functools.partial(_finalize_kernel, affine=affine, relu=relu,
                          tanh=tanh, has_res=has_res),
        out_shape=jax.ShapeDtypeStruct((mp, c), out_dtype),
        grid=(pl.cdiv(mp, tm),),
        in_specs=in_specs,
        out_specs=pl.BlockSpec((tm, c), lambda i: (i, 0)),
        compiler_params=pltpu.CompilerParams(
            dimension_semantics=("parallel",),
            vmem_limit_bytes=_vmem_limit()),
    )(*args)
    return out[:m] if mp != m else out


# ----------------------------- conv glue -----------------------------

def _spatial_pad(x, pad, mode):
    if pad == 0:
        return x
    m = "reflect" if mode == "reflect" else "constant"
    return jnp.pad(x, ((0, 0), (pad, pad), (pad, pad), (0, 0)), mode=m)


def _im2col_nhwc(xp, k, stride, hout, wout):
    cols = []
    for dy in range(k):
        for dx in range(k):
            cols.append(xp[:, dy:dy + stride * (hout - 1) + 1:stride,
                           dx:dx + stride * (wout - 1) + 1:stride, :])
    return jnp.concatenate(cols, axis=-1)       # channel order (dy, dx, cin)


def _conv_cols_layer(x, cin_real, w_mat, *, k, stride, pad, pad_mode):
    """Stem / downsampling convs via host im2col feeding the K=big matmul kernel."""
    n = x.shape[0]
    xr = x[..., :cin_real]
    xp = _spatial_pad(xr, pad, pad_mode)
    hp, wp = xp.shape[1], xp.shape[2]
    hout = (hp - k) // stride + 1
    wout = (wp - k) // stride + 1
    xcol = _im2col_nhwc(xp, k, stride, hout, wout)          # [N,ho,wo,k*k*cin]
    kreal = k * k * cin_real
    kpad, coutp = w_mat.shape
    xcol = jnp.pad(xcol, ((0, 0), (0, 0), (0, 0), (0, kpad - kreal)))
    xflat = xcol.reshape(n * hout * wout, kpad).astype(jnp.bfloat16)
    row_tile = _pick_rows(n * hout * wout)
    y2d, stats = conv_cols(xflat, w_mat, row_tile=row_tile, with_stats=True)
    return y2d, stats, (n, hout, wout, coutp)


def _conv_direct_layer(x, w_mat, *, k, pad, pad_mode, with_stats=True):
    """ResnetBlock 3x3 stride-1 convs: direct grouped-tap kernel, no im2col."""
    n, h, w, _ = x.shape
    xp = _spatial_pad(x, pad, pad_mode).astype(jnp.bfloat16)
    hout = h + 2 * pad - (k - 1)
    wout = w + 2 * pad - (k - 1)
    coutp = w_mat.shape[1]
    th = _pick_th(hout, wout, n)
    y2d, stats = conv_direct(xp, w_mat, k=k, hout=hout, wout=wout, th=th,
                             with_stats=with_stats)
    return y2d, stats, (n, hout, wout, coutp)


def _bn_scale_shift(stats, count, gamma_p, beta_p):
    s = jnp.sum(stats, axis=0)                            # [2, CP]
    mean = s[0] / count
    var = jnp.maximum(s[1] / count - mean * mean, 0.0)    # biased var (PyTorch BN)
    inv = jax.lax.rsqrt(var + EPS)
    scale = gamma_p * inv
    shift = beta_p - mean * scale
    return (scale.reshape(1, -1).astype(jnp.float32),
            shift.reshape(1, -1).astype(jnp.float32))


def _bn_finalize(y2d, stats, meta, gamma_p, beta_p, *, relu, residual=None,
                 tanh=False, out_dtype=jnp.bfloat16):
    n, hout, wout, coutp = meta
    scale, shift = _bn_scale_shift(stats, n * hout * wout, gamma_p, beta_p)
    out2d = pallas_finalize(y2d, scale, shift, residual=residual, affine=True,
                            relu=relu, tanh=tanh, out_dtype=out_dtype)
    return out2d.reshape(n, hout, wout, coutp)


def _plain_finalize(y2d, meta, residual, *, tanh, out_dtype):
    """Last ResnetBlock: second conv has NO norm -> skip the affine entirely."""
    n, hout, wout, coutp = meta
    out2d = pallas_finalize(y2d, None, None, residual=residual, affine=False,
                            relu=False, tanh=tanh, out_dtype=out_dtype)
    return out2d.reshape(n, hout, wout, coutp)


# ----------------------------- parameters -----------------------------

def _conv_w(key, cout, cin, k):
    return 0.05 * jax.random.normal(key, (cout, cin, k, k), dtype=jnp.float32)


def _bn_p(key, c):
    k1, k2 = jax.random.split(key)
    gamma = 1.0 + 0.1 * jax.random.normal(k1, (c,), dtype=jnp.float32)
    beta = 0.1 * jax.random.normal(k2, (c,), dtype=jnp.float32)
    return gamma, beta


def _prep_w_cols(w, kpad, coutp):
    """(cout,cin,kh,kw) -> [kpad, coutp] bf16, rows ordered (dy, dx, cin)."""
    cout, cin, kh, kw = w.shape
    wm = jnp.transpose(w, (2, 3, 1, 0)).reshape(kh * kw * cin, cout)
    wm = jnp.pad(wm, ((0, kpad - kh * kw * cin), (0, coutp - cout)))
    return wm.astype(jnp.bfloat16)


def _prep_w_direct(w, cinp, coutp):
    """(cout,cin,kh,kw) -> [kh*kw*cinp, coutp] bf16, per-tap channel-padded."""
    cout, cin, kh, kw = w.shape
    wt = jnp.transpose(w, (2, 3, 1, 0))                   # (kh, kw, cin, cout)
    wt = jnp.pad(wt, ((0, 0), (0, 0), (0, cinp - cin), (0, coutp - cout)))
    return wt.reshape(kh * kw * cinp, coutp).astype(jnp.bfloat16)


def init_resnet_filter(key, input_nc=3, ngf=16, n_blocks=2):
    """norm_layer = BatchNorm2d  =>  use_bias = False (as in the PyTorch module).
    Weight prep (transpose + pad + bf16 cast) and gamma/beta padding hoisted here."""
    keys = list(jax.random.split(key, 12 + 4 * n_blocks))
    kit = iter(keys)
    params = {}

    c1p = _rup(ngf, LANE)
    w = _conv_w(next(kit), ngf, input_nc, 7)
    params["stem_w"] = _prep_w_cols(w, _rup(7 * 7 * input_nc, LANE), c1p)
    g, b = _bn_p(next(kit), ngf)
    params["stem_gamma"] = jnp.pad(g, (0, c1p - ngf))
    params["stem_beta"] = jnp.pad(b, (0, c1p - ngf))

    c = ngf
    for i in range(2):
        cout = 2 * c
        coutp = _rup(cout, LANE)
        w = _conv_w(next(kit), cout, c, 3)
        params[f"down{i}_w"] = _prep_w_cols(w, _rup(9 * c, LANE), coutp)
        g, b = _bn_p(next(kit), cout)
        params[f"down{i}_gamma"] = jnp.pad(g, (0, coutp - cout))
        params[f"down{i}_beta"] = jnp.pad(b, (0, coutp - cout))
        c = cout

    cp = _rup(c, LANE)
    for i in range(n_blocks):
        last = i == n_blocks - 1
        w1 = _conv_w(next(kit), c, c, 3)
        params[f"blk{i}_w1"] = _prep_w_direct(w1, cp, cp)
        g1, b1 = _bn_p(next(kit), c)
        params[f"blk{i}_g1"] = jnp.pad(g1, (0, cp - c))
        params[f"blk{i}_b1"] = jnp.pad(b1, (0, cp - c))
        w2 = _conv_w(next(kit), c, c, 3)
        params[f"blk{i}_w2"] = _prep_w_direct(w2, cp, cp)
        if not last:
            g2, b2 = _bn_p(next(kit), c)
            params[f"blk{i}_g2"] = jnp.pad(g2, (0, cp - c))
            params[f"blk{i}_b2"] = jnp.pad(b2, (0, cp - c))
    return params


# ----------------------------- forward -----------------------------

@functools.partial(jax.jit,
                   static_argnames=("input_nc", "ngf", "n_blocks", "use_tanh"))
def resnet_filter_forward(params, x_nchw, *, input_nc, ngf, n_blocks,
                          use_tanh=True):
    x = jnp.transpose(x_nchw, (0, 2, 3, 1))                       # NHWC

    # stem: ReflectionPad2d(3) + Conv2d(input_nc, ngf, 7) + BN + ReLU
    y2d, st, meta = _conv_cols_layer(x, input_nc, params["stem_w"],
                                     k=7, stride=1, pad=3, pad_mode="reflect")
    y = _bn_finalize(y2d, st, meta, params["stem_gamma"], params["stem_beta"],
                     relu=True)

    # 2x downsampling: Conv2d(c, 2c, 3, stride=2, padding=1) + BN + ReLU
    c = ngf
    for i in range(2):
        y2d, st, meta = _conv_cols_layer(y, c, params[f"down{i}_w"],
                                         k=3, stride=2, pad=1, pad_mode="zero")
        y = _bn_finalize(y2d, st, meta, params[f"down{i}_gamma"],
                         params[f"down{i}_beta"], relu=True)
        c = 2 * c

    # ResnetBlocks at dim = 4*ngf, reflect padding, no dropout
    cp = _rup(c, LANE)
    for i in range(n_blocks):
        last = i == n_blocks - 1
        n_, hh, ww, _ = y.shape
        res2d = y.reshape(n_ * hh * ww, cp)

        y2d, st, meta = _conv_direct_layer(y, params[f"blk{i}_w1"],
                                           k=3, pad=1, pad_mode="reflect")
        h1 = _bn_finalize(y2d, st, meta, params[f"blk{i}_g1"],
                          params[f"blk{i}_b1"], relu=True)

        y2d, st, meta = _conv_direct_layer(h1, params[f"blk{i}_w2"],
                                           k=3, pad=1, pad_mode="reflect",
                                           with_stats=not last)
        if last:
            # no norm after last block's 2nd conv; fuse skip-add (+ tanh) here
            y = _plain_finalize(y2d, meta, res2d, tanh=use_tanh,
                                out_dtype=jnp.float32)
        else:
            y = _bn_finalize(y2d, st, meta, params[f"blk{i}_g2"],
                             params[f"blk{i}_b2"], relu=False,
                             residual=res2d, out_dtype=jnp.bfloat16)

    if n_blocks == 0 and use_tanh:
        n_, hh, ww, ccp = y.shape
        y = pallas_finalize(y.reshape(n_ * hh * ww, ccp), None, None,
                            affine=False, relu=False, tanh=True,
                            out_dtype=jnp.float32).reshape(n_, hh, ww, ccp)

    # strip channel padding, back to NCHW
    y = y[..., :c].astype(jnp.float32)
    return jnp.transpose(y, (0, 3, 1, 2))


# ----------------------------- main -----------------------------

if __name__ == "__main__":
    key = jax.random.PRNGKey(0)
    k_param, k_data = jax.random.split(key)

    # Small but structurally faithful config: input_nc=3, ngf=16 (vs 64),
    # n_blocks=2 (vs 6); batch=2, spatial=16x16.
    NGF, NBLK, INC = 16, 2, 3
    params = init_resnet_filter(k_param, input_nc=INC, ngf=NGF, n_blocks=NBLK)
    x = jax.random.normal(k_data, (2, INC, 16, 16), dtype=jnp.float32)

    out = resnet_filter_forward(params, x, input_nc=INC, ngf=NGF,
                                n_blocks=NBLK, use_tanh=True)
    out = jax.block_until_ready(out)
    assert out.shape == (2, 4 * NGF, 4, 4), out.shape   # [N, 4*ngf, H/4, W/4]
    assert bool(jnp.all(jnp.isfinite(out))), "non-finite output"
    print("KERNEL_OK")
</pallas_src>

<mosaic_0001>
module attributes {stable_mosaic.version = 11 : i64} {
  func.func @_cols_conv_kernel(%arg0: i32, %arg1: memref<256x256xbf16, #tpu.memory_space<vmem>>, %arg2: memref<256x128xbf16, #tpu.memory_space<vmem>>, %arg3: memref<256x128xbf16, #tpu.memory_space<vmem>>, %arg4: memref<1x2x128xf32, #tpu.memory_space<vmem>>) attributes {dimension_semantics = [#tpu.dimension_semantics<parallel>], iteration_bounds = array<i64: 2>, scalar_prefetch = 0 : i64, scratch_operands = 0 : i64, tpu.core_type = #tpu.core_type<tc>, window_params = [{transform_indices = @transform_0, window_bounds = array<i64: 256, 256>}, {pipeline_mode = #tpu.pipeline_mode<synchronous>, transform_indices = @transform_1, window_bounds = array<i64: 256, 128>}, {transform_indices = @transform_2, window_bounds = array<i64: 256, 128>}, {transform_indices = @transform_3, window_bounds = array<i64: 1, 2, 128>}]} {
    %c0 = arith.constant 0 : index
    %c0_0 = arith.constant 0 : index
    %0 = vector.load %arg1[%c0, %c0_0] : memref<256x256xbf16, #tpu.memory_space<vmem>>, vector<256x256xbf16>
    %c0_1 = arith.constant 0 : index
    %c0_2 = arith.constant 0 : index
    %1 = vector.load %arg2[%c0_1, %c0_2] : memref<256x128xbf16, #tpu.memory_space<vmem>>, vector<256x128xbf16>
    %cst = arith.constant dense<0.000000e+00> : vector<256x128xf32>
    %2 = tpu.matmul %0, %1, %cst {dimension_numbers = #tpu.dot_dimension_numbers<[1], [0], [0], [1], [0, 0, 1, 1], [], []>} : vector<256x256xbf16>, vector<256x128xbf16>, vector<256x128xf32> -> vector<256x128xf32>
    %3 = arith.truncf %2 : vector<256x128xf32> to vector<256x128xbf16>
    %c0_3 = arith.constant 0 : index
    %c0_4 = arith.constant 0 : index
    %4 = vector.load %arg3[%c0_3, %c0_4] : memref<256x128xbf16, #tpu.memory_space<vmem>>, vector<256x128xbf16>
    tpu.vector_store %arg3[%c0_3, %c0_4], %3 {strides = array<i32>} : memref<256x128xbf16, #tpu.memory_space<vmem>>, vector<256x128xbf16>,
    %cst_5 = arith.constant dense<0.000000e+00> : vector<128xf32>
    %5 = vector.multi_reduction <add>, %2, %cst_5 [0] : vector<256x128xf32> to vector<128xf32>
    %6 = vector.shape_cast %5 : vector<128xf32> to vector<1x128xf32>
    %7 = arith.mulf %2, %2 : vector<256x128xf32>
    %cst_6 = arith.constant dense<0.000000e+00> : vector<128xf32>
    %8 = vector.multi_reduction <add>, %7, %cst_6 [0] : vector<256x128xf32> to vector<128xf32>
    %9 = vector.shape_cast %8 : vector<128xf32> to vector<1x128xf32>
    %10 = tpu.concatenate %6, %9 in 0 : vector<1x128xf32>, vector<1x128xf32> -> vector<2x128xf32>
    %c0_7 = arith.constant 0 : index
    %c0_8 = arith.constant 0 : index
    %c0_9 = arith.constant 0 : index
    %11 = vector.load %arg4[%c0_7, %c0_8, %c0_9] : memref<1x2x128xf32, #tpu.memory_space<vmem>>, vector<1x2x128xf32>
    %12 = vector.shape_cast %11 : vector<1x2x128xf32> to vector<2x128xf32>
    %13 = vector.shape_cast %10 : vector<2x128xf32> to vector<1x2x128xf32>
    tpu.vector_store %arg4[%c0_7, %c0_8, %c0_9], %13 {strides = array<i32>} : memref<1x2x128xf32, #tpu.memory_space<vmem>>, vector<1x2x128xf32>,
    return
  }
  func.func @transform_0(%arg0: i32) -> (i32, i32) {
    %c0_i32 = arith.constant 0 : i32
    %c0_i32_0 = arith.constant 0 : i32
    return %arg0, %c0_i32 : i32, i32
  }
  func.func @transform_1(%arg0: i32) -> (i32, i32) {
    %c0_i32 = arith.constant 0 : i32
    %c0_i32_0 = arith.constant 0 : i32
    %c0_i32_1 = arith.constant 0 : i32
    return %c0_i32, %c0_i32_0 : i32, i32
  }
  func.func @transform_2(%arg0: i32) -> (i32, i32) {
    %c0_i32 = arith.constant 0 : i32
    %c0_i32_0 = arith.constant 0 : i32
    return %arg0, %c0_i32 : i32, i32
  }
  func.func @transform_3(%arg0: i32) -> (i32, i32, i32) {
    %c0_i32 = arith.constant 0 : i32
    %c0_i32_0 = arith.constant 0 : i32
    %c0_i32_1 = arith.constant 0 : i32
    return %arg0, %c0_i32, %c0_i32_0 : i32, i32, i32
  }
}

module attributes {stable_mosaic.version = 11 : i64} {
  func.func @_finalize_kernel(%arg0: i32, %arg1: memref<512x128xbf16, #tpu.memory_space<vmem>>, %arg2: memref<1x128xf32, #tpu.memory_space<vmem>>, %arg3: memref<1x128xf32, #tpu.memory_space<vmem>>, %arg4: memref<512x128xbf16, #tpu.memory_space<vmem>>) attributes {dimension_semantics = [#tpu.dimension_semantics<parallel>], iteration_bounds = array<i64: 1>, scalar_prefetch = 0 : i64, scratch_operands = 0 : i64, tpu.core_type = #tpu.core_type<tc>, window_params = [{transform_indices = @transform_0, window_bounds = array<i64: 512, 128>}, {pipeline_mode = #tpu.pipeline_mode<synchronous>, transform_indices = @transform_1, window_bounds = array<i64: 1, 128>}, {pipeline_mode = #tpu.pipeline_mode<synchronous>, transform_indices = @transform_2, window_bounds = array<i64: 1, 128>}, {transform_indices = @transform_3, window_bounds = array<i64: 512, 128>}]} {
    %c0 = arith.constant 0 : index
    %c0_0 = arith.constant 0 : index
    %0 = vector.load %arg1[%c0, %c0_0] : memref<512x128xbf16, #tpu.memory_space<vmem>>, vector<512x128xbf16>
    %1 = arith.extf %0 : vector<512x128xbf16> to vector<512x128xf32>
    %c0_1 = arith.constant 0 : index
    %c0_2 = arith.constant 0 : index
    %2 = vector.load %arg2[%c0_1, %c0_2] : memref<1x128xf32, #tpu.memory_space<vmem>>, vector<1x128xf32>
    %3 = vector.broadcast %2 : vector<1x128xf32> to vector<512x128xf32>
    %4 = arith.mulf %1, %3 : vector<512x128xf32>
    %c0_3 = arith.constant 0 : index
    %c0_4 = arith.constant 0 : index
    %5 = vector.load %arg3[%c0_3, %c0_4] : memref<1x128xf32, #tpu.memory_space<vmem>>, vector<1x128xf32>
    %6 = vector.broadcast %5 : vector<1x128xf32> to vector<512x128xf32>
    %7 = arith.addf %4, %6 : vector<512x128xf32>
    %cst = arith.constant 0.000000e+00 : f32
    %8 = vector.broadcast %cst : f32 to vector<512x128xf32>
    %9 = arith.maximumf %7, %8 : vector<512x128xf32>
    %10 = arith.truncf %9 : vector<512x128xf32> to vector<512x128xbf16>
    %c0_5 = arith.constant 0 : index
    %c0_6 = arith.constant 0 : index
    %11 = vector.load %arg4[%c0_5, %c0_6] : memref<512x128xbf16, #tpu.memory_space<vmem>>, vector<512x128xbf16>
    tpu.vector_store %arg4[%c0_5, %c0_6], %10 {strides = array<i32>} : memref<512x128xbf16, #tpu.memory_space<vmem>>, vector<512x128xbf16>,
    return
  }
  func.func @transform_0(%arg0: i32) -> (i32, i32) {
    %c0_i32 = arith.constant 0 : i32
    %c0_i32_0 = arith.constant 0 : i32
    return %arg0, %c0_i32 : i32, i32
  }
  func.func @transform_1(%arg0: i32) -> (i32, i32) {
    %c0_i32 = arith.constant 0 : i32
    %c0_i32_0 = arith.constant 0 : i32
    %c0_i32_1 = arith.constant 0 : i32
    return %c0_i32, %c0_i32_0 : i32, i32
  }
  func.func @transform_2(%arg0: i32) -> (i32, i32) {
    %c0_i32 = arith.constant 0 : i32
    %c0_i32_0 = arith.constant 0 : i32
    %c0_i32_1 = arith.constant 0 : i32
    return %c0_i32, %c0_i32_0 : i32, i32
  }
  func.func @transform_3(%arg0: i32) -> (i32, i32) {
    %c0_i32 = arith.constant 0 : i32
    %c0_i32_0 = arith.constant 0 : i32
    return %arg0, %c0_i32 : i32, i32
  }
}

module attributes {stable_mosaic.version = 11 : i64} {
  func.func @_cols_conv_kernel(%arg0: i32, %arg1: memref<64x256xbf16, #tpu.memory_space<vmem>>, %arg2: memref<256x128xbf16, #tpu.memory_space<vmem>>, %arg3: memref<64x128xbf16, #tpu.memory_space<vmem>>, %arg4: memref<1x2x128xf32, #tpu.memory_space<vmem>>) attributes {dimension_semantics = [#tpu.dimension_semantics<parallel>], iteration_bounds = array<i64: 2>, scalar_prefetch = 0 : i64, scratch_operands = 0 : i64, tpu.core_type = #tpu.core_type<tc>, window_params = [{transform_indices = @transform_0, window_bounds = array<i64: 64, 256>}, {pipeline_mode = #tpu.pipeline_mode<synchronous>, transform_indices = @transform_1, window_bounds = array<i64: 256, 128>}, {transform_indices = @transform_2, window_bounds = array<i64: 64, 128>}, {transform_indices = @transform_3, window_bounds = array<i64: 1, 2, 128>}]} {
    %c0 = arith.constant 0 : index
    %c0_0 = arith.constant 0 : index
    %0 = vector.load %arg1[%c0, %c0_0] : memref<64x256xbf16, #tpu.memory_space<vmem>>, vector<64x256xbf16>
    %c0_1 = arith.constant 0 : index
    %c0_2 = arith.constant 0 : index
    %1 = vector.load %arg2[%c0_1, %c0_2] : memref<256x128xbf16, #tpu.memory_space<vmem>>, vector<256x128xbf16>
    %cst = arith.constant dense<0.000000e+00> : vector<64x128xf32>
    %2 = tpu.matmul %0, %1, %cst {dimension_numbers = #tpu.dot_dimension_numbers<[1], [0], [0], [1], [0, 0, 1, 1], [], []>} : vector<64x256xbf16>, vector<256x128xbf16>, vector<64x128xf32> -> vector<64x128xf32>
    %3 = arith.truncf %2 : vector<64x128xf32> to vector<64x128xbf16>
    %c0_3 = arith.constant 0 : index
    %c0_4 = arith.constant 0 : index
    %4 = vector.load %arg3[%c0_3, %c0_4] : memref<64x128xbf16, #tpu.memory_space<vmem>>, vector<64x128xbf16>
    tpu.vector_store %arg3[%c0_3, %c0_4], %3 {strides = array<i32>} : memref<64x128xbf16, #tpu.memory_space<vmem>>, vector<64x128xbf16>,
    %cst_5 = arith.constant dense<0.000000e+00> : vector<128xf32>
    %5 = vector.multi_reduction <add>, %2, %cst_5 [0] : vector<64x128xf32> to vector<128xf32>
    %6 = vector.shape_cast %5 : vector<128xf32> to vector<1x128xf32>
    %7 = arith.mulf %2, %2 : vector<64x128xf32>
    %cst_6 = arith.constant dense<0.000000e+00> : vector<128xf32>
    %8 = vector.multi_reduction <add>, %7, %cst_6 [0] : vector<64x128xf32> to vector<128xf32>
    %9 = vector.shape_cast %8 : vector<128xf32> to vector<1x128xf32>
    %10 = tpu.concatenate %6, %9 in 0 : vector<1x128xf32>, vector<1x128xf32> -> vector<2x128xf32>
    %c0_7 = arith.constant 0 : index
    %c0_8 = arith.constant 0 : index
    %c0_9 = arith.constant 0 : index
    %11 = vector.load %arg4[%c0_7, %c0_8, %c0_9] : memref<1x2x128xf32, #tpu.memory_space<vmem>>, vector<1x2x128xf32>
    %12 = vector.shape_cast %11 : vector<1x2x128xf32> to vector<2x128xf32>
    %13 = vector.shape_cast %10 : vector<2x128xf32> to vector<1x2x128xf32>
    tpu.vector_store %arg4[%c0_7, %c0_8, %c0_9], %13 {strides = array<i32>} : memref<1x2x128xf32, #tpu.memory_space<vmem>>, vector<1x2x128xf32>,
    return
  }
  func.func @transform_0(%arg0: i32) -> (i32, i32) {
    %c0_i32 = arith.constant 0 : i32
    %c0_i32_0 = arith.constant 0 : i32
    return %arg0, %c0_i32 : i32, i32
  }
  func.func @transform_1(%arg0: i32) -> (i32, i32) {
    %c0_i32 = arith.constant 0 : i32
    %c0_i32_0 = arith.constant 0 : i32
    %c0_i32_1 = arith.constant 0 : i32
    return %c0_i32, %c0_i32_0 : i32, i32
  }
  func.func @transform_2(%arg0: i32) -> (i32, i32) {
    %c0_i32 = arith.constant 0 : i32
    %c0_i32_0 = arith.constant 0 : i32
    return %arg0, %c0_i32 : i32, i32
  }
  func.func @transform_3(%arg0: i32) -> (i32, i32, i32) {
    %c0_i32 = arith.constant 0 : i32
    %c0_i32_0 = arith.constant 0 : i32
    %c0_i32_1 = arith.constant 0 : i32
    return %arg0, %c0_i32, %c0_i32_0 : i32, i32, i32
  }
}

module attributes {stable_mosaic.version = 11 : i64} {
  func.func @_finalize_kernel(%arg0: i32, %arg1: memref<128x128xbf16, #tpu.memory_space<vmem>>, %arg2: memref<1x128xf32, #tpu.memory_space<vmem>>, %arg3: memref<1x128xf32, #tpu.memory_space<vmem>>, %arg4: memref<128x128xbf16, #tpu.memory_space<vmem>>) attributes {dimension_semantics = [#tpu.dimension_semantics<parallel>], iteration_bounds = array<i64: 1>, scalar_prefetch = 0 : i64, scratch_operands = 0 : i64, tpu.core_type = #tpu.core_type<tc>, window_params = [{transform_indices = @transform_0, window_bounds = array<i64: 128, 128>}, {pipeline_mode = #tpu.pipeline_mode<synchronous>, transform_indices = @transform_1, window_bounds = array<i64: 1, 128>}, {pipeline_mode = #tpu.pipeline_mode<synchronous>, transform_indices = @transform_2, window_bounds = array<i64: 1, 128>}, {transform_indices = @transform_3, window_bounds = array<i64: 128, 128>}]} {
    %c0 = arith.constant 0 : index
    %c0_0 = arith.constant 0 : index
    %0 = vector.load %arg1[%c0, %c0_0] : memref<128x128xbf16, #tpu.memory_space<vmem>>, vector<128x128xbf16>
    %1 = arith.extf %0 : vector<128x128xbf16> to vector<128x128xf32>
    %c0_1 = arith.constant 0 : index
    %c0_2 = arith.constant 0 : index
    %2 = vector.load %arg2[%c0_1, %c0_2] : memref<1x128xf32, #tpu.memory_space<vmem>>, vector<1x128xf32>
    %3 = vector.broadcast %2 : vector<1x128xf32> to vector<128x128xf32>
    %4 = arith.mulf %1, %3 : vector<128x128xf32>
    %c0_3 = arith.constant 0 : index
    %c0_4 = arith.constant 0 : index
    %5 = vector.load %arg3[%c0_3, %c0_4] : memref<1x128xf32, #tpu.memory_space<vmem>>, vector<1x128xf32>
    %6 = vector.broadcast %5 : vector<1x128xf32> to vector<128x128xf32>
    %7 = arith.addf %4, %6 : vector<128x128xf32>
    %cst = arith.constant 0.000000e+00 : f32
    %8 = vector.broadcast %cst : f32 to vector<128x128xf32>
    %9 = arith.maximumf %7, %8 : vector<128x128xf32>
    %10 = arith.truncf %9 : vector<128x128xf32> to vector<128x128xbf16>
    %c0_5 = arith.constant 0 : index
    %c0_6 = arith.constant 0 : index
    %11 = vector.load %arg4[%c0_5, %c0_6] : memref<128x128xbf16, #tpu.memory_space<vmem>>, vector<128x128xbf16>
    tpu.vector_store %arg4[%c0_5, %c0_6], %10 {strides = array<i32>} : memref<128x128xbf16, #tpu.memory_space<vmem>>, vector<128x128xbf16>,
    return
  }
  func.func @transform_0(%arg0: i32) -> (i32, i32) {
    %c0_i32 = arith.constant 0 : i32
    %c0_i32_0 = arith.constant 0 : i32
    return %arg0, %c0_i32 : i32, i32
  }
  func.func @transform_1(%arg0: i32) -> (i32, i32) {
    %c0_i32 = arith.constant 0 : i32
    %c0_i32_0 = arith.constant 0 : i32
    %c0_i32_1 = arith.constant 0 : i32
    return %c0_i32, %c0_i32_0 : i32, i32
  }
  func.func @transform_2(%arg0: i32) -> (i32, i32) {
    %c0_i32 = arith.constant 0 : i32
    %c0_i32_0 = arith.constant 0 : i32
    %c0_i32_1 = arith.constant 0 : i32
    return %c0_i32, %c0_i32_0 : i32, i32
  }
  func.func @transform_3(%arg0: i32) -> (i32, i32) {
    %c0_i32 = arith.constant 0 : i32
    %c0_i32_0 = arith.constant 0 : i32
    return %arg0, %c0_i32 : i32, i32
  }
}

module attributes {stable_mosaic.version = 11 : i64} {
  func.func @_cols_conv_kernel(%arg0: i32, %arg1: memref<16x384xbf16, #tpu.memory_space<vmem>>, %arg2: memref<384x128xbf16, #tpu.memory_space<vmem>>, %arg3: memref<16x128xbf16, #tpu.memory_space<vmem>>, %arg4: memref<1x2x128xf32, #tpu.memory_space<vmem>>) attributes {dimension_semantics = [#tpu.dimension_semantics<parallel>], iteration_bounds = array<i64: 2>, scalar_prefetch = 0 : i64, scratch_operands = 0 : i64, tpu.core_type = #tpu.core_type<tc>, window_params = [{transform_indices = @transform_0, window_bounds = array<i64: 16, 384>}, {pipeline_mode = #tpu.pipeline_mode<synchronous>, transform_indices = @transform_1, window_bounds = array<i64: 384, 128>}, {transform_indices = @transform_2, window_bounds = array<i64: 16, 128>}, {transform_indices = @transform_3, window_bounds = array<i64: 1, 2, 128>}]} {
    %c0 = arith.constant 0 : index
    %c0_0 = arith.constant 0 : index
    %0 = vector.load %arg1[%c0, %c0_0] : memref<16x384xbf16, #tpu.memory_space<vmem>>, vector<16x384xbf16>
    %c0_1 = arith.constant 0 : index
    %c0_2 = arith.constant 0 : index
    %1 = vector.load %arg2[%c0_1, %c0_2] : memref<384x128xbf16, #tpu.memory_space<vmem>>, vector<384x128xbf16>
    %cst = arith.constant dense<0.000000e+00> : vector<16x128xf32>
    %2 = tpu.matmul %0, %1, %cst {dimension_numbers = #tpu.dot_dimension_numbers<[1], [0], [0], [1], [0, 0, 1, 1], [], []>} : vector<16x384xbf16>, vector<384x128xbf16>, vector<16x128xf32> -> vector<16x128xf32>
    %3 = arith.truncf %2 : vector<16x128xf32> to vector<16x128xbf16>
    %c0_3 = arith.constant 0 : index
    %c0_4 = arith.constant 0 : index
    %4 = vector.load %arg3[%c0_3, %c0_4] : memref<16x128xbf16, #tpu.memory_space<vmem>>, vector<16x128xbf16>
    tpu.vector_store %arg3[%c0_3, %c0_4], %3 {strides = array<i32>} : memref<16x128xbf16, #tpu.memory_space<vmem>>, vector<16x128xbf16>,
    %cst_5 = arith.constant dense<0.000000e+00> : vector<128xf32>
    %5 = vector.multi_reduction <add>, %2, %cst_5 [0] : vector<16x128xf32> to vector<128xf32>
    %6 = vector.shape_cast %5 : vector<128xf32> to vector<1x128xf32>
    %7 = arith.mulf %2, %2 : vector<16x128xf32>
    %cst_6 = arith.constant dense<0.000000e+00> : vector<128xf32>
    %8 = vector.multi_reduction <add>, %7, %cst_6 [0] : vector<16x128xf32> to vector<128xf32>
    %9 = vector.shape_cast %8 : vector<128xf32> to vector<1x128xf32>
    %10 = tpu.concatenate %6, %9 in 0 : vector<1x128xf32>, vector<1x128xf32> -> vector<2x128xf32>
    %c0_7 = arith.constant 0 : index
    %c0_8 = arith.constant 0 : index
    %c0_9 = arith.constant 0 : index
    %11 = vector.load %arg4[%c0_7, %c0_8, %c0_9] : memref<1x2x128xf32, #tpu.memory_space<vmem>>, vector<1x2x128xf32>
    %12 = vector.shape_cast %11 : vector<1x2x128xf32> to vector<2x128xf32>
    %13 = vector.shape_cast %10 : vector<2x128xf32> to vector<1x2x128xf32>
    tpu.vector_store %arg4[%c0_7, %c0_8, %c0_9], %13 {strides = array<i32>} : memref<1x2x128xf32, #tpu.memory_space<vmem>>, vector<1x2x128xf32>,
    return
  }
  func.func @transform_0(%arg0: i32) -> (i32, i32) {
    %c0_i32 = arith.constant 0 : i32
    %c0_i32_0 = arith.constant 0 : i32
    return %arg0, %c0_i32 : i32, i32
  }
  func.func @transform_1(%arg0: i32) -> (i32, i32) {
    %c0_i32 = arith.constant 0 : i32
    %c0_i32_0 = arith.constant 0 : i32
    %c0_i32_1 = arith.constant 0 : i32
    return %c0_i32, %c0_i32_0 : i32, i32
  }
  func.func @transform_2(%arg0: i32) -> (i32, i32) {
    %c0_i32 = arith.constant 0 : i32
    %c0_i32_0 = arith.constant 0 : i32
    return %arg0, %c0_i32 : i32, i32
  }
  func.func @transform_3(%arg0: i32) -> (i32, i32, i32) {
    %c0_i32 = arith.constant 0 : i32
    %c0_i32_0 = arith.constant 0 : i32
    %c0_i32_1 = arith.constant 0 : i32
    return %arg0, %c0_i32, %c0_i32_0 : i32, i32, i32
  }
}

module attributes {stable_mosaic.version = 11 : i64} {
  func.func @_finalize_kernel(%arg0: i32, %arg1: memref<32x128xbf16, #tpu.memory_space<vmem>>, %arg2: memref<1x128xf32, #tpu.memory_space<vmem>>, %arg3: memref<1x128xf32, #tpu.memory_space<vmem>>, %arg4: memref<32x128xbf16, #tpu.memory_space<vmem>>) attributes {dimension_semantics = [#tpu.dimension_semantics<parallel>], iteration_bounds = array<i64: 1>, scalar_prefetch = 0 : i64, scratch_operands = 0 : i64, tpu.core_type = #tpu.core_type<tc>, window_params = [{transform_indices = @transform_0, window_bounds = array<i64: 32, 128>}, {pipeline_mode = #tpu.pipeline_mode<synchronous>, transform_indices = @transform_1, window_bounds = array<i64: 1, 128>}, {pipeline_mode = #tpu.pipeline_mode<synchronous>, transform_indices = @transform_2, window_bounds = array<i64: 1, 128>}, {transform_indices = @transform_3, window_bounds = array<i64: 32, 128>}]} {
    %c0 = arith.constant 0 : index
    %c0_0 = arith.constant 0 : index
    %0 = vector.load %arg1[%c0, %c0_0] : memref<32x128xbf16, #tpu.memory_space<vmem>>, vector<32x128xbf16>
    %1 = arith.extf %0 : vector<32x128xbf16> to vector<32x128xf32>
    %c0_1 = arith.constant 0 : index
    %c0_2 = arith.constant 0 : index
    %2 = vector.load %arg2[%c0_1, %c0_2] : memref<1x128xf32, #tpu.memory_space<vmem>>, vector<1x128xf32>
    %3 = vector.broadcast %2 : vector<1x128xf32> to vector<32x128xf32>
    %4 = arith.mulf %1, %3 : vector<32x128xf32>
    %c0_3 = arith.constant 0 : index
    %c0_4 = arith.constant 0 : index
    %5 = vector.load %arg3[%c0_3, %c0_4] : memref<1x128xf32, #tpu.memory_space<vmem>>, vector<1x128xf32>
    %6 = vector.broadcast %5 : vector<1x128xf32> to vector<32x128xf32>
    %7 = arith.addf %4, %6 : vector<32x128xf32>
    %cst = arith.constant 0.000000e+00 : f32
    %8 = vector.broadcast %cst : f32 to vector<32x128xf32>
    %9 = arith.maximumf %7, %8 : vector<32x128xf32>
    %10 = arith.truncf %9 : vector<32x128xf32> to vector<32x128xbf16>
    %c0_5 = arith.constant 0 : index
    %c0_6 = arith.constant 0 : index
    %11 = vector.load %arg4[%c0_5, %c0_6] : memref<32x128xbf16, #tpu.memory_space<vmem>>, vector<32x128xbf16>
    tpu.vector_store %arg4[%c0_5, %c0_6], %10 {strides = array<i32>} : memref<32x128xbf16, #tpu.memory_space<vmem>>, vector<32x128xbf16>,
    return
  }
  func.func @transform_0(%arg0: i32) -> (i32, i32) {
    %c0_i32 = arith.constant 0 : i32
    %c0_i32_0 = arith.constant 0 : i32
    return %arg0, %c0_i32 : i32, i32
  }
  func.func @transform_1(%arg0: i32) -> (i32, i32) {
    %c0_i32 = arith.constant 0 : i32
    %c0_i32_0 = arith.constant 0 : i32
    %c0_i32_1 = arith.constant 0 : i32
    return %c0_i32, %c0_i32_0 : i32, i32
  }
  func.func @transform_2(%arg0: i32) -> (i32, i32) {
    %c0_i32 = arith.constant 0 : i32
    %c0_i32_0 = arith.constant 0 : i32
    %c0_i32_1 = arith.constant 0 : i32
    return %c0_i32, %c0_i32_0 : i32, i32
  }
  func.func @transform_3(%arg0: i32) -> (i32, i32) {
    %c0_i32 = arith.constant 0 : i32
    %c0_i32_0 = arith.constant 0 : i32
    return %arg0, %c0_i32 : i32, i32
  }
}

module attributes {stable_mosaic.version = 11 : i64} {
  func.func @_direct_conv_kernel(%arg0: i32, %arg1: i32, %arg2: memref<1x6x6x128xbf16, #tpu.memory_space<vmem>>, %arg3: memref<1152x128xbf16, #tpu.memory_space<vmem>>, %arg4: memref<1x1x16x128xbf16, #tpu.memory_space<vmem>>, %arg5: memref<1x1x2x128xf32, #tpu.memory_space<vmem>>) attributes {dimension_semantics = [#tpu.dimension_semantics<parallel>, #tpu.dimension_semantics<parallel>], iteration_bounds = array<i64: 2, 1>, scalar_prefetch = 0 : i64, scratch_operands = 0 : i64, tpu.core_type = #tpu.core_type<tc>, window_params = [{transform_indices = @transform_0, window_bounds = array<i64: 1, 6, 6, 128>}, {pipeline_mode = #tpu.pipeline_mode<synchronous>, transform_indices = @transform_1, window_bounds = array<i64: 1152, 128>}, {transform_indices = @transform_2, window_bounds = array<i64: 1, 1, 16, 128>}, {transform_indices = @transform_3, window_bounds = array<i64: 1, 1, 2, 128>}]} {
    %c4_i32 = arith.constant 4 : i32
    %0 = arith.muli %arg1, %c4_i32 : i32
    %c0_i32 = arith.constant 0 : i32
    %1 = arith.addi %0, %c0_i32 : i32
    %c0 = arith.constant 0 : index
    %2 = arith.index_cast %1 : i32 to index
    %c0_0 = arith.constant 0 : index
    %c0_1 = arith.constant 0 : index
    %3 = vector.load %arg2[%c0, %2, %c0_0, %c0_1] : memref<1x6x6x128xbf16, #tpu.memory_space<vmem>>, vector<1x4x4x128xbf16>
    %4 = vector.shape_cast %3 : vector<1x4x4x128xbf16> to vector<4x4x128xbf16>
    %5 = vector.shape_cast %4 : vector<4x4x128xbf16> to vector<16x128xbf16>
    %c0_i32_2 = arith.constant 0 : i32
    %6 = arith.addi %0, %c0_i32_2 : i32
    %c0_3 = arith.constant 0 : index
    %7 = arith.index_cast %6 : i32 to index
    %c1 = arith.constant 1 : index
    %c0_4 = arith.constant 0 : index
    %8 = vector.load %arg2[%c0_3, %7, %c1, %c0_4] : memref<1x6x6x128xbf16, #tpu.memory_space<vmem>>, vector<1x4x4x128xbf16>
    %9 = vector.shape_cast %8 : vector<1x4x4x128xbf16> to vector<4x4x128xbf16>
    %10 = vector.shape_cast %9 : vector<4x4x128xbf16> to vector<16x128xbf16>
    %c0_i32_5 = arith.constant 0 : i32
    %11 = arith.addi %0, %c0_i32_5 : i32
    %c0_6 = arith.constant 0 : index
    %12 = arith.index_cast %11 : i32 to index
    %c2 = arith.constant 2 : index
    %c0_7 = arith.constant 0 : index
    %13 = vector.load %arg2[%c0_6, %12, %c2, %c0_7] : memref<1x6x6x128xbf16, #tpu.memory_space<vmem>>, vector<1x4x4x128xbf16>
    %14 = vector.shape_cast %13 : vector<1x4x4x128xbf16> to vector<4x4x128xbf16>
    %15 = vector.shape_cast %14 : vector<4x4x128xbf16> to vector<16x128xbf16>
    %c1_i32 = arith.constant 1 : i32
    %16 = arith.addi %0, %c1_i32 : i32
    %c0_8 = arith.constant 0 : index
    %17 = arith.index_cast %16 : i32 to index
    %c0_9 = arith.constant 0 : index
    %c0_10 = arith.constant 0 : index
    %18 = vector.load %arg2[%c0_8, %17, %c0_9, %c0_10] : memref<1x6x6x128xbf16, #tpu.memory_space<vmem>>, vector<1x4x4x128xbf16>
    %19 = vector.shape_cast %18 : vector<1x4x4x128xbf16> to vector<4x4x128xbf16>
    %20 = vector.shape_cast %19 : vector<4x4x128xbf16> to vector<16x128xbf16>
    %c1_i32_11 = arith.constant 1 : i32
    %21 = arith.addi %0, %c1_i32_11 : i32
    %c0_12 = arith.constant 0 : index
    %22 = arith.index_cast %21 : i32 to index
    %c1_13 = arith.constant 1 : index
    %c0_14 = arith.constant 0 : index
    %23 = vector.load %arg2[%c0_12, %22, %c1_13, %c0_14] : memref<1x6x6x128xbf16, #tpu.memory_space<vmem>>, vector<1x4x4x128xbf16>
    %24 = vector.shape_cast %23 : vector<1x4x4x128xbf16> to vector<4x4x128xbf16>
    %25 = vector.shape_cast %24 : vector<4x4x128xbf16> to vector<16x128xbf16>
    %c1_i32_15 = arith.constant 1 : i32
    %26 = arith.addi %0, %c1_i32_15 : i32
    %c0_16 = arith.constant 0 : index
    %27 = arith.index_cast %26 : i32 to index
    %c2_17 = arith.constant 2 : index
    %c0_18 = arith.constant 0 : index
    %28 = vector.load %arg2[%c0_16, %27, %c2_17, %c0_18] : memref<1x6x6x128xbf16, #tpu.memory_space<vmem>>, vector<1x4x4x128xbf16>
    %29 = vector.shape_cast %28 : vector<1x4x4x128xbf16> to vector<4x4x128xbf16>
    %30 = vector.shape_cast %29 : vector<4x4x128xbf16> to vector<16x128xbf16>
    %c2_i32 = arith.constant 2 : i32
    %31 = arith.addi %0, %c2_i32 : i32
    %c0_19 = arith.constant 0 : index
    %32 = arith.index_cast %31 : i32 to index
    %c0_20 = arith.constant 0 : index
    %c0_21 = arith.constant 0 : index
    %33 = vector.load %arg2[%c0_19, %32, %c0_20, %c0_21] : memref<1x6x6x128xbf16, #tpu.memory_space<vmem>>, vector<1x4x4x128xbf16>
    %34 = vector.shape_cast %33 : vector<1x4x4x128xbf16> to vector<4x4x128xbf16>
    %35 = vector.shape_cast %34 : vector<4x4x128xbf16> to vector<16x128xbf16>
    %c2_i32_22 = arith.constant 2 : i32
    %36 = arith.addi %0, %c2_i32_22 : i32
    %c0_23 = arith.constant 0 : index
    %37 = arith.index_cast %36 : i32 to index
    %c1_24 = arith.constant 1 : index
    %c0_25 = arith.constant 0 : index
    %38 = vector.load %arg2[%c0_23, %37, %c1_24, %c0_25] : memref<1x6x6x128xbf16, #tpu.memory_space<vmem>>, vector<1x4x4x128xbf16>
    %39 = vector.shape_cast %38 : vector<1x4x4x128xbf16> to vector<4x4x128xbf16>
    %40 = vector.shape_cast %39 : vector<4x4x128xbf16> to vector<16x128xbf16>
    %c2_i32_26 = arith.constant 2 : i32
    %41 = arith.addi %0, %c2_i32_26 : i32
    %c0_27 = arith.constant 0 : index
    %42 = arith.index_cast %41 : i32 to index
    %c2_28 = arith.constant 2 : index
    %c0_29 = arith.constant 0 : index
    %43 = vector.load %arg2[%c0_27, %42, %c2_28, %c0_29] : memref<1x6x6x128xbf16, #tpu.memory_space<vmem>>, vector<1x4x4x128xbf16>
    %44 = vector.shape_cast %43 : vector<1x4x4x128xbf16> to vector<4x4x128xbf16>
    %45 = vector.shape_cast %44 : vector<4x4x128xbf16> to vector<16x128xbf16>
    %46 = tpu.concatenate %5, %10, %15, %20, %25, %30, %35, %40, %45 in 1 : vector<16x128xbf16>, vector<16x128xbf16>, vector<16x128xbf16>, vector<16x128xbf16>, vector<16x128xbf16>, vector<16x128xbf16>, vector<16x128xbf16>, vector<16x128xbf16>, vector<16x128xbf16> -> vector<16x1152xbf16>
    %c0_30 = arith.constant 0 : index
    %c0_31 = arith.constant 0 : index
    %47 = vector.load %arg3[%c0_30, %c0_31] : memref<1152x128xbf16, #tpu.memory_space<vmem>>, vector<1152x128xbf16>
    %cst = arith.constant dense<0.000000e+00> : vector<16x128xf32>
    %48 = tpu.matmul %46, %47, %cst {dimension_numbers = #tpu.dot_dimension_numbers<[1], [0], [0], [1], [0, 0, 1, 1], [], []>} : vector<16x1152xbf16>, vector<1152x128xbf16>, vector<16x128xf32> -> vector<16x128xf32>
    %49 = arith.truncf %48 : vector<16x128xf32> to vector<16x128xbf16>
    %c0_32 = arith.constant 0 : index
    %c0_33 = arith.constant 0 : index
    %c0_34 = arith.constant 0 : index
    %c0_35 = arith.constant 0 : index
    %50 = vector.load %arg4[%c0_32, %c0_33, %c0_34, %c0_35] : memref<1x1x16x128xbf16, #tpu.memory_space<vmem>>, vector<1x1x16x128xbf16>
    %51 = vector.shape_cast %50 : vector<1x1x16x128xbf16> to vector<16x128xbf16>
    %52 = vector.shape_cast %49 : vector<16x128xbf16> to vector<1x1x16x128xbf16>
    tpu.vector_store %arg4[%c0_32, %c0_33, %c0_34, %c0_35], %52 {strides = array<i32>} : memref<1x1x16x128xbf16, #tpu.memory_space<vmem>>, vector<1x1x16x128xbf16>,
    %cst_36 = arith.constant dense<0.000000e+00> : vector<128xf32>
    %53 = vector.multi_reduction <add>, %48, %cst_36 [0] : vector<16x128xf32> to vector<128xf32>
    %54 = vector.shape_cast %53 : vector<128xf32> to vector<1x128xf32>
    %55 = arith.mulf %48, %48 : vector<16x128xf32>
    %cst_37 = arith.constant dense<0.000000e+00> : vector<128xf32>
    %56 = vector.multi_reduction <add>, %55, %cst_37 [0] : vector<16x128xf32> to vector<128xf32>
    %57 = vector.shape_cast %56 : vector<128xf32> to vector<1x128xf32>
    %58 = tpu.concatenate %54, %57 in 0 : vector<1x128xf32>, vector<1x128xf32> -> vector<2x128xf32>
    %c0_38 = arith.constant 0 : index
    %c0_39 = arith.constant 0 : index
    %c0_40 = arith.constant 0 : index
    %c0_41 = arith.constant 0 : index
    %59 = vector.load %arg5[%c0_38, %c0_39, %c0_40, %c0_41] : memref<1x1x2x128xf32, #tpu.memory_space<vmem>>, vector<1x1x2x128xf32>
    %60 = vector.shape_cast %59 : vector<1x1x2x128xf32> to vector<2x128xf32>
    %61 = vector.shape_cast %58 : vector<2x128xf32> to vector<1x1x2x128xf32>
    tpu.vector_store %arg5[%c0_38, %c0_39, %c0_40, %c0_41], %61 {strides = array<i32>} : memref<1x1x2x128xf32, #tpu.memory_space<vmem>>, vector<1x1x2x128xf32>,
    return
  }
  func.func @transform_0(%arg0: i32, %arg1: i32) -> (i32, i32, i32, i32) {
    %c0_i32 = arith.constant 0 : i32
    %c0_i32_0 = arith.constant 0 : i32
    %c0_i32_1 = arith.constant 0 : i32
    %c0_i32_2 = arith.constant 0 : i32
    return %arg0, %c0_i32, %c0_i32_0, %c0_i32_1 : i32, i32, i32, i32
  }
  func.func @transform_1(%arg0: i32, %arg1: i32) -> (i32, i32) {
    %c0_i32 = arith.constant 0 : i32
    %c0_i32_0 = arith.constant 0 : i32
    %c0_i32_1 = arith.constant 0 : i32
    return %c0_i32, %c0_i32_0 : i32, i32
  }
  func.func @transform_2(%arg0: i32, %arg1: i32) -> (i32, i32, i32, i32) {
    %c0_i32 = arith.constant 0 : i32
    %c0_i32_0 = arith.constant 0 : i32
    %c0_i32_1 = arith.constant 0 : i32
    return %arg0, %arg1, %c0_i32, %c0_i32_0 : i32, i32, i32, i32
  }
  func.func @transform_3(%arg0: i32, %arg1: i32) -> (i32, i32, i32, i32) {
    %c0_i32 = arith.constant 0 : i32
    %c0_i32_0 = arith.constant 0 : i32
    %c0_i32_1 = arith.constant 0 : i32
    return %arg0, %arg1, %c0_i32, %c0_i32_0 : i32, i32, i32, i32
  }
}

module attributes {stable_mosaic.version = 11 : i64} {
  func.func @_finalize_kernel(%arg0: i32, %arg1: memref<32x128xbf16, #tpu.memory_space<vmem>>, %arg2: memref<1x128xf32, #tpu.memory_space<vmem>>, %arg3: memref<1x128xf32, #tpu.memory_space<vmem>>, %arg4: memref<32x128xbf16, #tpu.memory_space<vmem>>, %arg5: memref<32x128xbf16, #tpu.memory_space<vmem>>) attributes {dimension_semantics = [#tpu.dimension_semantics<parallel>], iteration_bounds = array<i64: 1>, scalar_prefetch = 0 : i64, scratch_operands = 0 : i64, tpu.core_type = #tpu.core_type<tc>, window_params = [{transform_indices = @transform_0, window_bounds = array<i64: 32, 128>}, {pipeline_mode = #tpu.pipeline_mode<synchronous>, transform_indices = @transform_1, window_bounds = array<i64: 1, 128>}, {pipeline_mode = #tpu.pipeline_mode<synchronous>, transform_indices = @transform_2, window_bounds = array<i64: 1, 128>}, {transform_indices = @transform_3, window_bounds = array<i64: 32, 128>}, {transform_indices = @transform_4, window_bounds = array<i64: 32, 128>}]} {
    %c0 = arith.constant 0 : index
    %c0_0 = arith.constant 0 : index
    %0 = vector.load %arg1[%c0, %c0_0] : memref<32x128xbf16, #tpu.memory_space<vmem>>, vector<32x128xbf16>
    %1 = arith.extf %0 : vector<32x128xbf16> to vector<32x128xf32>
    %c0_1 = arith.constant 0 : index
    %c0_2 = arith.constant 0 : index
    %2 = vector.load %arg2[%c0_1, %c0_2] : memref<1x128xf32, #tpu.memory_space<vmem>>, vector<1x128xf32>
    %3 = vector.broadcast %2 : vector<1x128xf32> to vector<32x128xf32>
    %4 = arith.mulf %1, %3 : vector<32x128xf32>
    %c0_3 = arith.constant 0 : index
    %c0_4 = arith.constant 0 : index
    %5 = vector.load %arg3[%c0_3, %c0_4] : memref<1x128xf32, #tpu.memory_space<vmem>>, vector<1x128xf32>
    %6 = vector.broadcast %5 : vector<1x128xf32> to vector<32x128xf32>
    %7 = arith.addf %4, %6 : vector<32x128xf32>
    %c0_5 = arith.constant 0 : index
    %c0_6 = arith.constant 0 : index
    %8 = vector.load %arg4[%c0_5, %c0_6] : memref<32x128xbf16, #tpu.memory_space<vmem>>, vector<32x128xbf16>
    %9 = arith.extf %8 : vector<32x128xbf16> to vector<32x128xf32>
    %10 = arith.addf %7, %9 : vector<32x128xf32>
    %11 = arith.truncf %10 : vector<32x128xf32> to vector<32x128xbf16>
    %c0_7 = arith.constant 0 : index
    %c0_8 = arith.constant 0 : index
    %12 = vector.load %arg5[%c0_7, %c0_8] : memref<32x128xbf16, #tpu.memory_space<vmem>>, vector<32x128xbf16>
    tpu.vector_store %arg5[%c0_7, %c0_8], %11 {strides = array<i32>} : memref<32x128xbf16, #tpu.memory_space<vmem>>, vector<32x128xbf16>,
    return
  }
  func.func @transform_0(%arg0: i32) -> (i32, i32) {
    %c0_i32 = arith.constant 0 : i32
    %c0_i32_0 = arith.constant 0 : i32
    return %arg0, %c0_i32 : i32, i32
  }
  func.func @transform_1(%arg0: i32) -> (i32, i32) {
    %c0_i32 = arith.constant 0 : i32
    %c0_i32_0 = arith.constant 0 : i32
    %c0_i32_1 = arith.constant 0 : i32
    return %c0_i32, %c0_i32_0 : i32, i32
  }
  func.func @transform_2(%arg0: i32) -> (i32, i32) {
    %c0_i32 = arith.constant 0 : i32
    %c0_i32_0 = arith.constant 0 : i32
    %c0_i32_1 = arith.constant 0 : i32
    return %c0_i32, %c0_i32_0 : i32, i32
  }
  func.func @transform_3(%arg0: i32) -> (i32, i32) {
    %c0_i32 = arith.constant 0 : i32
    %c0_i32_0 = arith.constant 0 : i32
    return %arg0, %c0_i32 : i32, i32
  }
  func.func @transform_4(%arg0: i32) -> (i32, i32) {
    %c0_i32 = arith.constant 0 : i32
    %c0_i32_0 = arith.constant 0 : i32
    return %arg0, %c0_i32 : i32, i32
  }
}

module attributes {stable_mosaic.version = 11 : i64} {
  func.func @_finalize_kernel(%arg0: i32, %arg1: memref<32x128xbf16, #tpu.memory_space<vmem>>, %arg2: memref<32x128xbf16, #tpu.memory_space<vmem>>, %arg3: memref<32x128xf32, #tpu.memory_space<vmem>>) attributes {dimension_semantics = [#tpu.dimension_semantics<parallel>], iteration_bounds = array<i64: 1>, scalar_prefetch = 0 : i64, scratch_operands = 0 : i64, tpu.core_type = #tpu.core_type<tc>, window_params = [{transform_indices = @transform_0, window_bounds = array<i64: 32, 128>}, {transform_indices = @transform_1, window_bounds = array<i64: 32, 128>}, {transform_indices = @transform_2, window_bounds = array<i64: 32, 128>}]} {
    %c0 = arith.constant 0 : index
    %c0_0 = arith.constant 0 : index
    %0 = vector.load %arg1[%c0, %c0_0] : memref<32x128xbf16, #tpu.memory_space<vmem>>, vector<32x128xbf16>
    %1 = arith.extf %0 : vector<32x128xbf16> to vector<32x128xf32>
    %c0_1 = arith.constant 0 : index
    %c0_2 = arith.constant 0 : index
    %2 = vector.load %arg2[%c0_1, %c0_2] : memref<32x128xbf16, #tpu.memory_space<vmem>>, vector<32x128xbf16>
    %3 = arith.extf %2 : vector<32x128xbf16> to vector<32x128xf32>
    %4 = arith.addf %1, %3 : vector<32x128xf32>
    %5 = math.tanh %4 : vector<32x128xf32>
    %c0_3 = arith.constant 0 : index
    %c0_4 = arith.constant 0 : index
    %6 = vector.load %arg3[%c0_3, %c0_4] : memref<32x128xf32, #tpu.memory_space<vmem>>, vector<32x128xf32>
    tpu.vector_store %arg3[%c0_3, %c0_4], %5 {strides = array<i32>} : memref<32x128xf32, #tpu.memory_space<vmem>>, vector<32x128xf32>,
    return
  }
  func.func @transform_0(%arg0: i32) -> (i32, i32) {
    %c0_i32 = arith.constant 0 : i32
    %c0_i32_0 = arith.constant 0 : i32
    return %arg0, %c0_i32 : i32, i32
  }
  func.func @transform_1(%arg0: i32) -> (i32, i32) {
    %c0_i32 = arith.constant 0 : i32
    %c0_i32_0 = arith.constant 0 : i32
    return %arg0, %c0_i32 : i32, i32
  }
  func.func @transform_2(%arg0: i32) -> (i32, i32) {
    %c0_i32 = arith.constant 0 : i32
    %c0_i32_0 = arith.constant 0 : i32
    return %arg0, %c0_i32 : i32, i32
  }
}

module attributes {stable_mosaic.version = 11 : i64} {
  func.func @_direct_conv_kernel(%arg0: i32, %arg1: i32, %arg2: memref<1x6x6x128xbf16, #tpu.memory_space<vmem>>, %arg3: memref<1152x128xbf16, #tpu.memory_space<vmem>>, %arg4: memref<1x1x16x128xbf16, #tpu.memory_space<vmem>>) attributes {dimension_semantics = [#tpu.dimension_semantics<parallel>, #tpu.dimension_semantics<parallel>], iteration_bounds = array<i64: 2, 1>, scalar_prefetch = 0 : i64, scratch_operands = 0 : i64, tpu.core_type = #tpu.core_type<tc>, window_params = [{transform_indices = @transform_0, window_bounds = array<i64: 1, 6, 6, 128>}, {pipeline_mode = #tpu.pipeline_mode<synchronous>, transform_indices = @transform_1, window_bounds = array<i64: 1152, 128>}, {transform_indices = @transform_2, window_bounds = array<i64: 1, 1, 16, 128>}]} {
    %c4_i32 = arith.constant 4 : i32
    %0 = arith.muli %arg1, %c4_i32 : i32
    %c0_i32 = arith.constant 0 : i32
    %1 = arith.addi %0, %c0_i32 : i32
    %c0 = arith.constant 0 : index
    %2 = arith.index_cast %1 : i32 to index
    %c0_0 = arith.constant 0 : index
    %c0_1 = arith.constant 0 : index
    %3 = vector.load %arg2[%c0, %2, %c0_0, %c0_1] : memref<1x6x6x128xbf16, #tpu.memory_space<vmem>>, vector<1x4x4x128xbf16>
    %4 = vector.shape_cast %3 : vector<1x4x4x128xbf16> to vector<4x4x128xbf16>
    %5 = vector.shape_cast %4 : vector<4x4x128xbf16> to vector<16x128xbf16>
    %c0_i32_2 = arith.constant 0 : i32
    %6 = arith.addi %0, %c0_i32_2 : i32
    %c0_3 = arith.constant 0 : index
    %7 = arith.index_cast %6 : i32 to index
    %c1 = arith.constant 1 : index
    %c0_4 = arith.constant 0 : index
    %8 = vector.load %arg2[%c0_3, %7, %c1, %c0_4] : memref<1x6x6x128xbf16, #tpu.memory_space<vmem>>, vector<1x4x4x128xbf16>
    %9 = vector.shape_cast %8 : vector<1x4x4x128xbf16> to vector<4x4x128xbf16>
    %10 = vector.shape_cast %9 : vector<4x4x128xbf16> to vector<16x128xbf16>
    %c0_i32_5 = arith.constant 0 : i32
    %11 = arith.addi %0, %c0_i32_5 : i32
    %c0_6 = arith.constant 0 : index
    %12 = arith.index_cast %11 : i32 to index
    %c2 = arith.constant 2 : index
    %c0_7 = arith.constant 0 : index
    %13 = vector.load %arg2[%c0_6, %12, %c2, %c0_7] : memref<1x6x6x128xbf16, #tpu.memory_space<vmem>>, vector<1x4x4x128xbf16>
    %14 = vector.shape_cast %13 : vector<1x4x4x128xbf16> to vector<4x4x128xbf16>
    %15 = vector.shape_cast %14 : vector<4x4x128xbf16> to vector<16x128xbf16>
    %c1_i32 = arith.constant 1 : i32
    %16 = arith.addi %0, %c1_i32 : i32
    %c0_8 = arith.constant 0 : index
    %17 = arith.index_cast %16 : i32 to index
    %c0_9 = arith.constant 0 : index
    %c0_10 = arith.constant 0 : index
    %18 = vector.load %arg2[%c0_8, %17, %c0_9, %c0_10] : memref<1x6x6x128xbf16, #tpu.memory_space<vmem>>, vector<1x4x4x128xbf16>
    %19 = vector.shape_cast %18 : vector<1x4x4x128xbf16> to vector<4x4x128xbf16>
    %20 = vector.shape_cast %19 : vector<4x4x128xbf16> to vector<16x128xbf16>
    %c1_i32_11 = arith.constant 1 : i32
    %21 = arith.addi %0, %c1_i32_11 : i32
    %c0_12 = arith.constant 0 : index
    %22 = arith.index_cast %21 : i32 to index
    %c1_13 = arith.constant 1 : index
    %c0_14 = arith.constant 0 : index
    %23 = vector.load %arg2[%c0_12, %22, %c1_13, %c0_14] : memref<1x6x6x128xbf16, #tpu.memory_space<vmem>>, vector<1x4x4x128xbf16>
    %24 = vector.shape_cast %23 : vector<1x4x4x128xbf16> to vector<4x4x128xbf16>
    %25 = vector.shape_cast %24 : vector<4x4x128xbf16> to vector<16x128xbf16>
    %c1_i32_15 = arith.constant 1 : i32
    %26 = arith.addi %0, %c1_i32_15 : i32
    %c0_16 = arith.constant 0 : index
    %27 = arith.index_cast %26 : i32 to index
    %c2_17 = arith.constant 2 : index
    %c0_18 = arith.constant 0 : index
    %28 = vector.load %arg2[%c0_16, %27, %c2_17, %c0_18] : memref<1x6x6x128xbf16, #tpu.memory_space<vmem>>, vector<1x4x4x128xbf16>
    %29 = vector.shape_cast %28 : vector<1x4x4x128xbf16> to vector<4x4x128xbf16>
    %30 = vector.shape_cast %29 : vector<4x4x128xbf16> to vector<16x128xbf16>
    %c2_i32 = arith.constant 2 : i32
    %31 = arith.addi %0, %c2_i32 : i32
    %c0_19 = arith.constant 0 : index
    %32 = arith.index_cast %31 : i32 to index
    %c0_20 = arith.constant 0 : index
    %c0_21 = arith.constant 0 : index
    %33 = vector.load %arg2[%c0_19, %32, %c0_20, %c0_21] : memref<1x6x6x128xbf16, #tpu.memory_space<vmem>>, vector<1x4x4x128xbf16>
    %34 = vector.shape_cast %33 : vector<1x4x4x128xbf16> to vector<4x4x128xbf16>
    %35 = vector.shape_cast %34 : vector<4x4x128xbf16> to vector<16x128xbf16>
    %c2_i32_22 = arith.constant 2 : i32
    %36 = arith.addi %0, %c2_i32_22 : i32
    %c0_23 = arith.constant 0 : index
    %37 = arith.index_cast %36 : i32 to index
    %c1_24 = arith.constant 1 : index
    %c0_25 = arith.constant 0 : index
    %38 = vector.load %arg2[%c0_23, %37, %c1_24, %c0_25] : memref<1x6x6x128xbf16, #tpu.memory_space<vmem>>, vector<1x4x4x128xbf16>
    %39 = vector.shape_cast %38 : vector<1x4x4x128xbf16> to vector<4x4x128xbf16>
    %40 = vector.shape_cast %39 : vector<4x4x128xbf16> to vector<16x128xbf16>
    %c2_i32_26 = arith.constant 2 : i32
    %41 = arith.addi %0, %c2_i32_26 : i32
    %c0_27 = arith.constant 0 : index
    %42 = arith.index_cast %41 : i32 to index
    %c2_28 = arith.constant 2 : index
    %c0_29 = arith.constant 0 : index
    %43 = vector.load %arg2[%c0_27, %42, %c2_28, %c0_29] : memref<1x6x6x128xbf16, #tpu.memory_space<vmem>>, vector<1x4x4x128xbf16>
    %44 = vector.shape_cast %43 : vector<1x4x4x128xbf16> to vector<4x4x128xbf16>
    %45 = vector.shape_cast %44 : vector<4x4x128xbf16> to vector<16x128xbf16>
    %46 = tpu.concatenate %5, %10, %15, %20, %25, %30, %35, %40, %45 in 1 : vector<16x128xbf16>, vector<16x128xbf16>, vector<16x128xbf16>, vector<16x128xbf16>, vector<16x128xbf16>, vector<16x128xbf16>, vector<16x128xbf16>, vector<16x128xbf16>, vector<16x128xbf16> -> vector<16x1152xbf16>
    %c0_30 = arith.constant 0 : index
    %c0_31 = arith.constant 0 : index
    %47 = vector.load %arg3[%c0_30, %c0_31] : memref<1152x128xbf16, #tpu.memory_space<vmem>>, vector<1152x128xbf16>
    %cst = arith.constant dense<0.000000e+00> : vector<16x128xf32>
    %48 = tpu.matmul %46, %47, %cst {dimension_numbers = #tpu.dot_dimension_numbers<[1], [0], [0], [1], [0, 0, 1, 1], [], []>} : vector<16x1152xbf16>, vector<1152x128xbf16>, vector<16x128xf32> -> vector<16x128xf32>
    %49 = arith.truncf %48 : vector<16x128xf32> to vector<16x128xbf16>
    %c0_32 = arith.constant 0 : index
    %c0_33 = arith.constant 0 : index
    %c0_34 = arith.constant 0 : index
    %c0_35 = arith.constant 0 : index
    %50 = vector.load %arg4[%c0_32, %c0_33, %c0_34, %c0_35] : memref<1x1x16x128xbf16, #tpu.memory_space<vmem>>, vector<1x1x16x128xbf16>
    %51 = vector.shape_cast %50 : vector<1x1x16x128xbf16> to vector<16x128xbf16>
    %52 = vector.shape_cast %49 : vector<16x128xbf16> to vector<1x1x16x128xbf16>
    tpu.vector_store %arg4[%c0_32, %c0_33, %c0_34, %c0_35], %52 {strides = array<i32>} : memref<1x1x16x128xbf16, #tpu.memory_space<vmem>>, vector<1x1x16x128xbf16>,
    return
  }
  func.func @transform_0(%arg0: i32, %arg1: i32) -> (i32, i32, i32, i32) {
    %c0_i32 = arith.constant 0 : i32
    %c0_i32_0 = arith.constant 0 : i32
    %c0_i32_1 = arith.constant 0 : i32
    %c0_i32_2 = arith.constant 0 : i32
    return %arg0, %c0_i32, %c0_i32_0, %c0_i32_1 : i32, i32, i32, i32
  }
  func.func @transform_1(%arg0: i32, %arg1: i32) -> (i32, i32) {
    %c0_i32 = arith.constant 0 : i32
    %c0_i32_0 = arith.constant 0 : i32
    %c0_i32_1 = arith.constant 0 : i32
    return %c0_i32, %c0_i32_0 : i32, i32
  }
  func.func @transform_2(%arg0: i32, %arg1: i32) -> (i32, i32, i32, i32) {
    %c0_i32 = arith.constant 0 : i32
    %c0_i32_0 = arith.constant 0 : i32
    %c0_i32_1 = arith.constant 0 : i32
    return %arg0, %arg1, %c0_i32, %c0_i32_0 : i32, i32, i32, i32
  }
}

</mosaic_0001>

<bundles_post_ra>
// kernel: resnet_filter_forward.14
= control target key start
LH: loop header
LB: loop body
LE: loop exit
PB: predicated region body
PF: predicated region fallthrough
CT: control target
= control target key end

     0   :  { %s1475_s12 = smov 0   ;;  %s1688_s0 = inlined_call_operand.vmem [shape: bf16[512,256], index: 0, kind: input, shape index: {}]   ;;  %s1689_s1 = inlined_call_operand.vmem [shape: bf16[256,128], index: 1, kind: input, shape index: {}]   ;;  %s1690_s2 = inlined_call_operand.vmem [shape: bf16[512,128], index: 2, kind: output, shape index: {0}]   ;;  %s1691_s3 = inlined_call_operand.vmem [shape: f32[2,2,128], index: 3, kind: output, shape index: {1}]  }
   0x1 LB: > { %s1481_s13 = sadd.s32 4294967295, %s1453_s12   ;;  %p1030_p0 = scmp.ge.s32.totalorder %s1453_s12, 1  ;;  %s1453_s12 = sphi %s1475_s12, %s14_s12  }
   0x2   : > { %p142_p1 = scmp.lt.s32.totalorder %s1453_s12, 3 }
   0x4   : > { %p143_p2 = pnand %p1030_p0, %p142_p1 }
   0x5   : > { %v1383_v0 = vld [vmem:[%s1689_s1 + $0x40] sm:$0xff] (!%p143_p2)   ;;  %s1031_s16 = sshll.u32 (!%p143_p2), %s1481_s13, 5  ;;  %v1385_v2 = vld [vmem:[%s1689_s1 + $0x48] sm:$0xff] (!%p143_p2)   ;;  %v1387_v4 = vld [vmem:[%s1689_s1 + $0x50] sm:$0xff] (!%p143_p2)   ;;  %p184_p4 = scmp.lt.s32.totalorder (!%p143_p2), %s1481_s13, 1  ;;  %vm936_vm0 = vcmask (!%p143_p2), 1040384  }
   0x6   : > { %146 = sbr.rel (%p143_p2) target bundleno = 361 (0x169), region = 28  ;;  %v1384_v1 = vld [vmem:[%s1689_s1] sm:$0xff] (!%p143_p2)   ;;  %1247 = vmatprep.subr.bf16.mxu0 (!%p143_p2), %v1383_v0  ;;  %1359 = vmatprep.subr.bf16.mxu1 (!%p143_p2), %v1383_v0  ;;  %v1386_v3 = vld [vmem:[%s1689_s1 + $0x8] sm:$0xff] (!%p143_p2)   ;;  %p172_p3 = scmp.lt.s32.totalorder (!%p143_p2), %s1031_s16, 63  ;;  %v1388_v5 = vld [vmem:[%s1689_s1 + $0x10] sm:$0xff] (!%p143_p2)  }
   0x7   : > { %1248 = vmatpush3.bf16.msra.mxu0 (!%p143_p2), %v1384_v1  ;;  %1367 = vmatpush3.bf16.msra.mxu1 (!%p143_p2), %v1384_v1  ;;  %v1389_v6 = vld [vmem:[%s1689_s1 + $0x58] sm:$0xff] (!%p143_p2)   ;;  %v1391_v8 = vld [vmem:[%s1689_s1 + $0x60] sm:$0xff] (!%p143_p2)   ;;  %v1393_v10 = vld [vmem:[%s1689_s1 + $0x68] sm:$0xff] (!%p143_p2)  }
   0x8   : > { %1249 = vmatprep.subr.bf16.mxu0 (!%p143_p2), %v1385_v2  ;;  %1360 = vmatprep.subr.bf16.mxu1 (!%p143_p2), %v1385_v2  ;;  %v1390_v7 = vld [vmem:[%s1689_s1 + $0x18] sm:$0xff] (!%p143_p2)   ;;  %v1392_v9 = vld [vmem:[%s1689_s1 + $0x20] sm:$0xff] (!%p143_p2)   ;;  %v1394_v12 = vld [vmem:[%s1689_s1 + $0x28] sm:$0xff] (!%p143_p2)  }
   0x9   : > { %v1395_v13 = vld [vmem:[%s1689_s1 + $0x70] sm:$0xff] (!%p143_p2)   ;;  %v1397_v16 = vld [vmem:[%s1689_s1 + $0x78] sm:$0xff] (!%p143_p2)  }
   0xa   : > { %v1396_v15 = vld [vmem:[%s1689_s1 + $0x30] sm:$0xff] (!%p143_p2)   ;;  %v1398_v17 = vld [vmem:[%s1689_s1 + $0x38] sm:$0xff] (!%p143_p2)  }
   0xb   : > { %1250 = vmatpush3.bf16.msra.mxu0 (!%p143_p2), %v1386_v3  ;;  %1368 = vmatpush3.bf16.msra.mxu1 (!%p143_p2), %v1386_v3 }
   0xc   : > { %1251 = vmatprep.subr.bf16.mxu0 (!%p143_p2), %v1387_v4  ;;  %1361 = vmatprep.subr.bf16.mxu1 (!%p143_p2), %v1387_v4 }
   0xd   : > { %s1693_s16 = smov (!%p172_p3, %s1031_s16), 63  ;;  %s1695_s13 = smov (!%p184_p4, %s1481_s13), 1 }
   0xe   : > { %s1119_s4 = sshll.u32 %s1693_s16, 3  ;;  %s1035_s27 = sshll.u32 %s1693_s16, 2 }
   0xf   : > { %1252 = vmatpush3.bf16.msra.mxu0 %v1388_v5  ;;  %1369 = vmatpush3.bf16.msra.mxu1 %v1388_v5  ;;  %s1519_s9 = scalar_lea.vmem %s1688_s0, %s1119_s4  ;;  %s1580_s30 = scalar_lea.vmem %s1690_s2, %s1035_s27 }
  0x10   : > { %1253 = vmatprep.subr.bf16.mxu0 %v1389_v6  ;;  %1362 = vmatprep.subr.bf16.mxu1 %v1389_v6  ;;  %v1401_v11 = vld [vmem:[%s1519_s9 + $0x4] ss:$8 sps:$4 sm:$0xff]   ;;  %v1399_v18 = vld [vmem:[%s1519_s9] ss:$8 sps:$4 sm:$0xff]   ;;  %v1402_v19 = vld [vmem:[%s1519_s9 + $0x14] ss:$8 sps:$4 sm:$0xff]  }
  0x11   : > { %541 = vmatprep.mubr.bf16.mxu0 %v1401_v11  ;;  %v1413_v14 = vld [vmem:[%s1519_s9 + $0x84] ss:$8 sps:$4 sm:$0xff]   ;;  %v1411_v20 = vld [vmem:[%s1519_s9 + $0x80] ss:$8 sps:$4 sm:$0xff]   ;;  %v1417_v21 = vld [vmem:[%s1519_s9 + $0x94] ss:$8 sps:$4 sm:$0xff]  }
  0x12   : > { %605 = vmatprep.mubr.bf16.mxu1 %v1413_v14  ;;  %v1404_v22 = vld [vmem:[%s1519_s9 + $0x10] ss:$8 sps:$4 sm:$0xff]   ;;  %v1405_v23 = vld [vmem:[%s1519_s9 + $0x24] ss:$8 sps:$4 sm:$0xff]   ;;  %v1407_v26 = vld [vmem:[%s1519_s9 + $0x20] ss:$8 sps:$4 sm:$0xff]  }
  0x13   : > { %1254 = vmatpush3.bf16.msra.mxu0 %v1390_v7  ;;  %1370 = vmatpush3.bf16.msra.mxu1 %v1390_v7  ;;  %v1419_v24 = vld [vmem:[%s1519_s9 + $0x90] ss:$8 sps:$4 sm:$0xff]   ;;  %v1423_v25 = vld [vmem:[%s1519_s9 + $0xa4] ss:$8 sps:$4 sm:$0xff]   ;;  %v1408_v27 = vld [vmem:[%s1519_s9 + $0x34] ss:$8 sps:$4 sm:$0xff]  }
  0x14   : > { %1255 = vmatprep.subr.bf16.mxu0 %v1391_v8  ;;  %1363 = vmatprep.subr.bf16.mxu1 %v1391_v8  ;;  %v1425_v28 = vld [vmem:[%s1519_s9 + $0xa0] ss:$8 sps:$4 sm:$0xff]   ;;  %v1429_v29 = vld [vmem:[%s1519_s9 + $0xb4] ss:$8 sps:$4 sm:$0xff]   ;;  %v1410_v30 = vld [vmem:[%s1519_s9 + $0x30] ss:$8 sps:$4 sm:$0xff]  }
  0x15   : > { %v1414_v31 = vld [vmem:[%s1519_s9 + $0x44] ss:$8 sps:$4 sm:$0xff]   ;;  %v1431_v32 = vld [vmem:[%s1519_s9 + $0xb0] ss:$8 sps:$4 sm:$0xff]   ;;  %v1416_v34 = vld [vmem:[%s1519_s9 + $0x40] ss:$8 sps:$4 sm:$0xff]  }
  0x16   : > { %v1435_v33 = vld [vmem:[%s1519_s9 + $0xc4] ss:$8 sps:$4 sm:$0xff]   ;;  %v1420_v35 = vld [vmem:[%s1519_s9 + $0x54] ss:$8 sps:$4 sm:$0xff]   ;;  %v1437_v36 = vld [vmem:[%s1519_s9 + $0xc0] ss:$8 sps:$4 sm:$0xff]  }
  0x17   : > { %1256 = vmatpush3.bf16.msra.mxu0 %v1392_v9  ;;  %1371 = vmatpush3.bf16.msra.mxu1 %v1392_v9  ;;  %v1438_v37 = vld [vmem:[%s1519_s9 + $0xd4] ss:$8 sps:$4 sm:$0xff]   ;;  %v1422_v38 = vld [vmem:[%s1519_s9 + $0x50] ss:$8 sps:$4 sm:$0xff]   ;;  %v1426_v39 = vld [vmem:[%s1519_s9 + $0x64] ss:$8 sps:$4 sm:$0xff]  }
  0x18   : > { %1257 = vmatprep.subr.bf16.mxu0 %v1393_v10  ;;  %1364 = vmatprep.subr.bf16.mxu1 %v1393_v10  ;;  %v1440_v40 = vld [vmem:[%s1519_s9 + $0xd0] ss:$8 sps:$4 sm:$0xff]   ;;  %v1441_v41 = vld [vmem:[%s1519_s9 + $0xe4] ss:$8 sps:$4 sm:$0xff]   ;;  %v1428_v42 = vld [vmem:[%s1519_s9 + $0x60] ss:$8 sps:$4 sm:$0xff]  }
  0x19   : > { %v1432_v43 = vld [vmem:[%s1519_s9 + $0x74] ss:$8 sps:$4 sm:$0xff]   ;;  %v1443_v44 = vld [vmem:[%s1519_s9 + $0xe0] ss:$8 sps:$4 sm:$0xff]   ;;  %v1434_v46 = vld [vmem:[%s1519_s9 + $0x70] ss:$8 sps:$4 sm:$0xff]  }
  0x1a   : > { %v1444_v45 = vld [vmem:[%s1519_s9 + $0xf4] ss:$8 sps:$4 sm:$0xff]   ;;  %v1446_v47 = vld [vmem:[%s1519_s9 + $0xf0] ss:$8 sps:$4 sm:$0xff]   ;;  %s1036_s16 = sshll.u32 %s1695_s13, 1 }
  0x1b   : > { %1258 = vmatpush3.bf16.msra.mxu0 %v1394_v12  ;;  %1372 = vmatpush3.bf16.msra.mxu1 %v1394_v12  ;;  %s187_s6 = scalar_lea.vmem %s1691_s3, %s1036_s16 }
  0x1c   : > { %1259 = vmatprep.subr.bf16.mxu0 %v1395_v13  ;;  %1365 = vmatprep.subr.bf16.mxu1 %v1395_v13 }
  0x1f   : > { %1260 = vmatpush3.bf16.msra.mxu0 %v1396_v15  ;;  %1373 = vmatpush3.bf16.msra.mxu1 %v1396_v15 }
  0x20   : > { %1261 = vmatprep.subr.bf16.mxu0 %v1397_v16  ;;  %1366 = vmatprep.subr.bf16.mxu1 %v1397_v16 }
  0x23   : > { %1262 = vmatpush3.bf16.msra.mxu0 %v1398_v17  ;;  %1374 = vmatpush3.bf16.msra.mxu1 %v1398_v17 }
  0x26   : > { %542 = vmatmul.mubr.bf16.vlgmr.msra.gmra.mrb[0].mxu0 %v1399_v18  ;;  %606 = vmatmul.mubr.bf16.vlgmr.msra.gmra.mrb[0].mxu1 %v1411_v20 }
  0x27   : > { %549 = vmatprep.mubr.bf16.mxu0 %v1402_v19  ;;  %613 = vmatprep.mubr.bf16.mxu1 %v1417_v21 }
  0x2e   : > { %550 = vmatmul.mubr.bf16.gmra.mrb[4].mxu0 %v1404_v22  ;;  %614 = vmatmul.mubr.bf16.gmra.mrb[4].mxu1 %v1419_v24 }
  0x2f   : > { %557 = vmatprep.mubr.bf16.mxu0 %v1405_v23  ;;  %621 = vmatprep.mubr.bf16.mxu1 %v1423_v25 }
  0x36   : > { %558 = vmatmul.mubr.bf16.gmra.mrb[8].mxu0 %v1407_v26  ;;  %622 = vmatmul.mubr.bf16.gmra.mrb[8].mxu1 %v1425_v28 }
  0x37   : > { %565 = vmatprep.mubr.bf16.mxu0 %v1408_v27  ;;  %629 = vmatprep.mubr.bf16.mxu1 %v1429_v29 }
  0x3e   : > { %566 = vmatmul.mubr.bf16.gmra.mrb[12].mxu0 %v1410_v30  ;;  %630 = vmatmul.mubr.bf16.gmra.mrb[12].mxu1 %v1431_v32 }
  0x3f   : > { %573 = vmatprep.mubr.bf16.mxu0 %v1414_v31  ;;  %637 = vmatprep.mubr.bf16.mxu1 %v1435_v33 }
  0x46   : > { %574 = vmatmul.mubr.bf16.gmra.mrb[16].mxu0 %v1416_v34  ;;  %638 = vmatmul.mubr.bf16.gmra.mrb[16].mxu1 %v1437_v36 }
  0x47   : > { %581 = vmatprep.mubr.bf16.mxu0 %v1420_v35  ;;  %645 = vmatprep.mubr.bf16.mxu1 %v1438_v37 }
  0x4e   : > { %582 = vmatmul.mubr.bf16.gmra.mrb[20].mxu0 %v1422_v38  ;;  %646 = vmatmul.mubr.bf16.gmra.mrb[20].mxu1 %v1440_v40 }
  0x4f   : > { %589 = vmatprep.mubr.bf16.mxu0 %v1426_v39  ;;  %653 = vmatprep.mubr.bf16.mxu1 %v1441_v41 }
  0x56   : > { %590 = vmatmul.mubr.bf16.gmra.mrb[24].mxu0 %v1428_v42  ;;  %654 = vmatmul.mubr.bf16.gmra.mrb[24].mxu1 %v1443_v44 }
  0x57   : > { %597 = vmatprep.mubr.bf16.mxu0 %v1432_v43  ;;  %661 = vmatprep.mubr.bf16.mxu1 %v1444_v45 }
  0x5e   : > { %598 = vmatmul.mubr.bf16.gmra.mrb[28].mxu0 %v1434_v46  ;;  %662 = vmatmul.mubr.bf16.gmra.mrb[28].mxu1 %v1446_v47 }
  0xf9   : > { %v1263_v48 = vpop.f32.mrb[0].mxu0  ;;  %v1311_v50 = vpop.f32.mrb[0].mxu1 }
  0xfa   : > { %v1264_v49 = vpop.f32.mrb[1].mxu0  ;;  %v1312_v53 = vpop.f32.mrb[1].mxu1 }
  0xfb   : > { %v1265_v51 = vadd.f32 %v1264_v49, %v1263_v48  ;;  %v1266_v52 = vpop.f32.mrb[2].mxu0  ;;  %v1575_v55 = vadd.f32 %v1312_v53, %v1311_v50  ;;  %v1314_v56 = vpop.f32.mrb[2].mxu1 }
  0xfc   : > { %v1267_v54 = vpop.f32.mrb[3].mxu0  ;;  %v1315_v58 = vpop.f32.mrb[3].mxu1 }
  0xfd   : > { %v1268_v57 = vadd.f32 %v1267_v54, %v1266_v52  ;;  %v1582_v59 = vadd.f32 %v1315_v58, %v1314_v56  ;;  %v867_v60 = vmul.f32 %v1265_v51, %v1265_v51 }
  0xff   : > { %v1155_v61 = vpack.c.bf16 %v1268_v57, %v1265_v51  ;;  %v830_v62 = vadd.f32 %v1268_v57, %v1265_v51  ;;  %v868_v63 = vmul.f32 %v1268_v57, %v1268_v57  ;;  %v1195_v0 = vpack.c.bf16 %v1582_v59, %v1575_v55 }
 0x101   : > { %1156 = vst [vmem:[%s1580_s30] sm:$0xff] %v1155_v61   ;;  %v899_v1 = vadd.f32 %v868_v63, %v867_v60  ;;  %v1269_v2 = vpop.f32.mrb[4].mxu0  ;;  %1239 = vst [vmem:[%s1580_s30 + $0x40] sm:$0xff] %v1195_v0   ;;  %v1317_v4 = vpop.f32.mrb[4].mxu1 }
 0x102   : > { %v1270_v3 = vpop.f32.mrb[5].mxu0  ;;  %v1318_v7 = vpop.f32.mrb[5].mxu1 }
 0x103   : > { %v1271_v5 = vadd.f32 %v1270_v3, %v1269_v2  ;;  %v1272_v6 = vpop.f32.mrb[6].mxu0  ;;  %v1588_v9 = vadd.f32 %v1318_v7, %v1317_v4  ;;  %v1320_v10 = vpop.f32.mrb[6].mxu1 }
 0x104   : > { %v1273_v8 = vpop.f32.mrb[7].mxu0  ;;  %v1321_v14 = vpop.f32.mrb[7].mxu1 }
 0x105   : > { %v831_v11 = vadd.f32 %v1271_v5, %v830_v62  ;;  %v869_v12 = vmul.f32 %v1271_v5, %v1271_v5  ;;  %v1274_v13 = vadd.f32 %v1273_v8, %v1272_v6  ;;  %v1590_v15 = vadd.f32 %v1321_v14, %v1320_v10 }
 0x107   : > { %v900_v16 = vadd.f32 %v899_v1, %v869_v12  ;;  %v1160_v17 = vpack.c.bf16 %v1274_v13, %v1271_v5  ;;  %v832_v18 = vadd.f32 %v1274_v13, %v831_v11  ;;  %v870_v19 = vmul.f32 %v1274_v13, %v1274_v13 }
 0x108   : > { %v1200_v20 = vpack.c.bf16 %v1590_v15, %v1588_v9 }
 0x109   : > { %1232 = vst [vmem:[%s1580_s30 + $0x8] sm:$0xff] %v1160_v17   ;;  %v901_v21 = vadd.f32 %v900_v16, %v870_v19  ;;  %v1275_v22 = vpop.f32.mrb[8].mxu0  ;;  %v1323_v24 = vpop.f32.mrb[8].mxu1 }
 0x10a   : > { %v1276_v23 = vpop.f32.mrb[9].mxu0  ;;  %1240 = vst [vmem:[%s1580_s30 + $0x48] sm:$0xff] %v1200_v20   ;;  %v1324_v27 = vpop.f32.mrb[9].mxu1 }
 0x10b   : > { %v1277_v25 = vadd.f32 %v1276_v23, %v1275_v22  ;;  %v1278_v26 = vpop.f32.mrb[10].mxu0  ;;  %v1596_v29 = vadd.f32 %v1324_v27, %v1323_v24  ;;  %v1326_v30 = vpop.f32.mrb[10].mxu1 }
 0x10c   : > { %v1279_v28 = vpop.f32.mrb[11].mxu0  ;;  %v1327_v34 = vpop.f32.mrb[11].mxu1 }
 0x10d   : > { %v833_v31 = vadd.f32 %v1277_v25, %v832_v18  ;;  %v871_v32 = vmul.f32 %v1277_v25, %v1277_v25  ;;  %v1280_v33 = vadd.f32 %v1279_v28, %v1278_v26  ;;  %v1598_v35 = vadd.f32 %v1327_v34, %v1326_v30 }
 0x10f   : > { %v902_v36 = vadd.f32 %v901_v21, %v871_v32  ;;  %v1165_v37 = vpack.c.bf16 %v1280_v33, %v1277_v25  ;;  %v834_v38 = vadd.f32 %v1280_v33, %v833_v31  ;;  %v872_v39 = vmul.f32 %v1280_v33, %v1280_v33 }
 0x110   : > { %v1205_v40 = vpack.c.bf16 %v1598_v35, %v1596_v29 }
 0x111   : > { %1233 = vst [vmem:[%s1580_s30 + $0x10] sm:$0xff] %v1165_v37   ;;  %v903_v41 = vadd.f32 %v902_v36, %v872_v39  ;;  %v1281_v42 = vpop.f32.mrb[12].mxu0  ;;  %v1329_v44 = vpop.f32.mrb[12].mxu1 }
 0x112   : > { %v1282_v43 = vpop.f32.mrb[13].mxu0  ;;  %1241 = vst [vmem:[%s1580_s30 + $0x50] sm:$0xff] %v1205_v40   ;;  %v1330_v47 = vpop.f32.mrb[13].mxu1 }
 0x113   : > { %v1283_v45 = vadd.f32 %v1282_v43, %v1281_v42  ;;  %v1284_v46 = vpop.f32.mrb[14].mxu0  ;;  %v1604_v49 = vadd.f32 %v1330_v47, %v1329_v44  ;;  %v1332_v50 = vpop.f32.mrb[14].mxu1 }
 0x114   : > { %v1285_v48 = vpop.f32.mrb[15].mxu0  ;;  %v1333_v54 = vpop.f32.mrb[15].mxu1 }
 0x115   : > { %v835_v51 = vadd.f32 %v1283_v45, %v834_v38  ;;  %v873_v52 = vmul.f32 %v1283_v45, %v1283_v45  ;;  %v1286_v53 = vadd.f32 %v1285_v48, %v1284_v46  ;;  %v1606_v56 = vadd.f32 %v1333_v54, %v1332_v50 }
 0x117   : > { %v904_v57 = vadd.f32 %v903_v41, %v873_v52  ;;  %v1170_v58 = vpack.c.bf16 %v1286_v53, %v1283_v45  ;;  %v836_v60 = vadd.f32 %v1286_v53, %v835_v51  ;;  %v874_v61 = vmul.f32 %v1286_v53, %v1286_v53 }
 0x118   : > { %v1210_v62 = vpack.c.bf16 %v1606_v56, %v1604_v49 }
 0x119   : > { %1234 = vst [vmem:[%s1580_s30 + $0x18] sm:$0xff] %v1170_v58   ;;  %v905_v63 = vadd.f32 %v904_v57, %v874_v61  ;;  %v1287_v0 = vpop.f32.mrb[16].mxu0  ;;  %v1335_v2 = vpop.f32.mrb[16].mxu1 }
 0x11a   : > { %v1288_v1 = vpop.f32.mrb[17].mxu0  ;;  %1242 = vst [vmem:[%s1580_s30 + $0x58] sm:$0xff] %v1210_v62   ;;  %v1336_v5 = vpop.f32.mrb[17].mxu1 }
 0x11b   : > { %v1289_v3 = vadd.f32 %v1288_v1, %v1287_v0  ;;  %v1290_v4 = vpop.f32.mrb[18].mxu0  ;;  %v1612_v7 = vadd.f32 %v1336_v5, %v1335_v2  ;;  %v1338_v8 = vpop.f32.mrb[18].mxu1 }
 0x11c   : > { %v1291_v6 = vpop.f32.mrb[19].mxu0  ;;  %v1339_v13 = vpop.f32.mrb[19].mxu1 }
 0x11d   : > { %v837_v10 = vadd.f32 %v1289_v3, %v836_v60  ;;  %v875_v11 = vmul.f32 %v1289_v3, %v1289_v3  ;;  %v1292_v12 = vadd.f32 %v1291_v6, %v1290_v4  ;;  %v1614_v14 = vadd.f32 %v1339_v13, %v1338_v8 }
 0x11f   : > { %v906_v16 = vadd.f32 %v905_v63, %v875_v11  ;;  %v1175_v17 = vpack.c.bf16 %v1292_v12, %v1289_v3  ;;  %v838_v18 = vadd.f32 %v1292_v12, %v837_v10  ;;  %v876_v19 = vmul.f32 %v1292_v12, %v1292_v12 }
 0x120   : > { %v1215_v20 = vpack.c.bf16 %v1614_v14, %v1612_v7 }
 0x121   : > { %1235 = vst [vmem:[%s1580_s30 + $0x20] sm:$0xff] %v1175_v17   ;;  %v907_v21 = vadd.f32 %v906_v16, %v876_v19  ;;  %v1293_v22 = vpop.f32.mrb[20].mxu0  ;;  %v1341_v24 = vpop.f32.mrb[20].mxu1 }
 0x122   : > { %v1294_v23 = vpop.f32.mrb[21].mxu0  ;;  %1243 = vst [vmem:[%s1580_s30 + $0x60] sm:$0xff] %v1215_v20   ;;  %v1342_v27 = vpop.f32.mrb[21].mxu1 }
 0x123   : > { %v1295_v25 = vadd.f32 %v1294_v23, %v1293_v22  ;;  %v1296_v26 = vpop.f32.mrb[22].mxu0  ;;  %v1620_v30 = vadd.f32 %v1342_v27, %v1341_v24  ;;  %v1344_v31 = vpop.f32.mrb[22].mxu1  ;;  %v883_v27 = vmul.f32 %v1575_v55, %v1575_v55 }
 0x124   : > { %v1297_v28 = vpop.f32.mrb[23].mxu0  ;;  %v1345_v36 = vpop.f32.mrb[23].mxu1 }
 0x125   : > { %v839_v32 = vadd.f32 %v1295_v25, %v838_v18  ;;  %v877_v33 = vmul.f32 %v1295_v25, %v1295_v25  ;;  %v1298_v34 = vadd.f32 %v1297_v28, %v1296_v26  ;;  %v1622_v37 = vadd.f32 %v1345_v36, %v1344_v31 }
 0x126   : > { %v885_v36 = vmul.f32 %v1588_v9, %v1588_v9 }
 0x127   : > { %v908_v38 = vadd.f32 %v907_v21, %v877_v33  ;;  %v1180_v39 = vpack.c.bf16 %v1298_v34, %v1295_v25  ;;  %v840_v40 = vadd.f32 %v1298_v34, %v839_v32  ;;  %v878_v41 = vmul.f32 %v1298_v34, %v1298_v34 }
 0x128   : > { %v1220_v42 = vpack.c.bf16 %v1622_v37, %v1620_v30  ;;  %v884_v32 = vmul.f32 %v1582_v59, %v1582_v59 }
 0x129   : > { %1236 = vst [vmem:[%s1580_s30 + $0x28] sm:$0xff] %v1180_v39   ;;  %v909_v43 = vadd.f32 %v908_v38, %v878_v41  ;;  %v1299_v44 = vpop.f32.mrb[24].mxu0  ;;  %v1347_v46 = vpop.f32.mrb[24].mxu1 }
 0x12a   : > { %v1300_v45 = vpop.f32.mrb[25].mxu0  ;;  %1244 = vst [vmem:[%s1580_s30 + $0x68] sm:$0xff] %v1220_v42   ;;  %v1348_v50 = vpop.f32.mrb[25].mxu1  ;;  %v887_v42 = vmul.f32 %v1596_v29, %v1596_v29 }
 0x12b   : > { %v1301_v47 = vadd.f32 %v1300_v45, %v1299_v44  ;;  %v1302_v48 = vpop.f32.mrb[26].mxu0  ;;  %v1628_v52 = vadd.f32 %v1348_v50, %v1347_v46  ;;  %v1350_v53 = vpop.f32.mrb[26].mxu1 }
 0x12c   : > { %v1303_v51 = vpop.f32.mrb[27].mxu0  ;;  %v1351_v60 = vpop.f32.mrb[27].mxu1 }
 0x12d   : > { %v841_v54 = vadd.f32 %v1301_v47, %v840_v40  ;;  %v879_v57 = vmul.f32 %v1301_v47, %v1301_v47  ;;  %v1304_v58 = vadd.f32 %v1303_v51, %v1302_v48  ;;  %v1630_v61 = vadd.f32 %v1351_v60, %v1350_v53 }
 0x12e   : > { %v886_v40 = vmul.f32 %v1590_v15, %v1590_v15  ;;  %v891_v53 = vmul.f32 %v1612_v7, %v1612_v7 }
 0x12f   : > { %v910_v62 = vadd.f32 %v909_v43, %v879_v57  ;;  %v1185_v63 = vpack.c.bf16 %v1304_v58, %v1301_v47  ;;  %v842_v0 = vadd.f32 %v1304_v58, %v841_v54  ;;  %v880_v1 = vmul.f32 %v1304_v58, %v1304_v58 }
 0x130   : > { %v1225_v2 = vpack.c.bf16 %v1630_v61, %v1628_v52  ;;  %v892_v58 = vmul.f32 %v1614_v14, %v1614_v14 }
 0x131   : > { %1237 = vst [vmem:[%s1580_s30 + $0x30] sm:$0xff] %v1185_v63   ;;  %v911_v3 = vadd.f32 %v910_v62, %v880_v1  ;;  %v1305_v4 = vpop.f32.mrb[28].mxu0  ;;  %v1353_v6 = vpop.f32.mrb[28].mxu1  ;;  %v893_v62 = vmul.f32 %v1620_v30, %v1620_v30 }
 0x132   : > { %v1306_v5 = vpop.f32.mrb[29].mxu0  ;;  %1245 = vst [vmem:[%s1580_s30 + $0x70] sm:$0xff] %v1225_v2   ;;  %v1354_v11 = vpop.f32.mrb[29].mxu1  ;;  %v895_v2 = vmul.f32 %v1628_v52, %v1628_v52 }
 0x133   : > { %v1307_v8 = vadd.f32 %v1306_v5, %v1305_v4  ;;  %v1308_v10 = vpop.f32.mrb[30].mxu0  ;;  %v1355_v13 = vadd.f32 %v1354_v11, %v1353_v6  ;;  %v1356_v16 = vpop.f32.mrb[30].mxu1 }
 0x134   : > { %v1309_v12 = vpop.f32.mrb[31].mxu0  ;;  %v1357_v20 = vpop.f32.mrb[31].mxu1 }
 0x135   : > { %v843_v17 = vadd.f32 %v1307_v8, %v842_v0  ;;  %v881_v18 = vmul.f32 %v1307_v8, %v1307_v8  ;;  %v1310_v19 = vadd.f32 %v1309_v12, %v1308_v10  ;;  %v1358_v21 = vadd.f32 %v1357_v20, %v1356_v16 }
 0x136   : > { %v897_v4 = vmul.f32 %v1355_v13, %v1355_v13 }
 0x137   : > { %v912_v22 = vadd.f32 %v911_v3, %v881_v18  ;;  %v1190_v23 = vpack.c.bf16 %v1310_v19, %v1307_v8  ;;  %v844_v24 = vadd.f32 %v1310_v19, %v843_v17  ;;  %v882_v25 = vmul.f32 %v1310_v19, %v1310_v19 }
 0x138   : > { %v1230_v26 = vpack.c.bf16 %v1358_v21, %v1355_v13  ;;  %v898_v11 = vmul.f32 %v1358_v21, %v1358_v21 }
 0x139   : > { %1238 = vst [vmem:[%s1580_s30 + $0x38] sm:$0xff] %v1190_v23   ;;  %v845_v28 = vadd.f32 %v1575_v55, %v844_v24  ;;  %v913_v31 = vadd.f32 %v912_v22, %v882_v25 }
 0x13a   : > { %1246 = vst [vmem:[%s1580_s30 + $0x78] sm:$0xff] %v1230_v26  }
 0x13b   : > { %v846_v33 = vadd.f32 %v1582_v59, %v845_v28  ;;  %v914_v34 = vadd.f32 %v913_v31, %v883_v27  ;;  %v888_v59 = vmul.f32 %v1598_v35, %v1598_v35 }
 0x13d   : > { %v847_v38 = vadd.f32 %v1588_v9, %v846_v33  ;;  %v915_v39 = vadd.f32 %v914_v34, %v884_v32  ;;  %v889_v9 = vmul.f32 %v1604_v49, %v1604_v49 }
 0x13f   : > { %v848_v41 = vadd.f32 %v1590_v15, %v847_v38  ;;  %v916_v55 = vadd.f32 %v915_v39, %v885_v36  ;;  %v890_v15 = vmul.f32 %v1606_v56, %v1606_v56 }
 0x141   : > { %v917_v43 = vadd.f32 %v916_v55, %v886_v40  ;;  %v849_v44 = vadd.f32 %v1596_v29, %v848_v41 }
 0x143   : > { %v850_v45 = vadd.f32 %v1598_v35, %v849_v44  ;;  %v918_v46 = vadd.f32 %v917_v43, %v887_v42 }
 0x145   : > { %v851_v47 = vadd.f32 %v1604_v49, %v850_v45  ;;  %v919_v48 = vadd.f32 %v918_v46, %v888_v59 }
 0x147   : > { %v852_v50 = vadd.f32 %v1606_v56, %v851_v47  ;;  %v920_v51 = vadd.f32 %v919_v48, %v889_v9 }
 0x149   : > { %v853_v29 = vadd.f32 %v1612_v7, %v852_v50  ;;  %v921_v54 = vadd.f32 %v920_v51, %v890_v15  ;;  %v894_v7 = vmul.f32 %v1622_v37, %v1622_v37 }
 0x14b   : > { %v922_v35 = vadd.f32 %v921_v54, %v891_v53  ;;  %v854_v57 = vadd.f32 %v1614_v14, %v853_v29 }
 0x14d   : > { %v923_v49 = vadd.f32 %v922_v35, %v892_v58  ;;  %v855_v60 = vadd.f32 %v1620_v30, %v854_v57  ;;  %v896_v30 = vmul.f32 %v1630_v61, %v1630_v61 }
 0x14f   : > { %v924_v56 = vadd.f32 %v923_v49, %v893_v62  ;;  %v856_v63 = vadd.f32 %v1622_v37, %v855_v60 }
 0x151   : > { %v925_v0 = vadd.f32 %v924_v56, %v894_v7  ;;  %v857_v1 = vadd.f32 %v1628_v52, %v856_v63 }
 0x153   : > { %v926_v14 = vadd.f32 %v925_v0, %v895_v2  ;;  %v858_v3 = vadd.f32 %v1630_v61, %v857_v1 }
 0x155   : > { %v927_v5 = vadd.f32 %v926_v14, %v896_v30  ;;  %v859_v6 = vadd.f32 %v1355_v13, %v858_v3 }
 0x157   : > { %v928_v8 = vadd.f32 %v927_v5, %v897_v4  ;;  %v860_v10 = vadd.f32 %v1358_v21, %v859_v6 }
 0x159   : > { %v861_v37 = vrot.slane %v860_v10, 4  ;;  %v929_v12 = vadd.f32 %v928_v8, %v898_v11 }
 0x15b   : > { %v862_v16 = vadd.f32 %v861_v37, %v860_v10  ;;  %v930_v17 = vrot.slane %v929_v12, 4 }
 0x15d   : > { %v863_v18 = vrot.slane %v862_v16, 2  ;;  %v931_v52 = vadd.f32 %v930_v17, %v929_v12 }
 0x15f   : > { %v864_v19 = vadd.f32 %v863_v18, %v862_v16  ;;  %v932_v20 = vrot.slane %v931_v52, 2 }
 0x161   : > { %v865_v22 = vrot.slane %v864_v19, 1  ;;  %v933_v23 = vadd.f32 %v932_v20, %v931_v52 }
 0x163   : > { %v934_v61 = vrot.slane %v933_v23, 1  ;;  %v866_v13 = vadd.f32 %v865_v22, %v864_v19 }
 0x165   : > { %v935_v21 = vadd.f32 %v934_v61, %v933_v23 }
 0x167   : > { %v937_v24 = vsel %vm936_vm0, %v866_v13, %v935_v21 }
 0x168   : > { %938 = vst [vmem:[%s187_s6] sm:$0x3] %v937_v24 }
 0x169 PF: > { %s14_s12 = sadd.s32 1, %s1453_s12  }
 0x16a   : > { %p11_p5 = scmp.ge.s32.totalorder %s14_s12, 4  }
 0x16c   :  { %13 = sbr.rel (!%p11_p5) target bundleno = 1 (0x1), region = 70 }

// kernel: resnet_filter_forward.15
= control target key start
LH: loop header
LB: loop body
LE: loop exit
PB: predicated region body
PF: predicated region fallthrough
CT: control target
= control target key end

     0   :  { %s1502_s0 = inlined_call_operand.vmem [shape: bf16[512,128], index: 0, kind: input, shape index: {}]   ;;  %s1503_s1 = inlined_call_operand.vmem [shape: f32[1,128], index: 1, kind: input, shape index: {}]   ;;  %s1504_s2 = inlined_call_operand.vmem [shape: f32[1,128], index: 2, kind: input, shape index: {}]   ;;  %s1505_s3 = inlined_call_operand.vmem [shape: bf16[512,128], index: 3, kind: output, shape index: {}]  }
   0x1   :  { %v803_v0 = vld [vmem:[%s1502_s0] sm:$0xff]   ;;  %v1090_v4 = vld [vmem:[%s1502_s0 + $0x8] sm:$0xff]   ;;  %v1091_v5 = vld [vmem:[%s1502_s0 + $0x10] sm:$0xff]  }
   0x2   :  { %v1178_v1 = vld [vmem:[%s1503_s1] ss:$0 sm:$0xff]  ;;  %v804_v2 = vunpack.c.l.bf16 %v803_v0  ;;  %v805_v3 = vunpack.c.h.bf16 %v803_v0  ;;  %v1092_v6 = vld [vmem:[%s1502_s0 + $0x18] sm:$0xff]   ;;  %v808_v8 = vunpack.c.l.bf16 %v1090_v4  ;;  %v809_v9 = vunpack.c.h.bf16 %v1090_v4  ;;  %v1094_v33 = vld [vmem:[%s1502_s0 + $0x28] sm:$0xff]  }
   0x3   :  { %v1192_v7 = vld [vmem:[%s1504_s2] ss:$0 sm:$0xff]  ;;  %v812_v10 = vunpack.c.l.bf16 %v1091_v5  ;;  %v813_v11 = vunpack.c.h.bf16 %v1091_v5  ;;  %v816_v14 = vunpack.c.l.bf16 %v1092_v6  ;;  %v817_v15 = vunpack.c.h.bf16 %v1092_v6  ;;  %v1095_v38 = vld [vmem:[%s1502_s0 + $0x30] sm:$0xff]   ;;  %v1096_v43 = vld [vmem:[%s1502_s0 + $0x38] sm:$0xff]  }
   0x4   :  { %v149_v12 = vmul.f32 %v804_v2, %v1178_v1  ;;  %v150_v13 = vmul.f32 %v805_v3, %v1178_v1  ;;  %v151_v16 = vmul.f32 %v808_v8, %v1178_v1  ;;  %v152_v17 = vmul.f32 %v809_v9, %v1178_v1  ;;  %v1093_v28 = vld [vmem:[%s1502_s0 + $0x20] sm:$0xff]  }
   0x5   :  { %v153_v18 = vmul.f32 %v812_v10, %v1178_v1  ;;  %v154_v19 = vmul.f32 %v813_v11, %v1178_v1  ;;  %v155_v22 = vmul.f32 %v816_v14, %v1178_v1  ;;  %v156_v23 = vmul.f32 %v817_v15, %v1178_v1  ;;  %v1097_v0 = vld [vmem:[%s1502_s0 + $0x40] sm:$0xff]   ;;  %v1098_v11 = vld [vmem:[%s1502_s0 + $0x48] sm:$0xff]  }
   0x6   :  { %v220_v20 = vadd.f32 %v1192_v7, %v149_v12  ;;  %v221_v21 = vadd.f32 %v1192_v7, %v150_v13  ;;  %v222_v24 = vadd.f32 %v1192_v7, %v151_v16  ;;  %v223_v25 = vadd.f32 %v1192_v7, %v152_v17  ;;  %v1099_v16 = vld [vmem:[%s1502_s0 + $0x50] sm:$0xff]  }
   0x7   :  { %v224_v26 = vadd.f32 %v1192_v7, %v153_v18  ;;  %v225_v27 = vadd.f32 %v1192_v7, %v154_v19  ;;  %v226_v31 = vadd.f32 %v1192_v7, %v155_v22  ;;  %v227_v32 = vadd.f32 %v1192_v7, %v156_v23 }
   0x8   :  { %v284_v29 = vmax.f32 %v220_v20, 0.0  ;;  %v285_v30 = vmax.f32 %v221_v21, 0.0  ;;  %v286_v34 = vmax.f32 %v222_v24, 0.0  ;;  %v287_v35 = vmax.f32 %v223_v25, 0.0  ;;  %v1100_v25 = vld [vmem:[%s1502_s0 + $0x58] sm:$0xff]  }
   0x9   :  { %v288_v36 = vmax.f32 %v224_v26, 0.0  ;;  %v289_v37 = vmax.f32 %v225_v27, 0.0  ;;  %v290_v40 = vmax.f32 %v226_v31, 0.0  ;;  %v291_v41 = vmax.f32 %v227_v32, 0.0 }
   0xa   :  { %v933_v39 = vpack.c.bf16 %v285_v30, %v284_v29  ;;  %v820_v42 = vunpack.c.l.bf16 %v1093_v28  ;;  %v938_v44 = vpack.c.bf16 %v287_v35, %v286_v34  ;;  %v821_v46 = vunpack.c.h.bf16 %v1093_v28 }
   0xb   :  { %v943_v45 = vpack.c.bf16 %v289_v37, %v288_v36  ;;  %v824_v47 = vunpack.c.l.bf16 %v1094_v33  ;;  %v948_v48 = vpack.c.bf16 %v291_v41, %v290_v40  ;;  %v825_v50 = vunpack.c.h.bf16 %v1094_v33 }
   0xc   :  { %934 = vst [vmem:[%s1505_s3] sm:$0xff] %v933_v39   ;;  %v157_v49 = vmul.f32 %v820_v42, %v1178_v1  ;;  %v828_v51 = vunpack.c.l.bf16 %v1095_v38  ;;  %1121 = vst [vmem:[%s1505_s3 + $0x8] sm:$0xff] %v938_v44   ;;  %v158_v52 = vmul.f32 %v821_v46, %v1178_v1  ;;  %v829_v54 = vunpack.c.h.bf16 %v1095_v38  ;;  %v1101_v38 = vld [vmem:[%s1502_s0 + $0x60] sm:$0xff]  }
   0xd   :  { %1122 = vst [vmem:[%s1505_s3 + $0x10] sm:$0xff] %v943_v45   ;;  %v159_v53 = vmul.f32 %v824_v47, %v1178_v1  ;;  %v832_v55 = vunpack.c.l.bf16 %v1096_v43  ;;  %1123 = vst [vmem:[%s1505_s3 + $0x18] sm:$0xff] %v948_v48   ;;  %v160_v57 = vmul.f32 %v825_v50, %v1178_v1  ;;  %v833_v59 = vunpack.c.h.bf16 %v1096_v43 }
   0xe   :  { %v228_v56 = vadd.f32 %v1192_v7, %v157_v49  ;;  %v161_v58 = vmul.f32 %v828_v51, %v1178_v1  ;;  %v229_v60 = vadd.f32 %v1192_v7, %v158_v52  ;;  %v162_v62 = vmul.f32 %v829_v54, %v1178_v1  ;;  %v1102_v51 = vld [vmem:[%s1502_s0 + $0x68] sm:$0xff]  }
   0xf   :  { %v230_v61 = vadd.f32 %v1192_v7, %v159_v53  ;;  %v163_v63 = vmul.f32 %v832_v55, %v1178_v1  ;;  %v231_v3 = vadd.f32 %v1192_v7, %v160_v57  ;;  %v164_v5 = vmul.f32 %v833_v59, %v1178_v1 }
  0x10   :  { %v292_v2 = vmax.f32 %v228_v56, 0.0  ;;  %v232_v4 = vadd.f32 %v1192_v7, %v161_v58  ;;  %v293_v6 = vmax.f32 %v229_v60, 0.0  ;;  %v233_v9 = vadd.f32 %v1192_v7, %v162_v62  ;;  %v1103_v60 = vld [vmem:[%s1502_s0 + $0x70] sm:$0xff]  }
  0x11   :  { %v294_v8 = vmax.f32 %v230_v61, 0.0  ;;  %v234_v10 = vadd.f32 %v1192_v7, %v163_v63  ;;  %v295_v12 = vmax.f32 %v231_v3, 0.0  ;;  %v235_v14 = vadd.f32 %v1192_v7, %v164_v5 }
  0x12   :  { %v296_v13 = vmax.f32 %v232_v4, 0.0  ;;  %v836_v15 = vunpack.c.l.bf16 %v1097_v0  ;;  %v953_v17 = vpack.c.bf16 %v293_v6, %v292_v2  ;;  %v297_v18 = vmax.f32 %v233_v9, 0.0  ;;  %v1104_v2 = vld [vmem:[%s1502_s0 + $0x78] sm:$0xff]  }
  0x13   :  { %v298_v19 = vmax.f32 %v234_v10, 0.0  ;;  %v837_v20 = vunpack.c.h.bf16 %v1097_v0  ;;  %v958_v21 = vpack.c.bf16 %v295_v12, %v294_v8  ;;  %v299_v22 = vmax.f32 %v235_v14, 0.0  ;;  %v1105_v12 = vld [vmem:[%s1502_s0 + $0x80] sm:$0xff]  }
  0x14   :  { %v165_v23 = vmul.f32 %v836_v15, %v1178_v1  ;;  %v840_v24 = vunpack.c.l.bf16 %v1098_v11  ;;  %1124 = vst [vmem:[%s1505_s3 + $0x20] sm:$0xff] %v953_v17   ;;  %v963_v26 = vpack.c.bf16 %v297_v18, %v296_v13  ;;  %v841_v28 = vunpack.c.h.bf16 %v1098_v11 }
  0x15   :  { %v166_v27 = vmul.f32 %v837_v20, %v1178_v1  ;;  %v844_v29 = vunpack.c.l.bf16 %v1099_v16  ;;  %1125 = vst [vmem:[%s1505_s3 + $0x28] sm:$0xff] %v958_v21   ;;  %v968_v30 = vpack.c.bf16 %v299_v22, %v298_v19  ;;  %v845_v33 = vunpack.c.h.bf16 %v1099_v16 }
  0x16   :  { %v236_v31 = vadd.f32 %v1192_v7, %v165_v23  ;;  %v167_v32 = vmul.f32 %v840_v24, %v1178_v1  ;;  %1126 = vst [vmem:[%s1505_s3 + $0x30] sm:$0xff] %v963_v26   ;;  %v168_v35 = vmul.f32 %v841_v28, %v1178_v1  ;;  %v848_v37 = vunpack.c.l.bf16 %v1100_v25 }
  0x17   :  { %v237_v34 = vadd.f32 %v1192_v7, %v166_v27  ;;  %v169_v36 = vmul.f32 %v844_v29, %v1178_v1  ;;  %1127 = vst [vmem:[%s1505_s3 + $0x38] sm:$0xff] %v968_v30   ;;  %v170_v41 = vmul.f32 %v845_v33, %v1178_v1  ;;  %v849_v42 = vunpack.c.h.bf16 %v1100_v25  ;;  %v1106_v29 = vld [vmem:[%s1502_s0 + $0x88] sm:$0xff]  }
  0x18   :  { %v300_v39 = vmax.f32 %v236_v31, 0.0  ;;  %v238_v40 = vadd.f32 %v1192_v7, %v167_v32  ;;  %v239_v44 = vadd.f32 %v1192_v7, %v168_v35  ;;  %v171_v46 = vmul.f32 %v848_v37, %v1178_v1 }
  0x19   :  { %v301_v43 = vmax.f32 %v237_v34, 0.0  ;;  %v240_v45 = vadd.f32 %v1192_v7, %v169_v36  ;;  %v241_v48 = vadd.f32 %v1192_v7, %v170_v41  ;;  %v172_v49 = vmul.f32 %v849_v42, %v1178_v1  ;;  %v1107_v34 = vld [vmem:[%s1502_s0 + $0x90] sm:$0xff]  }
  0x1a   :  { %v302_v47 = vmax.f32 %v238_v40, 0.0  ;;  %v852_v50 = vunpack.c.l.bf16 %v1101_v38  ;;  %v303_v53 = vmax.f32 %v239_v44, 0.0  ;;  %v242_v55 = vadd.f32 %v1192_v7, %v171_v46 }
  0x1b   :  { %v973_v52 = vpack.c.bf16 %v301_v43, %v300_v39  ;;  %v304_v54 = vmax.f32 %v240_v45, 0.0  ;;  %v305_v56 = vmax.f32 %v241_v48, 0.0  ;;  %v243_v57 = vadd.f32 %v1192_v7, %v172_v49  ;;  %v1108_v43 = vld [vmem:[%s1502_s0 + $0x98] sm:$0xff]  }
  0x1c   :  { %v853_v58 = vunpack.c.h.bf16 %v1101_v38  ;;  %v173_v59 = vmul.f32 %v852_v50, %v1178_v1  ;;  %v978_v61 = vpack.c.bf16 %v303_v53, %v302_v47  ;;  %v306_v62 = vmax.f32 %v242_v55, 0.0 }
  0x1d   :  { %1128 = vst [vmem:[%s1505_s3 + $0x40] sm:$0xff] %v973_v52   ;;  %v856_v63 = vunpack.c.l.bf16 %v1102_v51  ;;  %v857_v0 = vunpack.c.h.bf16 %v1102_v51  ;;  %v983_v3 = vpack.c.bf16 %v305_v56, %v304_v54  ;;  %v307_v4 = vmax.f32 %v243_v57, 0.0  ;;  %v1109_v56 = vld [vmem:[%s1502_s0 + $0xa0] sm:$0xff]  }
  0x1e   :  { %v174_v5 = vmul.f32 %v853_v58, %v1178_v1  ;;  %v244_v6 = vadd.f32 %v1192_v7, %v173_v59  ;;  %1129 = vst [vmem:[%s1505_s3 + $0x48] sm:$0xff] %v978_v61   ;;  %v860_v10 = vunpack.c.l.bf16 %v1103_v60  ;;  %v861_v11 = vunpack.c.h.bf16 %v1103_v60 }
  0x1f   :  { %v175_v8 = vmul.f32 %v856_v63, %v1178_v1  ;;  %v176_v9 = vmul.f32 %v857_v0, %v1178_v1  ;;  %1130 = vst [vmem:[%s1505_s3 + $0x50] sm:$0xff] %v983_v3   ;;  %v988_v13 = vpack.c.bf16 %v307_v4, %v306_v62  ;;  %v864_v16 = vunpack.c.l.bf16 %v1104_v2 }
  0x20   :  { %v245_v14 = vadd.f32 %v1192_v7, %v174_v5  ;;  %v308_v15 = vmax.f32 %v244_v6, 0.0  ;;  %v177_v19 = vmul.f32 %v860_v10, %v1178_v1  ;;  %v178_v20 = vmul.f32 %v861_v11, %v1178_v1 }
  0x21   :  { %v246_v17 = vadd.f32 %v1192_v7, %v175_v8  ;;  %v247_v18 = vadd.f32 %v1192_v7, %v176_v9  ;;  %1131 = vst [vmem:[%s1505_s3 + $0x58] sm:$0xff] %v988_v13   ;;  %v865_v22 = vunpack.c.h.bf16 %v1104_v2  ;;  %v179_v23 = vmul.f32 %v864_v16, %v1178_v1  ;;  %v1110_v2 = vld [vmem:[%s1502_s0 + $0xa8] sm:$0xff]   ;;  %v1111_v16 = vld [vmem:[%s1502_s0 + $0xb0] sm:$0xff]  }
  0x22   :  { %v309_v21 = vmax.f32 %v245_v14, 0.0  ;;  %v868_v24 = vunpack.c.l.bf16 %v1105_v12  ;;  %v248_v27 = vadd.f32 %v1192_v7, %v177_v19  ;;  %v249_v28 = vadd.f32 %v1192_v7, %v178_v20 }
  0x23   :  { %v310_v25 = vmax.f32 %v246_v17, 0.0  ;;  %v311_v26 = vmax.f32 %v247_v18, 0.0  ;;  %v180_v31 = vmul.f32 %v865_v22, %v1178_v1  ;;  %v250_v32 = vadd.f32 %v1192_v7, %v179_v23 }
  0x24   :  { %v993_v30 = vpack.c.bf16 %v309_v21, %v308_v15  ;;  %v869_v33 = vunpack.c.h.bf16 %v1105_v12  ;;  %v312_v36 = vmax.f32 %v248_v27, 0.0  ;;  %v313_v37 = vmax.f32 %v249_v28, 0.0  ;;  %v1112_v21 = vld [vmem:[%s1502_s0 + $0xb8] sm:$0xff]  }
  0x25   :  { %v998_v35 = vpack.c.bf16 %v311_v26, %v310_v25  ;;  %v181_v38 = vmul.f32 %v868_v24, %v1178_v1  ;;  %v251_v39 = vadd.f32 %v1192_v7, %v180_v31  ;;  %v314_v40 = vmax.f32 %v250_v32, 0.0 }
  0x26   :  { %1132 = vst [vmem:[%s1505_s3 + $0x60] sm:$0xff] %v993_v30   ;;  %v182_v41 = vmul.f32 %v869_v33, %v1178_v1  ;;  %v872_v42 = vunpack.c.l.bf16 %v1106_v29  ;;  %v1003_v44 = vpack.c.bf16 %v313_v37, %v312_v36  ;;  %v873_v46 = vunpack.c.h.bf16 %v1106_v29 }
  0x27   :  { %1133 = vst [vmem:[%s1505_s3 + $0x68] sm:$0xff] %v998_v35   ;;  %v252_v45 = vadd.f32 %v1192_v7, %v181_v38  ;;  %v876_v47 = vunpack.c.l.bf16 %v1107_v34  ;;  %v315_v48 = vmax.f32 %v251_v39, 0.0  ;;  %v877_v51 = vunpack.c.h.bf16 %v1107_v34  ;;  %v1113_v34 = vld [vmem:[%s1502_s0 + $0xc0] sm:$0xff]  }
  0x28   :  { %v253_v49 = vadd.f32 %v1192_v7, %v182_v41  ;;  %v183_v50 = vmul.f32 %v872_v42, %v1178_v1  ;;  %1134 = vst [vmem:[%s1505_s3 + $0x70] sm:$0xff] %v1003_v44   ;;  %v184_v53 = vmul.f32 %v873_v46, %v1178_v1  ;;  %v880_v55 = vunpack.c.l.bf16 %v1108_v43 }
  0x29   :  { %v316_v52 = vmax.f32 %v252_v45, 0.0  ;;  %v185_v54 = vmul.f32 %v876_v47, %v1178_v1  ;;  %v1008_v57 = vpack.c.bf16 %v315_v48, %v314_v40  ;;  %v186_v60 = vmul.f32 %v877_v51, %v1178_v1  ;;  %v1114_v47 = vld [vmem:[%s1502_s0 + $0xc8] sm:$0xff]  }
  0x2a   :  { %v317_v58 = vmax.f32 %v253_v49, 0.0  ;;  %v254_v59 = vadd.f32 %v1192_v7, %v183_v50  ;;  %v255_v61 = vadd.f32 %v1192_v7, %v184_v53  ;;  %v881_v63 = vunpack.c.h.bf16 %v1108_v43 }
  0x2b   :  { %v256_v62 = vadd.f32 %v1192_v7, %v185_v54  ;;  %v187_v0 = vmul.f32 %v880_v55, %v1178_v1  ;;  %1135 = vst [vmem:[%s1505_s3 + $0x78] sm:$0xff] %v1008_v57   ;;  %v257_v5 = vadd.f32 %v1192_v7, %v186_v60  ;;  %v884_v6 = vunpack.c.l.bf16 %v1109_v56 }
  0x2c   :  { %v1013_v3 = vpack.c.bf16 %v317_v58, %v316_v52  ;;  %v318_v4 = vmax.f32 %v254_v59, 0.0  ;;  %v319_v8 = vmax.f32 %v255_v61, 0.0  ;;  %v188_v10 = vmul.f32 %v881_v63, %v1178_v1  ;;  %v1115_v52 = vld [vmem:[%s1502_s0 + $0xd0] sm:$0xff]   ;;  %v1116_v61 = vld [vmem:[%s1502_s0 + $0xd8] sm:$0xff]  }
  0x2d   :  { %v320_v9 = vmax.f32 %v256_v62, 0.0  ;;  %v258_v11 = vadd.f32 %v1192_v7, %v187_v0  ;;  %v321_v12 = vmax.f32 %v257_v5, 0.0  ;;  %v885_v13 = vunpack.c.h.bf16 %v1109_v56 }
  0x2e   :  { %1136 = vst [vmem:[%s1505_s3 + $0x80] sm:$0xff] %v1013_v3   ;;  %v189_v14 = vmul.f32 %v884_v6, %v1178_v1  ;;  %v888_v15 = vunpack.c.l.bf16 %v1110_v2  ;;  %v1018_v17 = vpack.c.bf16 %v319_v8, %v318_v4  ;;  %v259_v18 = vadd.f32 %v1192_v7, %v188_v10 }
  0x2f   :  { %v322_v19 = vmax.f32 %v258_v11, 0.0  ;;  %v889_v20 = vunpack.c.h.bf16 %v1110_v2  ;;  %v1023_v22 = vpack.c.bf16 %v321_v12, %v320_v9  ;;  %v190_v23 = vmul.f32 %v885_v13, %v1178_v1  ;;  %v1117_v12 = vld [vmem:[%s1502_s0 + $0xe0] sm:$0xff]  }
  0x30   :  { %v260_v24 = vadd.f32 %v1192_v7, %v189_v14  ;;  %v191_v25 = vmul.f32 %v888_v15, %v1178_v1  ;;  %1137 = vst [vmem:[%s1505_s3 + $0x88] sm:$0xff] %v1018_v17   ;;  %v323_v26 = vmax.f32 %v259_v18, 0.0  ;;  %v892_v28 = vunpack.c.l.bf16 %v1111_v16 }
  0x31   :  { %v192_v27 = vmul.f32 %v889_v20, %v1178_v1  ;;  %v893_v29 = vunpack.c.h.bf16 %v1111_v16  ;;  %1138 = vst [vmem:[%s1505_s3 + $0x90] sm:$0xff] %v1023_v22   ;;  %v261_v30 = vadd.f32 %v1192_v7, %v190_v23  ;;  %v896_v33 = vunpack.c.l.bf16 %v1112_v21 }
  0x32   :  { %v324_v31 = vmax.f32 %v260_v24, 0.0  ;;  %v262_v32 = vadd.f32 %v1192_v7, %v191_v25  ;;  %v1028_v35 = vpack.c.bf16 %v323_v26, %v322_v19  ;;  %v193_v37 = vmul.f32 %v892_v28, %v1178_v1 }
  0x33   :  { %v263_v36 = vadd.f32 %v1192_v7, %v192_v27  ;;  %v194_v38 = vmul.f32 %v893_v29, %v1178_v1  ;;  %v325_v39 = vmax.f32 %v261_v30, 0.0  ;;  %v897_v41 = vunpack.c.h.bf16 %v1112_v21  ;;  %v1118_v21 = vld [vmem:[%s1502_s0 + $0xe8] sm:$0xff]  }
  0x34   :  { %v326_v40 = vmax.f32 %v262_v32, 0.0  ;;  %v195_v42 = vmul.f32 %v896_v33, %v1178_v1  ;;  %1139 = vst [vmem:[%s1505_s3 + $0x98] sm:$0xff] %v1028_v35   ;;  %v264_v44 = vadd.f32 %v1192_v7, %v193_v37  ;;  %v900_v46 = vunpack.c.l.bf16 %v1113_v34 }
  0x35   :  { %v327_v43 = vmax.f32 %v263_v36, 0.0  ;;  %v265_v45 = vadd.f32 %v1192_v7, %v194_v38  ;;  %v1033_v48 = vpack.c.bf16 %v325_v39, %v324_v31  ;;  %v196_v49 = vmul.f32 %v897_v41, %v1178_v1  ;;  %v1120_v39 = vld [vmem:[%s1502_s0 + $0xf8] sm:$0xff]  }
  0x36   :  { %v266_v50 = vadd.f32 %v1192_v7, %v195_v42  ;;  %v901_v51 = vunpack.c.h.bf16 %v1113_v34  ;;  %v328_v54 = vmax.f32 %v264_v44, 0.0  ;;  %v197_v56 = vmul.f32 %v900_v46, %v1178_v1  ;;  %v1119_v34 = vld [vmem:[%s1502_s0 + $0xf0] sm:$0xff]  }
  0x37   :  { %v1038_v53 = vpack.c.bf16 %v327_v43, %v326_v40  ;;  %v329_v55 = vmax.f32 %v265_v45, 0.0  ;;  %1140 = vst [vmem:[%s1505_s3 + $0xa0] sm:$0xff] %v1033_v48   ;;  %v267_v57 = vadd.f32 %v1192_v7, %v196_v49  ;;  %v904_v60 = vunpack.c.l.bf16 %v1114_v47 }
  0x38   :  { %v330_v58 = vmax.f32 %v266_v50, 0.0  ;;  %v198_v59 = vmul.f32 %v901_v51, %v1178_v1  ;;  %v268_v63 = vadd.f32 %v1192_v7, %v197_v56  ;;  %v905_v0 = vunpack.c.h.bf16 %v1114_v47 }
  0x39   :  { %1141 = vst [vmem:[%s1505_s3 + $0xa8] sm:$0xff] %v1038_v53   ;;  %v1043_v62 = vpack.c.bf16 %v329_v55, %v328_v54  ;;  %v908_v2 = vunpack.c.l.bf16 %v1115_v52  ;;  %v331_v3 = vmax.f32 %v267_v57, 0.0  ;;  %v199_v5 = vmul.f32 %v904_v60, %v1178_v1 }
  0x3a   :  { %v269_v4 = vadd.f32 %v1192_v7, %v198_v59  ;;  %v909_v6 = vunpack.c.h.bf16 %v1115_v52  ;;  %v332_v8 = vmax.f32 %v268_v63, 0.0  ;;  %v200_v9 = vmul.f32 %v905_v0, %v1178_v1 }
  0x3b   :  { %1142 = vst [vmem:[%s1505_s3 + $0xb0] sm:$0xff] %v1043_v62   ;;  %v201_v10 = vmul.f32 %v908_v2, %v1178_v1  ;;  %v912_v11 = vunpack.c.l.bf16 %v1116_v61  ;;  %v1048_v13 = vpack.c.bf16 %v331_v3, %v330_v58  ;;  %v270_v15 = vadd.f32 %v1192_v7, %v199_v5 }
  0x3c   :  { %v333_v14 = vmax.f32 %v269_v4, 0.0  ;;  %v202_v16 = vmul.f32 %v909_v6, %v1178_v1  ;;  %v271_v17 = vadd.f32 %v1192_v7, %v200_v9  ;;  %v913_v19 = vunpack.c.h.bf16 %v1116_v61 }
  0x3d   :  { %v272_v18 = vadd.f32 %v1192_v7, %v201_v10  ;;  %v203_v20 = vmul.f32 %v912_v11, %v1178_v1  ;;  %1143 = vst [vmem:[%s1505_s3 + $0xb8] sm:$0xff] %v1048_v13   ;;  %v334_v23 = vmax.f32 %v270_v15, 0.0  ;;  %v916_v25 = vunpack.c.l.bf16 %v1117_v12 }
  0x3e   :  { %v1053_v22 = vpack.c.bf16 %v333_v14, %v332_v8  ;;  %v273_v24 = vadd.f32 %v1192_v7, %v202_v16  ;;  %v335_v26 = vmax.f32 %v271_v17, 0.0  ;;  %v204_v28 = vmul.f32 %v913_v19, %v1178_v1 }
  0x3f   :  { %v336_v27 = vmax.f32 %v272_v18, 0.0  ;;  %v274_v29 = vadd.f32 %v1192_v7, %v203_v20  ;;  %v917_v31 = vunpack.c.h.bf16 %v1117_v12  ;;  %v205_v32 = vmul.f32 %v916_v25, %v1178_v1 }
  0x40   :  { %1144 = vst [vmem:[%s1505_s3 + $0xc0] sm:$0xff] %v1053_v22   ;;  %v337_v30 = vmax.f32 %v273_v24, 0.0  ;;  %v920_v33 = vunpack.c.l.bf16 %v1118_v21  ;;  %v1058_v35 = vpack.c.bf16 %v335_v26, %v334_v23  ;;  %v275_v36 = vadd.f32 %v1192_v7, %v204_v28 }
  0x41   :  { %v338_v37 = vmax.f32 %v274_v29, 0.0  ;;  %v921_v38 = vunpack.c.h.bf16 %v1118_v21  ;;  %v206_v41 = vmul.f32 %v917_v31, %v1178_v1  ;;  %v276_v42 = vadd.f32 %v1192_v7, %v205_v32 }
  0x42   :  { %v1063_v40 = vpack.c.bf16 %v337_v30, %v336_v27  ;;  %v207_v43 = vmul.f32 %v920_v33, %v1178_v1  ;;  %1145 = vst [vmem:[%s1505_s3 + $0xc8] sm:$0xff] %v1058_v35   ;;  %v339_v44 = vmax.f32 %v275_v36, 0.0  ;;  %v924_v46 = vunpack.c.l.bf16 %v1119_v34 }
  0x43   :  { %v208_v45 = vmul.f32 %v921_v38, %v1178_v1  ;;  %v925_v47 = vunpack.c.h.bf16 %v1119_v34  ;;  %v277_v48 = vadd.f32 %v1192_v7, %v206_v41  ;;  %v340_v49 = vmax.f32 %v276_v42, 0.0 }
  0x44   :  { %1146 = vst [vmem:[%s1505_s3 + $0xd0] sm:$0xff] %v1063_v40   ;;  %v278_v50 = vadd.f32 %v1192_v7, %v207_v43  ;;  %v928_v51 = vunpack.c.l.bf16 %v1120_v39  ;;  %v1068_v52 = vpack.c.bf16 %v339_v44, %v338_v37  ;;  %v209_v54 = vmul.f32 %v924_v46, %v1178_v1 }
  0x45   :  { %v279_v53 = vadd.f32 %v1192_v7, %v208_v45  ;;  %v210_v55 = vmul.f32 %v925_v47, %v1178_v1  ;;  %v341_v56 = vmax.f32 %v277_v48, 0.0  ;;  %v929_v58 = vunpack.c.h.bf16 %v1120_v39 }
  0x46   :  { %v342_v57 = vmax.f32 %v278_v50, 0.0  ;;  %v211_v59 = vmul.f32 %v928_v51, %v1178_v1  ;;  %1147 = vst [vmem:[%s1505_s3 + $0xd8] sm:$0xff] %v1068_v52   ;;  %v280_v61 = vadd.f32 %v1192_v7, %v209_v54 }
  0x47   :  { %v343_v60 = vmax.f32 %v279_v53, 0.0  ;;  %v281_v62 = vadd.f32 %v1192_v7, %v210_v55  ;;  %v1073_v63 = vpack.c.bf16 %v341_v56, %v340_v49  ;;  %v212_v0 = vmul.f32 %v929_v58, %v1178_v1 }
  0x48   :  { %v282_v2 = vadd.f32 %v1192_v7, %v211_v59  ;;  %v344_v4 = vmax.f32 %v280_v61, 0.0 }
  0x49   :  { %v1078_v3 = vpack.c.bf16 %v343_v60, %v342_v57  ;;  %v345_v5 = vmax.f32 %v281_v62, 0.0  ;;  %1148 = vst [vmem:[%s1505_s3 + $0xe0] sm:$0xff] %v1073_v63   ;;  %v283_v6 = vadd.f32 %v1192_v7, %v212_v0 }
  0x4a   :  { %v346_v8 = vmax.f32 %v282_v2, 0.0 }
  0x4b   :  { %1149 = vst [vmem:[%s1505_s3 + $0xe8] sm:$0xff] %v1078_v3   ;;  %v1083_v9 = vpack.c.bf16 %v345_v5, %v344_v4  ;;  %v347_v10 = vmax.f32 %v283_v6, 0.0 }
  0x4d   :  { %1150 = vst [vmem:[%s1505_s3 + $0xf0] sm:$0xff] %v1083_v9   ;;  %v1088_v1 = vpack.c.bf16 %v347_v10, %v346_v8 }
  0x4f   :  { %1151 = vst [vmem:[%s1505_s3 + $0xf8] sm:$0xff] %v1088_v1  }

// kernel: resnet_filter_forward.16
= control target key start
LH: loop header
LB: loop body
LE: loop exit
PB: predicated region body
PF: predicated region fallthrough
CT: control target
= control target key end

     0   :  { %s791_s12 = smov 0   ;;  %s884_s0 = inlined_call_operand.vmem [shape: bf16[128,256], index: 0, kind: input, shape index: {}]   ;;  %s885_s1 = inlined_call_operand.vmem [shape: bf16[256,128], index: 1, kind: input, shape index: {}]   ;;  %s886_s2 = inlined_call_operand.vmem [shape: bf16[128,128], index: 2, kind: output, shape index: {0}]   ;;  %s887_s3 = inlined_call_operand.vmem [shape: f32[2,2,128], index: 3, kind: output, shape index: {1}]  }
   0x1 LB: > { %s797_s13 = sadd.s32 4294967295, %s769_s12   ;;  %p598_p0 = scmp.ge.s32.totalorder %s769_s12, 1  ;;  %s769_s12 = sphi %s791_s12, %s14_s12  }
   0x2   : > { %p142_p1 = scmp.lt.s32.totalorder %s769_s12, 3 }
   0x4   : > { %p143_p2 = pnand %p598_p0, %p142_p1 }
   0x5   : > { %v735_v0 = vld [vmem:[%s885_s1 + $0x40] sm:$0xff] (!%p143_p2)   ;;  %s599_s16 = sshll.u32 (!%p143_p2), %s797_s13, 3  ;;  %v737_v2 = vld [vmem:[%s885_s1 + $0x48] sm:$0xff] (!%p143_p2)   ;;  %v739_v4 = vld [vmem:[%s885_s1 + $0x50] sm:$0xff] (!%p143_p2)   ;;  %p184_p4 = scmp.lt.s32.totalorder (!%p143_p2), %s797_s13, 1  ;;  %vm504_vm0 = vcmask (!%p143_p2), 1040384  }
   0x6   : > { %146 = sbr.rel (%p143_p2) target bundleno = 289 (0x121), region = 28  ;;  %v736_v1 = vld [vmem:[%s885_s1] sm:$0xff] (!%p143_p2)   ;;  %671 = vmatprep.subr.bf16.mxu0 (!%p143_p2), %v735_v0  ;;  %711 = vmatprep.subr.bf16.mxu1 (!%p143_p2), %v735_v0  ;;  %v738_v3 = vld [vmem:[%s885_s1 + $0x8] sm:$0xff] (!%p143_p2)   ;;  %p172_p3 = scmp.lt.s32.totalorder (!%p143_p2), %s599_s16, 15  ;;  %v740_v5 = vld [vmem:[%s885_s1 + $0x10] sm:$0xff] (!%p143_p2)  }
   0x7   : > { %672 = vmatpush3.bf16.msra.mxu0 (!%p143_p2), %v736_v1  ;;  %719 = vmatpush3.bf16.msra.mxu1 (!%p143_p2), %v736_v1  ;;  %v741_v6 = vld [vmem:[%s885_s1 + $0x58] sm:$0xff] (!%p143_p2)   ;;  %v743_v8 = vld [vmem:[%s885_s1 + $0x60] sm:$0xff] (!%p143_p2)   ;;  %v745_v10 = vld [vmem:[%s885_s1 + $0x68] sm:$0xff] (!%p143_p2)  }
   0x8   : > { %673 = vmatprep.subr.bf16.mxu0 (!%p143_p2), %v737_v2  ;;  %712 = vmatprep.subr.bf16.mxu1 (!%p143_p2), %v737_v2  ;;  %v742_v7 = vld [vmem:[%s885_s1 + $0x18] sm:$0xff] (!%p143_p2)   ;;  %v744_v9 = vld [vmem:[%s885_s1 + $0x20] sm:$0xff] (!%p143_p2)   ;;  %v746_v13 = vld [vmem:[%s885_s1 + $0x28] sm:$0xff] (!%p143_p2)  }
   0x9   : > { %v747_v14 = vld [vmem:[%s885_s1 + $0x70] sm:$0xff] (!%p143_p2)   ;;  %v749_v16 = vld [vmem:[%s885_s1 + $0x78] sm:$0xff] (!%p143_p2)  }
   0xa   : > { %v748_v15 = vld [vmem:[%s885_s1 + $0x30] sm:$0xff] (!%p143_p2)   ;;  %v750_v17 = vld [vmem:[%s885_s1 + $0x38] sm:$0xff] (!%p143_p2)  }
   0xb   : > { %674 = vmatpush3.bf16.msra.mxu0 (!%p143_p2), %v738_v3  ;;  %720 = vmatpush3.bf16.msra.mxu1 (!%p143_p2), %v738_v3 }
   0xc   : > { %675 = vmatprep.subr.bf16.mxu0 (!%p143_p2), %v739_v4  ;;  %713 = vmatprep.subr.bf16.mxu1 (!%p143_p2), %v739_v4 }
   0xd   : > { %s889_s16 = smov (!%p172_p3, %s599_s16), 15  ;;  %s891_s13 = smov (!%p184_p4, %s797_s13), 1 }
   0xe   : > { %s639_s4 = sshll.u32 %s889_s16, 3  ;;  %s603_s27 = sshll.u32 %s889_s16, 2 }
   0xf   : > { %676 = vmatpush3.bf16.msra.mxu0 %v740_v5  ;;  %721 = vmatpush3.bf16.msra.mxu1 %v740_v5  ;;  %s835_s9 = scalar_lea.vmem %s884_s0, %s639_s4  ;;  %s870_s30 = scalar_lea.vmem %s886_s2, %s603_s27 }
  0x10   : > { %677 = vmatprep.subr.bf16.mxu0 %v741_v6  ;;  %714 = vmatprep.subr.bf16.mxu1 %v741_v6  ;;  %v753_v11 = vld [vmem:[%s835_s9 + $0x4] ss:$8 sps:$4 sm:$0xff]   ;;  %v751_v18 = vld [vmem:[%s835_s9] ss:$8 sps:$4 sm:$0xff]   ;;  %v757_v20 = vld [vmem:[%s835_s9 + $0x14] ss:$8 sps:$4 sm:$0xff]  }
  0x11   : > { %v756_v12 = vld [vmem:[%s835_s9 + $0x24] ss:$8 sps:$4 sm:$0xff]   ;;  %397 = vmatprep.mubr.bf16.mxu0 %v753_v11  ;;  %v754_v19 = vld [vmem:[%s835_s9 + $0x20] ss:$8 sps:$4 sm:$0xff]   ;;  %v760_v21 = vld [vmem:[%s835_s9 + $0x34] ss:$8 sps:$4 sm:$0xff]  }
  0x12   : > { %413 = vmatprep.mubr.bf16.mxu1 %v756_v12  ;;  %v759_v22 = vld [vmem:[%s835_s9 + $0x10] ss:$8 sps:$4 sm:$0xff]   ;;  %s604_s16 = sshll.u32 %s891_s13, 1 }
  0x13   : > { %678 = vmatpush3.bf16.msra.mxu0 %v742_v7  ;;  %722 = vmatpush3.bf16.msra.mxu1 %v742_v7  ;;  %v762_v23 = vld [vmem:[%s835_s9 + $0x30] ss:$8 sps:$4 sm:$0xff]   ;;  %s187_s6 = scalar_lea.vmem %s887_s3, %s604_s16 }
  0x14   : > { %679 = vmatprep.subr.bf16.mxu0 %v743_v8  ;;  %715 = vmatprep.subr.bf16.mxu1 %v743_v8 }
  0x17   : > { %680 = vmatpush3.bf16.msra.mxu0 %v744_v9  ;;  %723 = vmatpush3.bf16.msra.mxu1 %v744_v9 }
  0x18   : > { %681 = vmatprep.subr.bf16.mxu0 %v745_v10  ;;  %716 = vmatprep.subr.bf16.mxu1 %v745_v10 }
  0x1b   : > { %682 = vmatpush3.bf16.msra.mxu0 %v746_v13  ;;  %724 = vmatpush3.bf16.msra.mxu1 %v746_v13 }
  0x1c   : > { %683 = vmatprep.subr.bf16.mxu0 %v747_v14  ;;  %717 = vmatprep.subr.bf16.mxu1 %v747_v14 }
  0x1f   : > { %684 = vmatpush3.bf16.msra.mxu0 %v748_v15  ;;  %725 = vmatpush3.bf16.msra.mxu1 %v748_v15 }
  0x20   : > { %685 = vmatprep.subr.bf16.mxu0 %v749_v16  ;;  %718 = vmatprep.subr.bf16.mxu1 %v749_v16 }
  0x23   : > { %686 = vmatpush3.bf16.msra.mxu0 %v750_v17  ;;  %726 = vmatpush3.bf16.msra.mxu1 %v750_v17 }
  0x26   : > { %398 = vmatmul.mubr.bf16.vlgmr.msra.gmra.mrb[0].mxu0 %v751_v18  ;;  %414 = vmatmul.mubr.bf16.vlgmr.msra.gmra.mrb[0].mxu1 %v754_v19 }
  0x27   : > { %405 = vmatprep.mubr.bf16.mxu0 %v757_v20  ;;  %421 = vmatprep.mubr.bf16.mxu1 %v760_v21 }
  0x2e   : > { %406 = vmatmul.mubr.bf16.gmra.mrb[4].mxu0 %v759_v22  ;;  %422 = vmatmul.mubr.bf16.gmra.mrb[4].mxu1 %v762_v23 }
  0xf9   : > { %v687_v24 = vpop.f32.mrb[0].mxu0  ;;  %v699_v25 = vpop.f32.mrb[0].mxu1 }
  0xfa   : > { %v688_v26 = vpop.f32.mrb[1].mxu0  ;;  %v700_v27 = vpop.f32.mrb[1].mxu1 }
  0xfb   : > { %v689_v28 = vadd.f32 %v688_v26, %v687_v24  ;;  %v690_v29 = vpop.f32.mrb[2].mxu0  ;;  %v701_v30 = vadd.f32 %v700_v27, %v699_v25  ;;  %v702_v31 = vpop.f32.mrb[2].mxu1 }
  0xfc   : > { %v691_v32 = vpop.f32.mrb[3].mxu0  ;;  %v703_v33 = vpop.f32.mrb[3].mxu1 }
  0xfd   : > { %v692_v34 = vadd.f32 %v691_v32, %v690_v29  ;;  %v704_v35 = vadd.f32 %v703_v33, %v702_v31  ;;  %v483_v36 = vmul.f32 %v689_v28, %v689_v28  ;;  %v487_v61 = vmul.f32 %v701_v30, %v701_v30 }
  0xff   : > { %v651_v37 = vpack.c.bf16 %v692_v34, %v689_v28  ;;  %v470_v38 = vadd.f32 %v692_v34, %v689_v28  ;;  %v484_v39 = vmul.f32 %v692_v34, %v692_v34  ;;  %v661_v40 = vpack.c.bf16 %v704_v35, %v701_v30 }
 0x100   : > { %v488_v0 = vmul.f32 %v704_v35, %v704_v35 }
 0x101   : > { %652 = vst [vmem:[%s870_s30] sm:$0xff] %v651_v37   ;;  %v491_v41 = vadd.f32 %v484_v39, %v483_v36  ;;  %v693_v42 = vpop.f32.mrb[4].mxu0  ;;  %669 = vst [vmem:[%s870_s30 + $0x10] sm:$0xff] %v661_v40   ;;  %v705_v43 = vpop.f32.mrb[4].mxu1 }
 0x102   : > { %v694_v44 = vpop.f32.mrb[5].mxu0  ;;  %v706_v45 = vpop.f32.mrb[5].mxu1 }
 0x103   : > { %v695_v46 = vadd.f32 %v694_v44, %v693_v42  ;;  %v696_v47 = vpop.f32.mrb[6].mxu0  ;;  %v707_v48 = vadd.f32 %v706_v45, %v705_v43  ;;  %v708_v49 = vpop.f32.mrb[6].mxu1 }
 0x104   : > { %v697_v50 = vpop.f32.mrb[7].mxu0  ;;  %v709_v51 = vpop.f32.mrb[7].mxu1 }
 0x105   : > { %v471_v52 = vadd.f32 %v695_v46, %v470_v38  ;;  %v485_v53 = vmul.f32 %v695_v46, %v695_v46  ;;  %v698_v54 = vadd.f32 %v697_v50, %v696_v47  ;;  %v710_v55 = vadd.f32 %v709_v51, %v708_v49 }
 0x106   : > { %v489_v3 = vmul.f32 %v707_v48, %v707_v48 }
 0x107   : > { %v492_v56 = vadd.f32 %v491_v41, %v485_v53  ;;  %v656_v57 = vpack.c.bf16 %v698_v54, %v695_v46  ;;  %v472_v58 = vadd.f32 %v698_v54, %v471_v52  ;;  %v486_v59 = vmul.f32 %v698_v54, %v698_v54 }
 0x108   : > { %v666_v60 = vpack.c.bf16 %v710_v55, %v707_v48  ;;  %v490_v8 = vmul.f32 %v710_v55, %v710_v55 }
 0x109   : > { %668 = vst [vmem:[%s870_s30 + $0x8] sm:$0xff] %v656_v57   ;;  %v473_v62 = vadd.f32 %v701_v30, %v472_v58  ;;  %v493_v63 = vadd.f32 %v492_v56, %v486_v59 }
 0x10a   : > { %670 = vst [vmem:[%s870_s30 + $0x18] sm:$0xff] %v666_v60  }
 0x10b   : > { %v494_v1 = vadd.f32 %v493_v63, %v487_v61  ;;  %v474_v2 = vadd.f32 %v704_v35, %v473_v62 }
 0x10d   : > { %v475_v4 = vadd.f32 %v707_v48, %v474_v2  ;;  %v495_v5 = vadd.f32 %v494_v1, %v488_v0 }
 0x10f   : > { %v496_v6 = vadd.f32 %v495_v5, %v489_v3  ;;  %v476_v7 = vadd.f32 %v710_v55, %v475_v4 }
 0x111   : > { %v477_v9 = vrot.slane %v476_v7, 4  ;;  %v497_v10 = vadd.f32 %v496_v6, %v490_v8 }
 0x113   : > { %v478_v11 = vadd.f32 %v477_v9, %v476_v7  ;;  %v498_v12 = vrot.slane %v497_v10, 4 }
 0x115   : > { %v479_v13 = vrot.slane %v478_v11, 2  ;;  %v499_v14 = vadd.f32 %v498_v12, %v497_v10 }
 0x117   : > { %v480_v15 = vadd.f32 %v479_v13, %v478_v11  ;;  %v500_v16 = vrot.slane %v499_v14, 2 }
 0x119   : > { %v481_v17 = vrot.slane %v480_v15, 1  ;;  %v501_v18 = vadd.f32 %v500_v16, %v499_v14 }
 0x11b   : > { %v502_v19 = vrot.slane %v501_v18, 1  ;;  %v482_v20 = vadd.f32 %v481_v17, %v480_v15 }
 0x11d   : > { %v503_v21 = vadd.f32 %v502_v19, %v501_v18 }
 0x11f   : > { %v505_v22 = vsel %vm504_vm0, %v482_v20, %v503_v21 }
 0x120   : > { %506 = vst [vmem:[%s187_s6] sm:$0x3] %v505_v22 }
 0x121 PF: > { %s14_s12 = sadd.s32 1, %s769_s12  }
 0x122   : > { %p11_p5 = scmp.ge.s32.totalorder %s14_s12, 4  }
 0x124   :  { %13 = sbr.rel (!%p11_p5) target bundleno = 1 (0x1), region = 70 }

// kernel: resnet_filter_forward.17
= control target key start
LH: loop header
LB: loop body
LE: loop exit
PB: predicated region body
PF: predicated region fallthrough
CT: control target
= control target key end

     0   :  { %s422_s0 = inlined_call_operand.vmem [shape: bf16[128,128], index: 0, kind: input, shape index: {}]   ;;  %s423_s1 = inlined_call_operand.vmem [shape: f32[1,128], index: 1, kind: input, shape index: {}]   ;;  %s424_s2 = inlined_call_operand.vmem [shape: f32[1,128], index: 2, kind: input, shape index: {}]   ;;  %s425_s3 = inlined_call_operand.vmem [shape: bf16[128,128], index: 3, kind: output, shape index: {}]  }
   0x1   :  { %v227_v0 = vld [vmem:[%s422_s0] sm:$0xff]   ;;  %v298_v4 = vld [vmem:[%s422_s0 + $0x8] sm:$0xff]   ;;  %v299_v5 = vld [vmem:[%s422_s0 + $0x10] sm:$0xff]  }
   0x2   :  { %v338_v1 = vld [vmem:[%s423_s1] ss:$0 sm:$0xff]  ;;  %v228_v2 = vunpack.c.l.bf16 %v227_v0  ;;  %v229_v3 = vunpack.c.h.bf16 %v227_v0  ;;  %v300_v6 = vld [vmem:[%s422_s0 + $0x18] sm:$0xff]   ;;  %v232_v8 = vunpack.c.l.bf16 %v298_v4  ;;  %v233_v9 = vunpack.c.h.bf16 %v298_v4  ;;  %v302_v33 = vld [vmem:[%s422_s0 + $0x28] sm:$0xff]  }
   0x3   :  { %v352_v7 = vld [vmem:[%s424_s2] ss:$0 sm:$0xff]  ;;  %v236_v10 = vunpack.c.l.bf16 %v299_v5  ;;  %v237_v11 = vunpack.c.h.bf16 %v299_v5  ;;  %v240_v14 = vunpack.c.l.bf16 %v300_v6  ;;  %v241_v15 = vunpack.c.h.bf16 %v300_v6  ;;  %v303_v38 = vld [vmem:[%s422_s0 + $0x30] sm:$0xff]   ;;  %v304_v43 = vld [vmem:[%s422_s0 + $0x38] sm:$0xff]  }
   0x4   :  { %v53_v12 = vmul.f32 %v228_v2, %v338_v1  ;;  %v54_v13 = vmul.f32 %v229_v3, %v338_v1  ;;  %v55_v16 = vmul.f32 %v232_v8, %v338_v1  ;;  %v56_v17 = vmul.f32 %v233_v9, %v338_v1  ;;  %v301_v28 = vld [vmem:[%s422_s0 + $0x20] sm:$0xff]  }
   0x5   :  { %v57_v18 = vmul.f32 %v236_v10, %v338_v1  ;;  %v58_v19 = vmul.f32 %v237_v11, %v338_v1  ;;  %v59_v22 = vmul.f32 %v240_v14, %v338_v1  ;;  %v60_v23 = vmul.f32 %v241_v15, %v338_v1 }
   0x6   :  { %v76_v20 = vadd.f32 %v352_v7, %v53_v12  ;;  %v77_v21 = vadd.f32 %v352_v7, %v54_v13  ;;  %v78_v24 = vadd.f32 %v352_v7, %v55_v16  ;;  %v79_v25 = vadd.f32 %v352_v7, %v56_v17 }
   0x7   :  { %v80_v26 = vadd.f32 %v352_v7, %v57_v18  ;;  %v81_v27 = vadd.f32 %v352_v7, %v58_v19  ;;  %v82_v31 = vadd.f32 %v352_v7, %v59_v22  ;;  %v83_v32 = vadd.f32 %v352_v7, %v60_v23 }
   0x8   :  { %v92_v29 = vmax.f32 %v76_v20, 0.0  ;;  %v93_v30 = vmax.f32 %v77_v21, 0.0  ;;  %v94_v34 = vmax.f32 %v78_v24, 0.0  ;;  %v95_v35 = vmax.f32 %v79_v25, 0.0 }
   0x9   :  { %v96_v36 = vmax.f32 %v80_v26, 0.0  ;;  %v97_v37 = vmax.f32 %v81_v27, 0.0  ;;  %v98_v40 = vmax.f32 %v82_v31, 0.0  ;;  %v99_v41 = vmax.f32 %v83_v32, 0.0 }
   0xa   :  { %v261_v39 = vpack.c.bf16 %v93_v30, %v92_v29  ;;  %v244_v42 = vunpack.c.l.bf16 %v301_v28  ;;  %v266_v44 = vpack.c.bf16 %v95_v35, %v94_v34  ;;  %v245_v46 = vunpack.c.h.bf16 %v301_v28 }
   0xb   :  { %v271_v45 = vpack.c.bf16 %v97_v37, %v96_v36  ;;  %v248_v47 = vunpack.c.l.bf16 %v302_v33  ;;  %v276_v48 = vpack.c.bf16 %v99_v41, %v98_v40  ;;  %v249_v50 = vunpack.c.h.bf16 %v302_v33 }
   0xc   :  { %262 = vst [vmem:[%s425_s3] sm:$0xff] %v261_v39   ;;  %v61_v49 = vmul.f32 %v244_v42, %v338_v1  ;;  %v252_v51 = vunpack.c.l.bf16 %v303_v38  ;;  %305 = vst [vmem:[%s425_s3 + $0x8] sm:$0xff] %v266_v44   ;;  %v62_v52 = vmul.f32 %v245_v46, %v338_v1  ;;  %v253_v54 = vunpack.c.h.bf16 %v303_v38 }
   0xd   :  { %306 = vst [vmem:[%s425_s3 + $0x10] sm:$0xff] %v271_v45   ;;  %v63_v53 = vmul.f32 %v248_v47, %v338_v1  ;;  %v256_v55 = vunpack.c.l.bf16 %v304_v43  ;;  %307 = vst [vmem:[%s425_s3 + $0x18] sm:$0xff] %v276_v48   ;;  %v64_v57 = vmul.f32 %v249_v50, %v338_v1  ;;  %v257_v59 = vunpack.c.h.bf16 %v304_v43 }
   0xe   :  { %v84_v56 = vadd.f32 %v352_v7, %v61_v49  ;;  %v65_v58 = vmul.f32 %v252_v51, %v338_v1  ;;  %v85_v60 = vadd.f32 %v352_v7, %v62_v52  ;;  %v66_v62 = vmul.f32 %v253_v54, %v338_v1 }
   0xf   :  { %v86_v61 = vadd.f32 %v352_v7, %v63_v53  ;;  %v67_v63 = vmul.f32 %v256_v55, %v338_v1  ;;  %v87_v2 = vadd.f32 %v352_v7, %v64_v57  ;;  %v68_v4 = vmul.f32 %v257_v59, %v338_v1 }
  0x10   :  { %v100_v0 = vmax.f32 %v84_v56, 0.0  ;;  %v88_v3 = vadd.f32 %v352_v7, %v65_v58  ;;  %v101_v5 = vmax.f32 %v85_v60, 0.0  ;;  %v89_v8 = vadd.f32 %v352_v7, %v66_v62 }
  0x11   :  { %v102_v6 = vmax.f32 %v86_v61, 0.0  ;;  %v90_v9 = vadd.f32 %v352_v7, %v67_v63  ;;  %v103_v10 = vmax.f32 %v87_v2, 0.0  ;;  %v91_v12 = vadd.f32 %v352_v7, %v68_v4 }
  0x12   :  { %v104_v11 = vmax.f32 %v88_v3, 0.0  ;;  %v281_v13 = vpack.c.bf16 %v101_v5, %v100_v0  ;;  %v105_v14 = vmax.f32 %v89_v8, 0.0 }
  0x13   :  { %v106_v15 = vmax.f32 %v90_v9, 0.0  ;;  %v286_v16 = vpack.c.bf16 %v103_v10, %v102_v6  ;;  %v107_v17 = vmax.f32 %v91_v12, 0.0 }
  0x14   :  { %308 = vst [vmem:[%s425_s3 + $0x20] sm:$0xff] %v281_v13   ;;  %v291_v1 = vpack.c.bf16 %v105_v14, %v104_v11 }
  0x15   :  { %309 = vst [vmem:[%s425_s3 + $0x28] sm:$0xff] %v286_v16   ;;  %v296_v18 = vpack.c.bf16 %v107_v17, %v106_v15 }
  0x16   :  { %310 = vst [vmem:[%s425_s3 + $0x30] sm:$0xff] %v291_v1  }
  0x17   :  { %311 = vst [vmem:[%s425_s3 + $0x38] sm:$0xff] %v296_v18  }

// kernel: resnet_filter_forward.18
= control target key start
LH: loop header
LB: loop body
LE: loop exit
PB: predicated region body
PF: predicated region fallthrough
CT: control target
= control target key end

     0   :  { %s767_s12 = smov 0   ;;  %s868_s0 = inlined_call_operand.vmem [shape: bf16[32,384], index: 0, kind: input, shape index: {}]   ;;  %s869_s1 = inlined_call_operand.vmem [shape: bf16[384,128], index: 1, kind: input, shape index: {}]   ;;  %s870_s2 = inlined_call_operand.vmem [shape: bf16[32,128], index: 2, kind: output, shape index: {0}]   ;;  %s871_s3 = inlined_call_operand.vmem [shape: f32[2,2,128], index: 3, kind: output, shape index: {1}]  }
   0x1 LB: > { %s773_s13 = sadd.s32 4294967295, %s743_s12   ;;  %p603_p0 = scmp.ge.s32.totalorder %s743_s12, 1  ;;  %s743_s12 = sphi %s767_s12, %s14_s12  }
   0x2   : > { %p142_p1 = scmp.lt.s32.totalorder %s743_s12, 3 }
   0x4   : > { %p143_p2 = pnand %p603_p0, %p142_p1 }
   0x5   : > { %v709_v0 = vld [vmem:[%s869_s1 + $0x40] sm:$0xff] (!%p143_p2)   ;;  %v745_v1 = vmov (!%p143_p2), 0.0   ;;  %v712_v4 = vld [vmem:[%s869_s1 + $0x48] sm:$0xff] (!%p143_p2)   ;;  %vm746_vm0 = vmmov (!%p143_p2), 0   ;;  %v715_v7 = vld [vmem:[%s869_s1 + $0x50] sm:$0xff] (!%p143_p2)   ;;  %s604_s30 = sshll.u32 (!%p143_p2), %s773_s13, 1 }
   0x6   : > { %146 = sbr.rel (%p143_p2) target bundleno = 275 (0x113), region = 28  ;;  %678 = vmatprep.subr.bf16.mxu1 (!%p143_p2), %v745_v1  ;;  %v710_v2 = vld [vmem:[%s869_s1] sm:$0xff] (!%p143_p2)   ;;  %647 = vmatprep.subr.bf16.mxu0 (!%p143_p2), %v709_v0  ;;  %v713_v5 = vld [vmem:[%s869_s1 + $0x8] sm:$0xff] (!%p143_p2)   ;;  %v716_v8 = vld [vmem:[%s869_s1 + $0x10] sm:$0xff] (!%p143_p2)   ;;  %p172_p3 = scmp.lt.s32.totalorder (!%p143_p2), %s604_s30, 3  ;;  %vm509_vm1 = vcmask (!%p143_p2), 1040384  }
   0x7   : > { %v711_v3 = vld [vmem:[%s869_s1 + $0x80] sm:$0xff] (!%p143_p2)   ;;  %648 = vmatpush3.bf16.msra.mxu0 (!%p143_p2), %v710_v2  ;;  %694 = vmatprep.mubr.msk.bf16.mxu1 (!%p143_p2), %vm746_vm0, %v745_v1  ;;  %v714_v6 = vld [vmem:[%s869_s1 + $0x88] sm:$0xff] (!%p143_p2)   ;;  %v717_v9 = vld [vmem:[%s869_s1 + $0x90] sm:$0xff] (!%p143_p2)   ;;  %p184_p4 = scmp.lt.s32.totalorder (!%p143_p2), %s773_s13, 1 }
   0x8   : > { %679 = vmatpush3.bf16.msra.mxu1 (!%p143_p2), %v711_v3  ;;  %649 = vmatprep.subr.bf16.mxu0 (!%p143_p2), %v712_v4  ;;  %v718_v10 = vld [vmem:[%s869_s1 + $0x58] sm:$0xff] (!%p143_p2)   ;;  %v721_v13 = vld [vmem:[%s869_s1 + $0x60] sm:$0xff] (!%p143_p2)   ;;  %v724_v16 = vld [vmem:[%s869_s1 + $0x68] sm:$0xff] (!%p143_p2)  }
   0x9   : > { %680 = vmatprep.subr.bf16.mxu1 (!%p143_p2), %v745_v1  ;;  %v719_v11 = vld [vmem:[%s869_s1 + $0x18] sm:$0xff] (!%p143_p2)   ;;  %v722_v14 = vld [vmem:[%s869_s1 + $0x20] sm:$0xff] (!%p143_p2)   ;;  %v725_v17 = vld [vmem:[%s869_s1 + $0x28] sm:$0xff] (!%p143_p2)  }
   0xa   : > { %v720_v12 = vld [vmem:[%s869_s1 + $0x98] sm:$0xff] (!%p143_p2)   ;;  %v723_v15 = vld [vmem:[%s869_s1 + $0xa0] sm:$0xff] (!%p143_p2)   ;;  %v726_v18 = vld [vmem:[%s869_s1 + $0xa8] sm:$0xff] (!%p143_p2)  }
   0xb   : > { %650 = vmatpush3.bf16.msra.mxu0 (!%p143_p2), %v713_v5  ;;  %v727_v19 = vld [vmem:[%s869_s1 + $0x70] sm:$0xff] (!%p143_p2)   ;;  %v730_v22 = vld [vmem:[%s869_s1 + $0x78] sm:$0xff] (!%p143_p2)  }
   0xc   : > { %681 = vmatpush3.bf16.msra.mxu1 (!%p143_p2), %v714_v6  ;;  %651 = vmatprep.subr.bf16.mxu0 (!%p143_p2), %v715_v7  ;;  %v728_v20 = vld [vmem:[%s869_s1 + $0x30] sm:$0xff] (!%p143_p2)   ;;  %v731_v24 = vld [vmem:[%s869_s1 + $0x38] sm:$0xff] (!%p143_p2)  }
   0xd   : > { %682 = vmatprep.subr.bf16.mxu1 %v745_v1  ;;  %s873_s30 = smov (!%p172_p3, %s604_s30), 3  ;;  %v729_v21 = vld [vmem:[%s869_s1 + $0xb0] sm:$0xff]   ;;  %v732_v25 = vld [vmem:[%s869_s1 + $0xb8] sm:$0xff]   ;;  %s875_s13 = smov (!%p184_p4, %s773_s13), 1 }
   0xe   : > { %s698_s24 = smul.u32 12, %s873_s30  ;;  %s607_s18 = sshll.u32 %s873_s30, 2 }
   0xf   : > { %652 = vmatpush3.bf16.msra.mxu0 %v716_v8  ;;  %s182_s21 = scalar_lea.vmem %s870_s2, %s607_s18  ;;  %s608_s30 = sshll.u32 %s875_s13, 1 }
  0x10   : > { %683 = vmatpush3.bf16.msra.mxu1 %v717_v9  ;;  %653 = vmatprep.subr.bf16.mxu0 %v718_v10  ;;  %s176_s7 = scalar_lea.vmem %s868_s0, %s698_s24  ;;  %s187_s24 = scalar_lea.vmem %s871_s3, %s608_s30 }
  0x11   : > { %684 = vmatprep.subr.bf16.mxu1 %v745_v1  ;;  %v735_v23 = vld [vmem:[%s176_s7 + $0x4] ss:$12 sps:$4 sm:$0xff]   ;;  %v733_v26 = vld [vmem:[%s176_s7] ss:$12 sps:$4 sm:$0xff]   ;;  %v736_v27 = vld [vmem:[%s176_s7 + $0x8] ss:$12 sps:$4 sm:$0xff]  }
  0x12   : > { %433 = vmatprep.mubr.bf16.mxu0 %v735_v23 }
  0x13   : > { %654 = vmatpush3.bf16.msra.mxu0 %v719_v11 }
  0x14   : > { %685 = vmatpush3.bf16.msra.mxu1 %v720_v12  ;;  %655 = vmatprep.subr.bf16.mxu0 %v721_v13 }
  0x15   : > { %686 = vmatprep.subr.bf16.mxu1 %v745_v1 }
  0x17   : > { %656 = vmatpush3.bf16.msra.mxu0 %v722_v14 }
  0x18   : > { %687 = vmatpush3.bf16.msra.mxu1 %v723_v15  ;;  %657 = vmatprep.subr.bf16.mxu0 %v724_v16 }
  0x19   : > { %688 = vmatprep.subr.bf16.mxu1 %v745_v1 }
  0x1b   : > { %658 = vmatpush3.bf16.msra.mxu0 %v725_v17 }
  0x1c   : > { %689 = vmatpush3.bf16.msra.mxu1 %v726_v18  ;;  %659 = vmatprep.subr.bf16.mxu0 %v727_v19 }
  0x1d   : > { %690 = vmatprep.subr.bf16.mxu1 %v745_v1 }
  0x1f   : > { %660 = vmatpush3.bf16.msra.mxu0 %v728_v20 }
  0x20   : > { %691 = vmatpush3.bf16.msra.mxu1 %v729_v21  ;;  %661 = vmatprep.subr.bf16.mxu0 %v730_v22 }
  0x21   : > { %692 = vmatprep.subr.bf16.mxu1 %v745_v1 }
  0x23   : > { %662 = vmatpush3.bf16.msra.mxu0 %v731_v24 }
  0x24   : > { %693 = vmatpush3.bf16.msra.mxu1 %v732_v25 }
  0x26   : > { %434 = vmatmul.mubr.bf16.vlgmr.msra.gmra.mrb[0].mxu0 %v733_v26 }
  0x27   : > { %695 = vmatmul.mubr.bf16.vlgmr.msra.gmra.mrb[0].mxu1 %v736_v27 }
  0xf9   : > { %v663_v28 = vpop.f32.mrb[0].mxu0 }
  0xfa   : > { %v476_v29 = vpop.f32.mrb[0].mxu1  ;;  %v664_v30 = vpop.f32.mrb[1].mxu0 }
  0xfb   : > { %v665_v31 = vadd.f32 %v664_v30, %v663_v28  ;;  %v696_v32 = vpop.f32.mrb[1].mxu1  ;;  %v666_v33 = vpop.f32.mrb[2].mxu0 }
  0xfc   : > { %v479_v34 = vpop.f32.mrb[2].mxu1  ;;  %v667_v35 = vpop.f32.mrb[3].mxu0 }
  0xfd   : > { %v477_v36 = vadd.f32 %v665_v31, %v476_v29  ;;  %v668_v37 = vadd.f32 %v667_v35, %v666_v33  ;;  %v697_v38 = vpop.f32.mrb[3].mxu1 }
  0xff   : > { %v480_v39 = vadd.f32 %v668_v37, %v479_v34  ;;  %v500_v40 = vmul.f32 %v477_v36, %v477_v36 }
 0x101   : > { %v645_v41 = vpack.c.bf16 %v480_v39, %v477_v36  ;;  %v493_v42 = vadd.f32 %v480_v39, %v477_v36  ;;  %v501_v43 = vmul.f32 %v480_v39, %v480_v39 }
 0x103   : > { %646 = vst [vmem:[%s182_s21] sm:$0xff] %v645_v41   ;;  %v494_v44 = vrot.slane %v493_v42, 4  ;;  %v502_v45 = vadd.f32 %v501_v43, %v500_v40 }
 0x105   : > { %v495_v46 = vadd.f32 %v494_v44, %v493_v42  ;;  %v503_v47 = vrot.slane %v502_v45, 4 }
 0x107   : > { %v496_v48 = vrot.slane %v495_v46, 2  ;;  %v504_v49 = vadd.f32 %v503_v47, %v502_v45 }
 0x109   : > { %v497_v50 = vadd.f32 %v496_v48, %v495_v46  ;;  %v505_v51 = vrot.slane %v504_v49, 2 }
 0x10b   : > { %v498_v52 = vrot.slane %v497_v50, 1  ;;  %v506_v53 = vadd.f32 %v505_v51, %v504_v49 }
 0x10d   : > { %v507_v54 = vrot.slane %v506_v53, 1  ;;  %v499_v55 = vadd.f32 %v498_v52, %v497_v50 }
 0x10f   : > { %v508_v56 = vadd.f32 %v507_v54, %v506_v53 }
 0x111   : > { %v510_v57 = vsel %vm509_vm1, %v499_v55, %v508_v56 }
 0x112   : > { %511 = vst [vmem:[%s187_s24] sm:$0x3] %v510_v57 }
 0x113 PF: > { %s14_s12 = sadd.s32 1, %s743_s12  }
 0x114   : > { %p11_p5 = scmp.ge.s32.totalorder %s14_s12, 4  }
 0x116   :  { %13 = sbr.rel (!%p11_p5) target bundleno = 1 (0x1), region = 70 }

// kernel: resnet_filter_forward.19
= control target key start
LH: loop header
LB: loop body
LE: loop exit
PB: predicated region body
PF: predicated region fallthrough
CT: control target
= control target key end

     0   :  { %s140_s0 = inlined_call_operand.vmem [shape: bf16[32,128], index: 0, kind: input, shape index: {}]   ;;  %s141_s1 = inlined_call_operand.vmem [shape: f32[1,128], index: 1, kind: input, shape index: {}]   ;;  %s142_s2 = inlined_call_operand.vmem [shape: f32[1,128], index: 2, kind: input, shape index: {}]   ;;  %s143_s3 = inlined_call_operand.vmem [shape: bf16[32,128], index: 3, kind: output, shape index: {}]  }
   0x1   :  { %v83_v0 = vld [vmem:[%s140_s0] sm:$0xff]   ;;  %v100_v4 = vld [vmem:[%s140_s0 + $0x8] sm:$0xff]  }
   0x2   :  { %v72_v1 = vld [vmem:[%s141_s1] ss:$0 sm:$0xff]  ;;  %v84_v2 = vunpack.c.l.bf16 %v83_v0  ;;  %v85_v3 = vunpack.c.h.bf16 %v83_v0  ;;  %v88_v6 = vunpack.c.l.bf16 %v100_v4  ;;  %v89_v7 = vunpack.c.h.bf16 %v100_v4 }
   0x3   :  { %v73_v5 = vld [vmem:[%s142_s2] ss:$0 sm:$0xff] }
   0x4   :  { %v29_v8 = vmul.f32 %v84_v2, %v72_v1  ;;  %v30_v9 = vmul.f32 %v85_v3, %v72_v1  ;;  %v31_v10 = vmul.f32 %v88_v6, %v72_v1  ;;  %v32_v11 = vmul.f32 %v89_v7, %v72_v1 }
   0x6   :  { %v40_v12 = vadd.f32 %v73_v5, %v29_v8  ;;  %v41_v13 = vadd.f32 %v73_v5, %v30_v9  ;;  %v42_v14 = vadd.f32 %v73_v5, %v31_v10  ;;  %v43_v15 = vadd.f32 %v73_v5, %v32_v11 }
   0x8   :  { %v44_v16 = vmax.f32 %v40_v12, 0.0  ;;  %v45_v17 = vmax.f32 %v41_v13, 0.0  ;;  %v46_v18 = vmax.f32 %v42_v14, 0.0  ;;  %v47_v19 = vmax.f32 %v43_v15, 0.0 }
   0xa   :  { %v93_v20 = vpack.c.bf16 %v45_v17, %v44_v16  ;;  %v98_v21 = vpack.c.bf16 %v47_v19, %v46_v18 }
   0xc   :  { %94 = vst [vmem:[%s143_s3] sm:$0xff] %v93_v20   ;;  %101 = vst [vmem:[%s143_s3 + $0x8] sm:$0xff] %v98_v21  }

// kernel: resnet_filter_forward.23
= control target key start
LH: loop header
LB: loop body
LE: loop exit
PB: predicated region body
PF: predicated region fallthrough
CT: control target
= control target key end

     0   :  { %s171_s0 = inlined_call_operand.vmem [shape: bf16[32,128], index: 0, kind: input, shape index: {}]   ;;  %s172_s1 = inlined_call_operand.vmem [shape: f32[1,128], index: 1, kind: input, shape index: {}]   ;;  %s173_s2 = inlined_call_operand.vmem [shape: f32[1,128], index: 2, kind: input, shape index: {}]   ;;  %s174_s3 = inlined_call_operand.vmem [shape: bf16[32,128], index: 3, kind: input, shape index: {}]   ;;  %s175_s4 = inlined_call_operand.vmem [shape: bf16[32,128], index: 4, kind: output, shape index: {}]  }
   0x1   :  { %v94_v0 = vld [vmem:[%s171_s0] sm:$0xff]   ;;  %v119_v5 = vld [vmem:[%s171_s0 + $0x8] sm:$0xff]  }
   0x2   :  { %v83_v1 = vld [vmem:[%s172_s1] ss:$0 sm:$0xff]  ;;  %v95_v2 = vunpack.c.l.bf16 %v94_v0  ;;  %v96_v3 = vunpack.c.h.bf16 %v94_v0  ;;  %v120_v6 = vld [vmem:[%s174_s3 + $0x8] sm:$0xff]   ;;  %v99_v8 = vunpack.c.l.bf16 %v119_v5  ;;  %v100_v9 = vunpack.c.h.bf16 %v119_v5 }
   0x3   :  { %v102_v4 = vld [vmem:[%s174_s3] sm:$0xff]   ;;  %v107_v16 = vunpack.c.l.bf16 %v120_v6  ;;  %v108_v17 = vunpack.c.h.bf16 %v120_v6 }
   0x4   :  { %v84_v7 = vld [vmem:[%s173_s2] ss:$0 sm:$0xff]  ;;  %v32_v10 = vmul.f32 %v95_v2, %v83_v1  ;;  %v33_v11 = vmul.f32 %v96_v3, %v83_v1  ;;  %v103_v12 = vunpack.c.l.bf16 %v102_v4  ;;  %v104_v13 = vunpack.c.h.bf16 %v102_v4 }
   0x5   :  { %v34_v14 = vmul.f32 %v99_v8, %v83_v1  ;;  %v35_v15 = vmul.f32 %v100_v9, %v83_v1 }
   0x6   :  { %v43_v18 = vadd.f32 %v84_v7, %v32_v10  ;;  %v44_v19 = vadd.f32 %v84_v7, %v33_v11 }
   0x7   :  { %v45_v20 = vadd.f32 %v84_v7, %v34_v14  ;;  %v46_v21 = vadd.f32 %v84_v7, %v35_v15 }
   0x8   :  { %v55_v22 = vadd.f32 %v103_v12, %v43_v18  ;;  %v56_v23 = vadd.f32 %v104_v13, %v44_v19 }
   0x9   :  { %v57_v24 = vadd.f32 %v107_v16, %v45_v20  ;;  %v58_v25 = vadd.f32 %v108_v17, %v46_v21 }
   0xa   :  { %v112_v26 = vpack.c.bf16 %v56_v23, %v55_v22 }
   0xb   :  { %v117_v27 = vpack.c.bf16 %v58_v25, %v57_v24 }
   0xc   :  { %113 = vst [vmem:[%s175_s4] sm:$0xff] %v112_v26  }
   0xd   :  { %121 = vst [vmem:[%s175_s4 + $0x8] sm:$0xff] %v117_v27  }

// kernel: resnet_filter_forward.27
= control target key start
LH: loop header
LB: loop body
LE: loop exit
PB: predicated region body
PF: predicated region fallthrough
CT: control target
= control target key end

     0   :  { %s108_s0 = inlined_call_operand.vmem [shape: bf16[32,128], index: 0, kind: input, shape index: {}]   ;;  %s109_s1 = inlined_call_operand.vmem [shape: bf16[32,128], index: 1, kind: input, shape index: {}]   ;;  %s110_s2 = inlined_call_operand.vmem [shape: f32[32,128], index: 2, kind: output, shape index: {}]  }
   0x1   :  { %v44_v0 = vld [vmem:[%s108_s0] sm:$0xff]   ;;  %v59_v2 = vld [vmem:[%s108_s0 + $0x8] sm:$0xff]  }
   0x2   :  { %v52_v1 = vld [vmem:[%s109_s1] sm:$0xff]   ;;  %v45_v3 = vunpack.c.l.bf16 %v44_v0  ;;  %v46_v5 = vunpack.c.h.bf16 %v44_v0  ;;  %v60_v7 = vld [vmem:[%s109_s1 + $0x8] sm:$0xff]   ;;  %v49_v8 = vunpack.c.l.bf16 %v59_v2  ;;  %v50_v10 = vunpack.c.h.bf16 %v59_v2 }
   0x3   :  { %v53_v4 = vunpack.c.l.bf16 %v52_v1  ;;  %v54_v6 = vunpack.c.h.bf16 %v52_v1  ;;  %v57_v9 = vunpack.c.l.bf16 %v60_v7  ;;  %v58_v11 = vunpack.c.h.bf16 %v60_v7 }
   0x5   :  { %v27_v12 = vadd.f32 %v53_v4, %v45_v3  ;;  %v28_v13 = vadd.f32 %v54_v6, %v46_v5  ;;  %v29_v14 = vadd.f32 %v57_v9, %v49_v8  ;;  %v30_v15 = vadd.f32 %v58_v11, %v50_v10 }
   0x7   :  { %61 = vtanh.f32 %v27_v12 }
   0x8   :  { %63 = vtanh.f32 %v28_v13 }
   0x9   :  { %65 = vtanh.f32 %v29_v14 }
   0xa   :  { %67 = vtanh.f32 %v30_v15 }
  0x11   :  { %v62_v16 = vpop.eup %61 }
  0x12   :  { %v64_v17 = vpop.eup %63  ;;  %35 = vst [vmem:[%s110_s2] sm:$0xff] %v62_v16 }
  0x13   :  { %v66_v18 = vpop.eup %65  ;;  %36 = vst [vmem:[%s110_s2 + $0x8] sm:$0xff] %v64_v17 }
  0x14   :  { %v68_v19 = vpop.eup %67  ;;  %37 = vst [vmem:[%s110_s2 + $0x10] sm:$0xff] %v66_v18 }
  0x15   :  { %38 = vst [vmem:[%s110_s2 + $0x18] sm:$0xff] %v68_v19 }

// kernel: resnet_filter_forward.20
= control target key start
LH: loop header
LB: loop body
LE: loop exit
PB: predicated region body
PF: predicated region fallthrough
CT: control target
= control target key end

     0   :  { %s2251_s12 = smov 0   ;;  %s2253_s13 = smov 0   ;;  %s2618_s0 = inlined_call_operand.vmem [shape: bf16[2,6,6,128], index: 0, kind: input, shape index: {}]   ;;  %s2619_s1 = inlined_call_operand.vmem [shape: bf16[1152,128], index: 1, kind: input, shape index: {}]   ;;  %s2620_s2 = inlined_call_operand.vmem [shape: bf16[2,1,16,128], index: 2, kind: output, shape index: {0}]   ;;  %s2621_s3 = inlined_call_operand.vmem [shape: f32[2,1,2,128], index: 3, kind: output, shape index: {1}]  }
   0x1   :  { %s2255_s14 = smov 0  }
   0x2 LB: > { %s26_s15 = sadd.s32 1, %s2222_s13  ;;  %p1826_p0 = scmp.ge.s32.totalorder %s2226_s14, 1  ;;  %s2226_s14 = sphi %s2255_s14, %s14_s14   ;;  %s2222_s13 = sphi %s2253_s13, %s2627_s13   ;;  %s2218_s12 = sphi %s2251_s12, %s2626_s12  }
   0x3   : > { %p28_p1 = scmp.ge.s32.totalorder %s26_s15, 2  ;;  %p156_p2 = scmp.lt.s32.totalorder %s2226_s14, 3 }
   0x5   : > { %s2629_s15 = smov (%p28_p1, %s26_s15), 0  ;;  %p157_p3 = pnand %p1826_p0, %p156_p2 }
   0x6   : > { %v2120_v0 = vld [vmem:[%s2619_s1 + $0x40] sm:$0xff] (!%p157_p3)   ;;  %v2124_v4 = vld [vmem:[%s2619_s1 + $0x48] sm:$0xff] (!%p157_p3)   ;;  %v2128_v8 = vld [vmem:[%s2619_s1 + $0x50] sm:$0xff] (!%p157_p3)   ;;  %p191_p4 = scmp.lt.s32.totalorder (!%p157_p3), %s2218_s12, 1  ;;  %v713_v28 = vlaneseq (!%p157_p3)  ;;  %vm260_vm0 = vsmask.f32 (!%p157_p3), 1280 }
   0x7   : > { %160 = sbr.rel (%p157_p3) target bundleno = 344 (0x158), region = 28  ;;  %v2121_v1 = vld [vmem:[%s2619_s1 + $0xc0] sm:$0xff] (!%p157_p3)   ;;  %1975 = vmatprep.subr.bf16.mxu0 (!%p157_p3), %v2120_v0  ;;  %v2125_v5 = vld [vmem:[%s2619_s1 + $0xc8] sm:$0xff] (!%p157_p3)   ;;  %v2129_v9 = vld [vmem:[%s2619_s1 + $0xd0] sm:$0xff] (!%p157_p3)   ;;  %vm363_vm1 = vcmask (!%p157_p3), 1040384   ;;  %vm364_vm2 = vcmask (!%p157_p3), 1042434  }
   0x8   : > { %v2122_v2 = vld [vmem:[%s2619_s1] sm:$0xff] (!%p157_p3)   ;;  %1997 = vmatprep.subr.bf16.mxu1 (!%p157_p3), %v2121_v1  ;;  %v2126_v6 = vld [vmem:[%s2619_s1 + $0x8] sm:$0xff] (!%p157_p3)   ;;  %v2130_v10 = vld [vmem:[%s2619_s1 + $0x10] sm:$0xff] (!%p157_p3)   ;;  %v2377_v33 = vshrl.u32 (!%p157_p3), %v713_v28, 7  ;;  %vm261_vm3 = vsmask.f32 (!%p157_p3), 3336 }
   0x9   : > { %v2123_v3 = vld [vmem:[%s2619_s1 + $0x80] sm:$0xff] (!%p157_p3)   ;;  %1976 = vmatpush3.bf16.msra.mxu0 (!%p157_p3), %v2122_v2  ;;  %v2127_v7 = vld [vmem:[%s2619_s1 + $0x88] sm:$0xff] (!%p157_p3)   ;;  %v2131_v11 = vld [vmem:[%s2619_s1 + $0x90] sm:$0xff] (!%p157_p3)   ;;  %vm263_vm4 = vsmask.f32 (!%p157_p3), 5392  ;;  %vm366_vm7 = vcmask (!%p157_p3), 1044484  }
   0xa   : > { %1998 = vmatpush3.bf16.msra.mxu1 (!%p157_p3), %v2123_v3  ;;  %1977 = vmatprep.subr.bf16.mxu0 (!%p157_p3), %v2124_v4  ;;  %v2132_v12 = vld [vmem:[%s2619_s1 + $0x58] sm:$0xff] (!%p157_p3)   ;;  %v2136_v16 = vld [vmem:[%s2619_s1 + $0x60] sm:$0xff] (!%p157_p3)   ;;  %v2140_v20 = vld [vmem:[%s2619_s1 + $0x68] sm:$0xff] (!%p157_p3)   ;;  %vm265_vm6 = vsmask.f32 (!%p157_p3), 7448  ;;  %vm368_vm10 = vcmask (!%p157_p3), 1046534  }
   0xb   : > { %1999 = vmatprep.subr.bf16.mxu1 (!%p157_p3), %v2125_v5  ;;  %v2133_v13 = vld [vmem:[%s2619_s1 + $0xd8] sm:$0xff] (!%p157_p3)   ;;  %v2137_v17 = vld [vmem:[%s2619_s1 + $0xe0] sm:$0xff] (!%p157_p3)   ;;  %v2141_v21 = vld [vmem:[%s2619_s1 + $0xe8] sm:$0xff] (!%p157_p3)   ;;  %vm2230_vm14 = vmmov (!%p157_p3), 0  }
   0xc   : > { %v2134_v14 = vld [vmem:[%s2619_s1 + $0x18] sm:$0xff] (!%p157_p3)   ;;  %v2138_v18 = vld [vmem:[%s2619_s1 + $0x20] sm:$0xff] (!%p157_p3)   ;;  %v2142_v22 = vld [vmem:[%s2619_s1 + $0x28] sm:$0xff] (!%p157_p3)  }
   0xd   : > { %1978 = vmatpush3.bf16.msra.mxu0 (!%p157_p3), %v2126_v6  ;;  %v2135_v15 = vld [vmem:[%s2619_s1 + $0x98] sm:$0xff] (!%p157_p3)   ;;  %v2139_v19 = vld [vmem:[%s2619_s1 + $0xa0] sm:$0xff] (!%p157_p3)   ;;  %v2143_v23 = vld [vmem:[%s2619_s1 + $0xa8] sm:$0xff] (!%p157_p3)  }
   0xe   : > { %2000 = vmatpush3.bf16.msra.mxu1 %v2127_v7  ;;  %1979 = vmatprep.subr.bf16.mxu0 %v2128_v8  ;;  %s2631_s12 = smov (!%p191_p4, %s2218_s12), 1  ;;  %v2144_v24 = vld [vmem:[%s2619_s1 + $0x70] sm:$0xff]   ;;  %v2148_v29 = vld [vmem:[%s2619_s1 + $0x78] sm:$0xff]   ;;  %vm262_vm5 = vmor %vm260_vm0, %vm261_vm3 }
   0xf   : > { %2001 = vmatprep.subr.bf16.mxu1 %v2129_v9  ;;  %v2145_v25 = vld [vmem:[%s2619_s1 + $0xf0] sm:$0xff]   ;;  %s2092_s22 = smul.u32 24, %s2631_s12  ;;  %v2149_v30 = vld [vmem:[%s2619_s1 + $0xf8] sm:$0xff]   ;;  %v2156_v45 = vld [vmem:[%s2619_s1 + $0x140] sm:$0xff]   ;;  %v2228_v9 = vmov 1983009808  }
  0x10   : > { %v2146_v26 = vld [vmem:[%s2619_s1 + $0x30] sm:$0xff]   ;;  %v2150_v31 = vld [vmem:[%s2619_s1 + $0x38] sm:$0xff]   ;;  %vm264_vm8 = vmor %vm262_vm5, %vm263_vm4  ;;  %s1967_s28 = sshll.u32 %s2631_s12, 3  ;;  %s1830_s5 = sshll.u32 %s2631_s12, 1 }
  0x11   : > { %1980 = vmatpush3.bf16.msra.mxu0 %v2130_v10  ;;  %v2147_v27 = vld [vmem:[%s2619_s1 + $0xb0] sm:$0xff]   ;;  %s2369_s6 = scalar_lea.vmem %s2618_s0, %s2092_s22  ;;  %v2151_v32 = vld [vmem:[%s2619_s1 + $0xb8] sm:$0xff]   ;;  %vm2388_vm9 = vmor %vm264_vm8, %vm265_vm6  ;;  %v711_v10 = vunpack.c.l.s4 %v2228_v9  ;;  %s204_s4 = scalar_lea.vmem %s2620_s2, %s1967_s28 }
  0x12   : > { %2002 = vmatpush3.bf16.msra.mxu1 %v2131_v11  ;;  %1981 = vmatprep.subr.bf16.mxu0 %v2132_v12  ;;  %v1831_v34 = vld.sshfl [vmem:[%s2369_s6] sm:$0x13 pattern:$0x76325410]  ;;  %vm365_vm11 = vmor %vm363_vm1, %vm364_vm2  ;;  %v2171_v9 = vld [vmem:[%s2619_s1 + $0x198] sm:$0xff]   ;;  %s211_s9 = scalar_lea.vmem %s2621_s3, %s1830_s5 }
  0x13   : > { %2003 = vmatprep.subr.bf16.mxu1 %v2133_v13  ;;  %v1832_v35 = vld.sshfl [vmem:[%s2369_s6 + $0x4] sm:$0x13 pattern:$0x76325410]  ;;  %v235_v36 = vcombine.high %v1831_v34, %v1831_v34  ;;  %v268_v42 = vshrl.u32 %v1831_v34, 16  ;;  %v271_v43 = vshll.u32 %v1831_v34, 16  ;;  %vm367_vm12 = vmor %vm365_vm11, %vm366_vm7 }
  0x14   : > { %v1833_v37 = vld.sshfl [vmem:[%s2369_s6 + $0x8] sm:$0x13 pattern:$0x76325410]  ;;  %v243_v38 = vcombine.high %v1832_v35, %v1832_v35  ;;  %v282_v46 = vshrl.u32 %v1832_v35, 16  ;;  %v285_v47 = vshll.u32 %v1832_v35, 16  ;;  %vm2426_vm13 = vmor %vm367_vm12, %vm368_vm10 }
  0x15   : > { %1982 = vmatpush3.bf16.msra.mxu0 %v2134_v14  ;;  %v1834_v39 = vld.sshfl [vmem:[%s2369_s6 + $0xc] sm:$0x13 pattern:$0x76325410]  ;;  %v251_v40 = vcombine.high %v1833_v37, %v1833_v37  ;;  %v277_v44 = vshll.u32 %v235_v36, 16  ;;  %v296_v49 = vshrl.u32 %v1833_v37, 16 }
  0x16   : > { %2004 = vmatpush3.bf16.msra.mxu1 %v2135_v15  ;;  %1983 = vmatprep.subr.bf16.mxu0 %v2136_v16  ;;  %v259_v41 = vcombine.high %v1834_v39, %v1834_v39  ;;  %v291_v48 = vshll.u32 %v243_v38, 16  ;;  %v270_v50 = vrot.slane %v268_v42, 6  ;;  %v273_v51 = vrot.slane %v271_v43, 7  ;;  %v2158_v5 = vld [vmem:[%s2619_s1 + $0x1c0] sm:$0xff]   ;;  %v2191_v62 = vld [vmem:[%s2619_s1 + $0x208] sm:$0xff]   ;;  %v2193_v36 = vld [vmem:[%s2619_s1 + $0x218] sm:$0xff]  }
  0x17   : > { %2005 = vmatprep.subr.bf16.mxu1 %v2137_v17  ;;  %v279_v52 = vrot.slane %v277_v44, 7  ;;  %v299_v53 = vshll.u32 %v1833_v37, 16  ;;  %v284_v54 = vrot.slane %v282_v46, 6  ;;  %v287_v55 = vrot.slane %v285_v47, 7 }
  0x18   : > { %v293_v56 = vrot.slane %v291_v48, 7  ;;  %v298_v57 = vrot.slane %v296_v49, 6  ;;  %v274_v58 = vor.u32 %v273_v51, %v270_v50  ;;  %v305_v60 = vshll.u32 %v251_v40, 16 }
  0x19   : > { %1984 = vmatpush3.bf16.msra.mxu0 %v2138_v18  ;;  %v301_v59 = vrot.slane %v299_v53, 7  ;;  %v310_v61 = vshrl.u32 %v1834_v39, 16  ;;  %v288_v63 = vor.u32 %v287_v55, %v284_v54  ;;  %v313_v0 = vshll.u32 %v1834_v39, 16  ;;  %v2157_v53 = vld [vmem:[%s2619_s1 + $0x100] sm:$0xff]   ;;  %v2160_v55 = vld [vmem:[%s2619_s1 + $0x148] sm:$0xff]  }
  0x1a   : > { %2006 = vmatpush3.bf16.msra.mxu1 %v2139_v19  ;;  %1985 = vmatprep.subr.bf16.mxu0 %v2140_v20  ;;  %v319_v1 = vshll.u32 %v259_v41, 16  ;;  %v275_v2 = vrot.slane %v274_v58, 2  ;;  %v307_v7 = vrot.slane %v305_v60, 7  ;;  %v712_v18 = vunpack.c.0.s8 %v711_v10  ;;  %v2159_v58 = vld [vmem:[%s2619_s1 + $0x180] sm:$0xff]   ;;  %v2161_v60 = vld [vmem:[%s2619_s1 + $0x108] sm:$0xff]  }
  0x1b   : > { %2007 = vmatprep.subr.bf16.mxu1 %v2141_v21  ;;  %v302_v3 = vor.u32 %v301_v59, %v298_v57  ;;  %v312_v4 = vrot.slane %v310_v61, 6  ;;  %v289_v6 = vrot.slane %v288_v63, 2  ;;  %v315_v8 = vrot.slane %v313_v0, 7  ;;  %v2164_v61 = vld [vmem:[%s2619_s1 + $0x150] sm:$0xff]   ;;  %v2162_v0 = vld [vmem:[%s2619_s1 + $0x1c8] sm:$0xff]   ;;  %v2173_v10 = vld [vmem:[%s2619_s1 + $0x120] sm:$0xff]  }
  0x1c   : > { %v2198_v11 = vld.sshfl [vmem:[%s2369_s6 + $0x4] sm:$0xf pattern:$0x76325410]  ;;  %v280_v13 = vsel %vm2388_vm9, %v275_v2, %v279_v52  ;;  %v321_v15 = vrot.slane %v319_v1, 7  ;;  %v2165_v2 = vld [vmem:[%s2619_s1 + $0x110] sm:$0xff]  }
  0x1d   : > { %1986 = vmatpush3.bf16.msra.mxu0 %v2142_v22  ;;  %v2199_v12 = vld.sshfl [vmem:[%s2369_s6 + $0xc] sm:$0xf pattern:$0x76325410]  ;;  %v303_v14 = vrot.slane %v302_v3, 2  ;;  %v2403_v16 = vsel %vm2388_vm9, %v289_v6, %v293_v56  ;;  %v316_v17 = vor.u32 %v315_v8, %v312_v4  ;;  %v2168_v3 = vld [vmem:[%s2619_s1 + $0x158] sm:$0xff]  }
  0x1e   : > { %2008 = vmatpush3.bf16.msra.mxu1 %v2143_v23  ;;  %1987 = vmatprep.subr.bf16.mxu0 %v2144_v24  ;;  %v2200_v19 = vld.sshfl [vmem:[%s2369_s6] sm:$0xf pattern:$0x76325410]  ;;  %v726_v21 = vcombine.low %v280_v13, %v2403_v16  ;;  %v782_v38 = vcombine.low %v2198_v11, %v2199_v12  ;;  %v2163_v1 = vld [vmem:[%s2619_s1 + $0x188] sm:$0xff]   ;;  %v2166_v4 = vld [vmem:[%s2619_s1 + $0x1d0] sm:$0xff]  }
  0x1f   : > { %2009 = vmatprep.subr.bf16.mxu1 %v2145_v25  ;;  %v2201_v20 = vld.sshfl [vmem:[%s2369_s6 + $0x8] sm:$0xf pattern:$0x76325410]  ;;  %v2412_v23 = vsel %vm2388_vm9, %v303_v14, %v307_v7  ;;  %v317_v24 = vrot.slane %v316_v17, 2  ;;  %v2415_v25 = vsub.s32 %v712_v18, %v2377_v33  ;;  %v2169_v6 = vld [vmem:[%s2619_s1 + $0x118] sm:$0xff]  }
  0x20   : > { %v1835_v22 = vld.sshfl [vmem:[%s2369_s6] sm:$0x12 pattern:$0x76325410]  ;;  %v724_v43 = vcombine.low %v2200_v19, %v2201_v20  ;;  %1527 = vmatprep.mubr.bf16.mxu1 %v782_v38  ;;  %v2170_v8 = vld [vmem:[%s2619_s1 + $0x1d8] sm:$0xff]   ;;  %v2176_v11 = vld [vmem:[%s2619_s1 + $0x168] sm:$0xff]  }
  0x21   : > { %1988 = vmatpush3.bf16.msra.mxu0 %v2146_v26  ;;  %v1836_v26 = vld.sshfl [vmem:[%s2369_s6 + $0x4] sm:$0x12 pattern:$0x76325410]  ;;  %v734_v34 = vrot.slane %v726_v21, %v2415_v25  ;;  %v2177_v14 = vld [vmem:[%s2619_s1 + $0x128] sm:$0xff]   ;;  %v2181_v19 = vld [vmem:[%s2619_s1 + $0x130] sm:$0xff]  }
  0x22   : > { %2010 = vmatpush3.bf16.msra.mxu1 %v2147_v27  ;;  %1989 = vmatprep.subr.bf16.mxu0 %v2148_v29  ;;  %v338_v27 = vcombine.high %v1835_v22, %v1835_v22  ;;  %v1837_v28 = vld.sshfl [vmem:[%s2369_s6 + $0x8] sm:$0x12 pattern:$0x76325410]  ;;  %v346_v29 = vcombine.high %v1836_v26, %v1836_v26  ;;  %v2172_v7 = vld [vmem:[%s2619_s1 + $0x160] sm:$0xff]   ;;  %v2184_v20 = vld [vmem:[%s2619_s1 + $0x178] sm:$0xff]  }
  0x23   : > { %2011 = vmatprep.subr.bf16.mxu1 %v2149_v30  ;;  %v1839_v30 = vrot.slane %v1835_v22, 9  ;;  %v1838_v35 = vld.sshfl [vmem:[%s2369_s6 + $0xc] sm:$0x12 pattern:$0x76325410]  ;;  %v354_v37 = vcombine.high %v1837_v28, %v1837_v28  ;;  %v1841_v44 = vrot.slane %v1837_v28, 9 }
  0x24   : > { %v362_v39 = vcombine.high %v1838_v35, %v1838_v35  ;;  %v372_v40 = vrot.slane %v338_v27, 7  ;;  %v376_v41 = vrot.slane %v346_v29, 7  ;;  %v1842_v48 = vrot.slane %v1838_v35, 9  ;;  %v2174_v12 = vld [vmem:[%s2619_s1 + $0x1e0] sm:$0xff]   ;;  %v2178_v17 = vld [vmem:[%s2619_s1 + $0x1e8] sm:$0xff]   ;;  %v2183_v28 = vld [vmem:[%s2619_s1 + $0x1b0] sm:$0xff]  }
  0x25   : > { %1990 = vmatpush3.bf16.msra.mxu0 %v2150_v31  ;;  %v1840_v31 = vrot.slane %v1836_v26, 9  ;;  %v2175_v13 = vld [vmem:[%s2619_s1 + $0x1a0] sm:$0xff]   ;;  %v2179_v18 = vld [vmem:[%s2619_s1 + $0x1a8] sm:$0xff]  }
  0x26   : > { %2012 = vmatpush3.bf16.msra.mxu1 %v2151_v32  ;;  %2019 = vmatprep.subr.bf16.mxu0 %v2156_v45  ;;  %v2421_v32 = vsel %vm2388_vm9, %v317_v24, %v321_v15  ;;  %v380_v45 = vrot.slane %v354_v37, 7  ;;  %v373_v46 = vsel %vm2426_vm13, %v1839_v30, %v372_v40  ;;  %v384_v49 = vrot.slane %v362_v39, 7  ;;  %v2180_v15 = vld [vmem:[%s2619_s1 + $0x170] sm:$0xff]   ;;  %v2185_v30 = vld [vmem:[%s2619_s1 + $0x138] sm:$0xff]  }
  0x27   : > { %2041 = vmatprep.subr.bf16.mxu1 %v2158_v5  ;;  %v727_v33 = vcombine.low %v2412_v23, %v2421_v32  ;;  %v2439_v47 = vsel %vm2426_vm13, %v1840_v31, %v376_v41  ;;  %v2167_v5 = vld [vmem:[%s2619_s1 + $0x190] sm:$0xff]   ;;  %v2186_v39 = vld [vmem:[%s2619_s1 + $0x1f8] sm:$0xff]  }
  0x28   : > { %v2444_v51 = vsel %vm2426_vm13, %v1841_v44, %v380_v45  ;;  %v744_v52 = vcombine.low %v373_v46, %v2439_v47  ;;  %v2452_v54 = vsel %vm2426_vm13, %v1842_v48, %v384_v49  ;;  %v1862_v21 = vld.sshfl [vmem:[%s2369_s6 + $0x10] sm:$0x12 pattern:$0x76325410] }
  0x29   : > { %v2433_v42 = vrot.slane %v727_v33, %v2415_v25  ;;  %v745_v56 = vcombine.low %v2444_v51, %v2452_v54  ;;  %v802_v22 = vcombine.low %v2439_v47, %v2444_v51  ;;  %v2182_v24 = vld [vmem:[%s2619_s1 + $0x1f0] sm:$0xff]   ;;  %v528_v26 = vcombine.high %v1862_v21, %v1862_v21 }
  0x2a   : > { %v752_v57 = vrot.slane %v744_v52, %v2415_v25  ;;  %v1866_v27 = vrot.slane %v1862_v21, 9  ;;  %v1854_v29 = vld.sshfl [vmem:[%s2369_s6 + $0x10] sm:$0x13 pattern:$0x76325410]  ;;  %v784_v51 = vcombine.low %v2403_v16, %v2412_v23  ;;  %v2197_v21 = vld [vmem:[%s2619_s1 + $0x238] sm:$0xff]  }
  0x2b   : > { %v742_v50 = vcombine.low %v734_v34, %v2433_v42  ;;  %v2464_v59 = vrot.slane %v745_v56, %v2415_v25  ;;  %v543_v31 = vrot.slane %v528_v26, 7  ;;  %v432_v34 = vcombine.high %v1854_v29, %v1854_v29  ;;  %v1878_v38 = vld.sshfl [vmem:[%s2369_s6 + $0x14] sm:$0x13 pattern:$0x76325410] }
  0x2c   : > { %v476_v35 = vshrl.u32 %v1854_v29, 16  ;;  %v479_v33 = vshll.u32 %v1854_v29, 16  ;;  %v810_v37 = vrot.slane %v802_v22, %v2415_v25  ;;  %v591_v46 = vcombine.high %v1878_v38, %v1878_v38 }
  0x2d   : > { %1486 = vmatprep.mubr.bf16.mxu0 %v742_v50  ;;  %v760_v63 = vcombine.low %v752_v57, %v2464_v59  ;;  %v544_v40 = vsel %vm2426_vm13, %v1866_v27, %v543_v31  ;;  %v485_v44 = vshll.u32 %v432_v34, 16  ;;  %v635_v47 = vshrl.u32 %v1878_v38, 16 }
  0x2e   : > { %1487 = vmatmul.mubr.bf16.vlgmr.msra.gmra.mrb[0].mxu0 %v724_v43  ;;  %v478_v41 = vrot.slane %v476_v35, 6  ;;  %v481_v43 = vrot.slane %v479_v33, 7  ;;  %v803_v45 = vcombine.low %v2452_v54, %v544_v40  ;;  %v638_v48 = vshll.u32 %v1878_v38, 16 }
  0x2f   : > { %2020 = vmatpush3.bf16.msra.mxu0 %v2157_v53  ;;  %1528 = vmatmul.mubr.bf16.vlgmr.msra.gmra.mrb[0].mxu1 %v760_v63  ;;  %v487_v50 = vrot.slane %v485_v44, 7  ;;  %v2187_v53 = vld [vmem:[%s2619_s1 + $0x1b8] sm:$0xff]   ;;  %v637_v54 = vrot.slane %v635_v47, 6  ;;  %v644_v57 = vshll.u32 %v591_v46, 16 }
  0x30   : > { %2021 = vmatprep.subr.bf16.mxu0 %v2160_v55  ;;  %2042 = vmatpush3.bf16.msra.mxu1 %v2159_v58  ;;  %v482_v49 = vor.u32 %v481_v43, %v478_v41  ;;  %v817_v52 = vrot.slane %v803_v45, %v2415_v25  ;;  %v2229_v55 = vmov 0.0   ;;  %v640_v56 = vrot.slane %v638_v48, 7  ;;  %v2202_v58 = vld.sshfl [vmem:[%s2369_s6 + $0x8] sm:$0xf pattern:$0x76325410] }
  0x31   : > { %2043 = vmatprep.subr.bf16.mxu1 %v2162_v0  ;;  %v646_v16 = vrot.slane %v644_v57, 7 }
  0x32   : > { %v818_v63 = vcombine.low %v810_v37, %v817_v52  ;;  %v641_v0 = vor.u32 %v640_v56, %v637_v54 }
  0x33   : > { %2022 = vmatpush3.bf16.msra.mxu0 %v2161_v60  ;;  %v2203_v60 = vld.sshfl [vmem:[%s2369_s6 + $0x10] sm:$0xf pattern:$0x76325410] }
  0x34   : > { %2023 = vmatprep.subr.bf16.mxu0 %v2164_v61  ;;  %2044 = vmatpush3.bf16.msra.mxu1 %v2163_v1  ;;  %v483_v61 = vrot.slane %v482_v49, 2 }
  0x35   : > { %2045 = vmatprep.subr.bf16.mxu1 %v2166_v4  ;;  %1568 = vmatprep.mubr.bf16.mxu0 %v818_v63 }
  0x36   : > { %v488_v23 = vsel %vm2388_vm9, %v483_v61, %v487_v50 }
  0x37   : > { %2024 = vmatpush3.bf16.msra.mxu0 %v2165_v2  ;;  %v785_v1 = vcombine.low %v2421_v32, %v488_v23  ;;  %v792_v2 = vrot.slane %v784_v51, %v2415_v25 }
  0x38   : > { %2025 = vmatprep.subr.bf16.mxu0 %v2168_v3  ;;  %2046 = vmatpush3.bf16.msra.mxu1 %v2167_v5  ;;  %v642_v3 = vrot.slane %v641_v0, 2 }
  0x39   : > { %2047 = vmatprep.subr.bf16.mxu1 %v2170_v8  ;;  %v799_v4 = vrot.slane %v785_v1, %v2415_v25  ;;  %v2188_v8 = vld [vmem:[%s2619_s1 + $0x200] sm:$0xff]  }
  0x3a   : > { %v647_v5 = vsel %vm2388_vm9, %v642_v3, %v646_v16 }
  0x3b   : > { %2026 = vmatpush3.bf16.msra.mxu0 %v2169_v6  ;;  %v1886_v6 = vld.sshfl [vmem:[%s2369_s6 + $0x14] sm:$0x12 pattern:$0x76325410] }
  0x3c   : > { %2027 = vmatprep.subr.bf16.mxu0 %v2172_v7  ;;  %2048 = vmatpush3.bf16.msra.mxu1 %v2171_v9  ;;  %v843_v7 = vcombine.low %v488_v23, %v647_v5  ;;  %v687_v9 = vcombine.high %v1886_v6, %v1886_v6 }
  0x3d   : > { %2049 = vmatprep.subr.bf16.mxu1 %v2174_v12 }
  0x3e   : > { %v857_v12 = vrot.slane %v843_v7, %v2415_v25  ;;  %v702_v32 = vrot.slane %v687_v9, 7 }
  0x3f   : > { %2028 = vmatpush3.bf16.msra.mxu0 %v2173_v10  ;;  %v1890_v10 = vrot.slane %v1886_v6, 9 }
  0x40   : > { %2029 = vmatprep.subr.bf16.mxu0 %v2176_v11  ;;  %2050 = vmatpush3.bf16.msra.mxu1 %v2175_v13  ;;  %v800_v11 = vcombine.low %v792_v2, %v799_v4  ;;  %v840_v13 = vcombine.low %v2202_v58, %v2203_v60 }
  0x41   : > { %2051 = vmatprep.subr.bf16.mxu1 %v2178_v17 }
  0x43   : > { %2030 = vmatpush3.bf16.msra.mxu0 %v2177_v14  ;;  %v858_v14 = vcombine.low %v2433_v42, %v857_v12  ;;  %v2192_v42 = vld [vmem:[%s2619_s1 + $0x210] sm:$0xff]  }
  0x44   : > { %2031 = vmatprep.subr.bf16.mxu0 %v2180_v15  ;;  %2052 = vmatpush3.bf16.msra.mxu1 %v2179_v18  ;;  %v703_v15 = vsel %vm2426_vm13, %v1890_v10, %v702_v32 }
  0x45   : > { %2053 = vmatprep.subr.bf16.mxu1 %v2182_v24  ;;  %v861_v17 = vcombine.low %v544_v40, %v703_v15  ;;  %1609 = vmatprep.mubr.bf16.mxu1 %v858_v14 }
  0x47   : > { %2032 = vmatpush3.bf16.msra.mxu0 %v2181_v19  ;;  %v875_v18 = vrot.slane %v861_v17, %v2415_v25  ;;  %v2195_v25 = vld [vmem:[%s2619_s1 + $0x228] sm:$0xff]  }
  0x48   : > { %2033 = vmatprep.subr.bf16.mxu0 %v2184_v20  ;;  %2054 = vmatpush3.bf16.msra.mxu1 %v2183_v28  ;;  %v2194_v20 = vld [vmem:[%s2619_s1 + $0x220] sm:$0xff]  }
  0x49   : > { %2055 = vmatprep.subr.bf16.mxu1 %v2186_v39  ;;  %v876_v19 = vcombine.low %v2464_v59, %v875_v18  ;;  %v2196_v59 = vld [vmem:[%s2619_s1 + $0x230] sm:$0xff]  }
  0x4b   : > { %2034 = vmatpush3.bf16.msra.mxu0 %v2185_v30 }
  0x4c   : > { %2072 = vmatprep.subr.bf16.mxu0 %v2229_v55  ;;  %2056 = vmatpush3.bf16.msra.mxu1 %v2187_v53 }
  0x4e   : > { %1569 = vmatmul.mubr.bf16.vlgmr.msra.gmra.mrb[4].mxu0 %v800_v11 }
  0x4f   : > { %2073 = vmatpush3.bf16.msra.mxu0 %v2188_v8  ;;  %2088 = vmatprep.mubr.msk.bf16.mxu0 %vm2230_vm14, %v2229_v55 }
  0x50   : > { %2074 = vmatprep.subr.bf16.mxu0 %v2229_v55  ;;  %1610 = vmatmul.mubr.bf16.vlgmr.msra.gmra.mrb[4].mxu1 %v840_v13 }
  0x53   : > { %2075 = vmatpush3.bf16.msra.mxu0 %v2191_v62 }
  0x54   : > { %2076 = vmatprep.subr.bf16.mxu0 %v2229_v55 }
  0x57   : > { %2077 = vmatpush3.bf16.msra.mxu0 %v2192_v42 }
  0x58   : > { %2078 = vmatprep.subr.bf16.mxu0 %v2229_v55 }
  0x5b   : > { %2079 = vmatpush3.bf16.msra.mxu0 %v2193_v36 }
  0x5c   : > { %2080 = vmatprep.subr.bf16.mxu0 %v2229_v55 }
  0x5f   : > { %2081 = vmatpush3.bf16.msra.mxu0 %v2194_v20 }
  0x60   : > { %2082 = vmatprep.subr.bf16.mxu0 %v2229_v55 }
  0x63   : > { %2083 = vmatpush3.bf16.msra.mxu0 %v2195_v25 }
  0x64   : > { %2084 = vmatprep.subr.bf16.mxu0 %v2229_v55 }
  0x67   : > { %2085 = vmatpush3.bf16.msra.mxu0 %v2196_v59 }
  0x68   : > { %2086 = vmatprep.subr.bf16.mxu0 %v2229_v55 }
  0x6b   : > { %2087 = vmatpush3.bf16.msra.mxu0 %v2197_v21 }
  0x6e   : > { %2089 = vmatmul.mubr.bf16.vlgmr.msra.gmra.mrb[8].mxu0 %v876_v19 }
 0x101   : > { %v1991_v22 = vpop.f32.mrb[0].mxu0 }
 0x102   : > { %v1992_v24 = vpop.f32.mrb[1].mxu0  ;;  %v2013_v30 = vpop.f32.mrb[0].mxu1 }
 0x103   : > { %v1993_v26 = vadd.f32 %v1992_v24, %v1991_v22  ;;  %v1994_v27 = vpop.f32.mrb[2].mxu0  ;;  %v2014_v31 = vpop.f32.mrb[1].mxu1 }
 0x104   : > { %v1995_v28 = vpop.f32.mrb[3].mxu0  ;;  %v2015_v34 = vadd.f32 %v2014_v31, %v2013_v30  ;;  %v2016_v35 = vpop.f32.mrb[2].mxu1 }
 0x105   : > { %v1996_v29 = vadd.f32 %v1995_v28, %v1994_v27  ;;  %v2017_v33 = vpop.f32.mrb[3].mxu1 }
 0x106   : > { %v1530_v37 = vadd.f32 %v2015_v34, %v1993_v26  ;;  %v2018_v38 = vadd.f32 %v2017_v33, %v2016_v35 }
 0x108   : > { %v1533_v39 = vadd.f32 %v2018_v38, %v1996_v29 }
 0x121   : > { %v2035_v40 = vpop.f32.mrb[4].mxu0 }
 0x122   : > { %v2036_v41 = vpop.f32.mrb[5].mxu0 }
 0x123   : > { %v2037_v43 = vadd.f32 %v2036_v41, %v2035_v40  ;;  %v2038_v44 = vpop.f32.mrb[6].mxu0  ;;  %v2057_v47 = vpop.f32.mrb[4].mxu1 }
 0x124   : > { %v2039_v45 = vpop.f32.mrb[7].mxu0  ;;  %v2058_v49 = vpop.f32.mrb[5].mxu1 }
 0x125   : > { %v1571_v46 = vadd.f32 %v2037_v43, %v1530_v37  ;;  %v2040_v48 = vadd.f32 %v2039_v45, %v2038_v44  ;;  %v2059_v51 = vadd.f32 %v2058_v49, %v2057_v47  ;;  %v2060_v52 = vpop.f32.mrb[6].mxu1 }
 0x126   : > { %v2061_v53 = vpop.f32.mrb[7].mxu1 }
 0x127   : > { %v1574_v50 = vadd.f32 %v2040_v48, %v1533_v39  ;;  %v2062_v55 = vadd.f32 %v2061_v53, %v2060_v52  ;;  %v1612_v54 = vadd.f32 %v2059_v51, %v1571_v46 }
 0x129   : > { %v1615_v56 = vadd.f32 %v2062_v55, %v1574_v50 }
 0x141   : > { %v1652_v57 = vpop.f32.mrb[8].mxu0 }
 0x142   : > { %v1653_v58 = vadd.f32 %v1652_v57, %v1612_v54  ;;  %v2090_v60 = vpop.f32.mrb[9].mxu0 }
 0x143   : > { %v1655_v61 = vpop.f32.mrb[10].mxu0 }
 0x144   : > { %v1656_v63 = vadd.f32 %v1655_v61, %v1615_v56  ;;  %v2091_v0 = vpop.f32.mrb[11].mxu0  ;;  %v1676_v16 = vmul.f32 %v1653_v58, %v1653_v58 }
 0x146   : > { %v1973_v23 = vpack.c.bf16 %v1656_v63, %v1653_v58  ;;  %v1669_v1 = vadd.f32 %v1656_v63, %v1653_v58  ;;  %v1677_v2 = vmul.f32 %v1656_v63, %v1656_v63 }
 0x148   : > { %1974 = vst [vmem:[%s204_s4] sm:$0xff] %v1973_v23   ;;  %v1670_v3 = vrot.slane %v1669_v1, 4  ;;  %v1678_v4 = vadd.f32 %v1677_v2, %v1676_v16 }
 0x14a   : > { %v1671_v5 = vadd.f32 %v1670_v3, %v1669_v1  ;;  %v1679_v6 = vrot.slane %v1678_v4, 4 }
 0x14c   : > { %v1672_v7 = vrot.slane %v1671_v5, 2  ;;  %v1680_v8 = vadd.f32 %v1679_v6, %v1678_v4 }
 0x14e   : > { %v1673_v9 = vadd.f32 %v1672_v7, %v1671_v5  ;;  %v1681_v10 = vrot.slane %v1680_v8, 2 }
 0x150   : > { %v1674_v11 = vrot.slane %v1673_v9, 1  ;;  %v1682_v12 = vadd.f32 %v1681_v10, %v1680_v8 }
 0x152   : > { %v1683_v32 = vrot.slane %v1682_v12, 1  ;;  %v1675_v13 = vadd.f32 %v1674_v11, %v1673_v9 }
 0x154   : > { %v1684_v14 = vadd.f32 %v1683_v32, %v1682_v12 }
 0x156   : > { %v1686_v62 = vsel %vm363_vm1, %v1675_v13, %v1684_v14 }
 0x157   : > { %1687 = vst [vmem:[%s211_s9] sm:$0x3] %v1686_v62 }
 0x158 PF: > { %s14_s14 = sadd.s32 1, %s2226_s14   ;;  %s2626_s12 = smov %s2222_s13 }
 0x159   : > { %p11_p5 = scmp.ge.s32.totalorder %s14_s14, 4   ;;  %s2627_s13 = smov %s2629_s15 }
 0x15b   :  { %13 = sbr.rel (!%p11_p5) target bundleno = 2 (0x2), region = 73 }

// kernel: resnet_filter_forward.26
= control target key start
LH: loop header
LB: loop body
LE: loop exit
PB: predicated region body
PF: predicated region fallthrough
CT: control target
= control target key end

     0   :  { %s2139_s9 = smov 0   ;;  %s2141_s10 = smov 0   ;;  %s2501_s0 = inlined_call_operand.vmem [shape: bf16[2,6,6,128], index: 0, kind: input, shape index: {}]   ;;  %s2502_s1 = inlined_call_operand.vmem [shape: bf16[1152,128], index: 1, kind: input, shape index: {}]   ;;  %s2503_s2 = inlined_call_operand.vmem [shape: bf16[2,1,16,128], index: 2, kind: output, shape index: {}]  }
   0x1   :  { %s2143_s11 = smov 0  }
   0x2 LB: > { %s24_s12 = sadd.s32 1, %s2115_s10  ;;  %p1720_p0 = scmp.ge.s32.totalorder %s2119_s11, 1  ;;  %s2119_s11 = sphi %s2143_s11, %s12_s11   ;;  %s2115_s10 = sphi %s2141_s10, %s2509_s10   ;;  %s2111_s9 = sphi %s2139_s9, %s2508_s9  }
   0x3   : > { %p26_p1 = scmp.ge.s32.totalorder %s24_s12, 2  ;;  %p126_p2 = scmp.lt.s32.totalorder %s2119_s11, 3 }
   0x5   : > { %s2511_s12 = smov (%p26_p1, %s24_s12), 0  ;;  %p127_p3 = pnand %p1720_p0, %p126_p2 }
   0x6   : > { %v2013_v0 = vld [vmem:[%s2502_s1 + $0x40] sm:$0xff] (!%p127_p3)   ;;  %v2017_v4 = vld [vmem:[%s2502_s1 + $0x48] sm:$0xff] (!%p127_p3)   ;;  %v2021_v8 = vld [vmem:[%s2502_s1 + $0x50] sm:$0xff] (!%p127_p3)   ;;  %p152_p4 = scmp.lt.s32.totalorder (!%p127_p3), %s2111_s9, 1  ;;  %v667_v28 = vlaneseq (!%p127_p3)  ;;  %vm214_vm0 = vsmask.f32 (!%p127_p3), 1280 }
   0x7   : > { %130 = sbr.rel (%p127_p3) target bundleno = 329 (0x149), region = 28  ;;  %v2014_v1 = vld [vmem:[%s2502_s1 + $0xc0] sm:$0xff] (!%p127_p3)   ;;  %1868 = vmatprep.subr.bf16.mxu0 (!%p127_p3), %v2013_v0  ;;  %v2018_v5 = vld [vmem:[%s2502_s1 + $0xc8] sm:$0xff] (!%p127_p3)   ;;  %v2022_v9 = vld [vmem:[%s2502_s1 + $0xd0] sm:$0xff] (!%p127_p3)   ;;  %vm317_vm1 = vcmask (!%p127_p3), 1040384   ;;  %vm318_vm2 = vcmask (!%p127_p3), 1042434  }
   0x8   : > { %v2015_v2 = vld [vmem:[%s2502_s1] sm:$0xff] (!%p127_p3)   ;;  %1890 = vmatprep.subr.bf16.mxu1 (!%p127_p3), %v2014_v1  ;;  %v2019_v6 = vld [vmem:[%s2502_s1 + $0x8] sm:$0xff] (!%p127_p3)   ;;  %v2023_v10 = vld [vmem:[%s2502_s1 + $0x10] sm:$0xff] (!%p127_p3)   ;;  %v2265_v33 = vshrl.u32 (!%p127_p3), %v667_v28, 7  ;;  %vm215_vm3 = vsmask.f32 (!%p127_p3), 3336 }
   0x9   : > { %v2016_v3 = vld [vmem:[%s2502_s1 + $0x80] sm:$0xff] (!%p127_p3)   ;;  %1869 = vmatpush3.bf16.msra.mxu0 (!%p127_p3), %v2015_v2  ;;  %v2020_v7 = vld [vmem:[%s2502_s1 + $0x88] sm:$0xff] (!%p127_p3)   ;;  %v2024_v11 = vld [vmem:[%s2502_s1 + $0x90] sm:$0xff] (!%p127_p3)   ;;  %vm217_vm4 = vsmask.f32 (!%p127_p3), 5392  ;;  %vm320_vm7 = vcmask (!%p127_p3), 1044484  }
   0xa   : > { %1891 = vmatpush3.bf16.msra.mxu1 (!%p127_p3), %v2016_v3  ;;  %1870 = vmatprep.subr.bf16.mxu0 (!%p127_p3), %v2017_v4  ;;  %v2025_v12 = vld [vmem:[%s2502_s1 + $0x58] sm:$0xff] (!%p127_p3)   ;;  %v2029_v16 = vld [vmem:[%s2502_s1 + $0x60] sm:$0xff] (!%p127_p3)   ;;  %v2033_v20 = vld [vmem:[%s2502_s1 + $0x68] sm:$0xff] (!%p127_p3)   ;;  %vm219_vm6 = vsmask.f32 (!%p127_p3), 7448  ;;  %vm322_vm10 = vcmask (!%p127_p3), 1046534  }
   0xb   : > { %1892 = vmatprep.subr.bf16.mxu1 (!%p127_p3), %v2018_v5  ;;  %v2026_v13 = vld [vmem:[%s2502_s1 + $0xd8] sm:$0xff] (!%p127_p3)   ;;  %v2030_v17 = vld [vmem:[%s2502_s1 + $0xe0] sm:$0xff] (!%p127_p3)   ;;  %v2034_v21 = vld [vmem:[%s2502_s1 + $0xe8] sm:$0xff] (!%p127_p3)   ;;  %vm2123_vm14 = vmmov (!%p127_p3), 0  }
   0xc   : > { %v2027_v14 = vld [vmem:[%s2502_s1 + $0x18] sm:$0xff] (!%p127_p3)   ;;  %v2031_v18 = vld [vmem:[%s2502_s1 + $0x20] sm:$0xff] (!%p127_p3)   ;;  %v2035_v22 = vld [vmem:[%s2502_s1 + $0x28] sm:$0xff] (!%p127_p3)  }
   0xd   : > { %1871 = vmatpush3.bf16.msra.mxu0 (!%p127_p3), %v2019_v6  ;;  %v2028_v15 = vld [vmem:[%s2502_s1 + $0x98] sm:$0xff] (!%p127_p3)   ;;  %v2032_v19 = vld [vmem:[%s2502_s1 + $0xa0] sm:$0xff] (!%p127_p3)   ;;  %v2036_v23 = vld [vmem:[%s2502_s1 + $0xa8] sm:$0xff] (!%p127_p3)  }
   0xe   : > { %1893 = vmatpush3.bf16.msra.mxu1 %v2020_v7  ;;  %1872 = vmatprep.subr.bf16.mxu0 %v2021_v8  ;;  %s2513_s9 = smov (!%p152_p4, %s2111_s9), 1  ;;  %v2037_v24 = vld [vmem:[%s2502_s1 + $0x70] sm:$0xff]   ;;  %v2041_v29 = vld [vmem:[%s2502_s1 + $0x78] sm:$0xff]   ;;  %vm216_vm5 = vmor %vm214_vm0, %vm215_vm3 }
   0xf   : > { %1894 = vmatprep.subr.bf16.mxu1 %v2022_v9  ;;  %v2038_v25 = vld [vmem:[%s2502_s1 + $0xf0] sm:$0xff]   ;;  %s1985_s17 = smul.u32 24, %s2513_s9  ;;  %v2042_v30 = vld [vmem:[%s2502_s1 + $0xf8] sm:$0xff]   ;;  %v2049_v45 = vld [vmem:[%s2502_s1 + $0x140] sm:$0xff]   ;;  %v2121_v9 = vmov 1983009808  }
  0x10   : > { %v2039_v26 = vld [vmem:[%s2502_s1 + $0x30] sm:$0xff]   ;;  %v2043_v31 = vld [vmem:[%s2502_s1 + $0x38] sm:$0xff]   ;;  %vm218_vm8 = vmor %vm216_vm5, %vm217_vm4  ;;  %s1860_s19 = sshll.u32 %s2513_s9, 3 }
  0x11   : > { %1873 = vmatpush3.bf16.msra.mxu0 %v2023_v10  ;;  %v2040_v27 = vld [vmem:[%s2502_s1 + $0xb0] sm:$0xff]   ;;  %s2257_s28 = scalar_lea.vmem %s2501_s0, %s1985_s17  ;;  %v2044_v32 = vld [vmem:[%s2502_s1 + $0xb8] sm:$0xff]   ;;  %vm2276_vm9 = vmor %vm218_vm8, %vm219_vm6  ;;  %v665_v10 = vunpack.c.l.s4 %v2121_v9  ;;  %s165_s22 = scalar_lea.vmem %s2503_s2, %s1860_s19 }
  0x12   : > { %1895 = vmatpush3.bf16.msra.mxu1 %v2024_v11  ;;  %1874 = vmatprep.subr.bf16.mxu0 %v2025_v12  ;;  %v1724_v34 = vld.sshfl [vmem:[%s2257_s28] sm:$0x13 pattern:$0x76325410]  ;;  %vm319_vm11 = vmor %vm317_vm1, %vm318_vm2  ;;  %v2064_v9 = vld [vmem:[%s2502_s1 + $0x198] sm:$0xff]  }
  0x13   : > { %1896 = vmatprep.subr.bf16.mxu1 %v2026_v13  ;;  %v1725_v35 = vld.sshfl [vmem:[%s2257_s28 + $0x4] sm:$0x13 pattern:$0x76325410]  ;;  %v189_v36 = vcombine.high %v1724_v34, %v1724_v34  ;;  %v222_v42 = vshrl.u32 %v1724_v34, 16  ;;  %v225_v43 = vshll.u32 %v1724_v34, 16  ;;  %vm321_vm12 = vmor %vm319_vm11, %vm320_vm7 }
  0x14   : > { %v1726_v37 = vld.sshfl [vmem:[%s2257_s28 + $0x8] sm:$0x13 pattern:$0x76325410]  ;;  %v197_v38 = vcombine.high %v1725_v35, %v1725_v35  ;;  %v236_v46 = vshrl.u32 %v1725_v35, 16  ;;  %v239_v47 = vshll.u32 %v1725_v35, 16  ;;  %vm2314_vm13 = vmor %vm321_vm12, %vm322_vm10 }
  0x15   : > { %1875 = vmatpush3.bf16.msra.mxu0 %v2027_v14  ;;  %v1727_v39 = vld.sshfl [vmem:[%s2257_s28 + $0xc] sm:$0x13 pattern:$0x76325410]  ;;  %v205_v40 = vcombine.high %v1726_v37, %v1726_v37  ;;  %v231_v44 = vshll.u32 %v189_v36, 16  ;;  %v250_v49 = vshrl.u32 %v1726_v37, 16 }
  0x16   : > { %1897 = vmatpush3.bf16.msra.mxu1 %v2028_v15  ;;  %1876 = vmatprep.subr.bf16.mxu0 %v2029_v16  ;;  %v213_v41 = vcombine.high %v1727_v39, %v1727_v39  ;;  %v245_v48 = vshll.u32 %v197_v38, 16  ;;  %v224_v50 = vrot.slane %v222_v42, 6  ;;  %v227_v51 = vrot.slane %v225_v43, 7  ;;  %v2051_v5 = vld [vmem:[%s2502_s1 + $0x1c0] sm:$0xff]   ;;  %v2084_v62 = vld [vmem:[%s2502_s1 + $0x208] sm:$0xff]   ;;  %v2086_v36 = vld [vmem:[%s2502_s1 + $0x218] sm:$0xff]  }
  0x17   : > { %1898 = vmatprep.subr.bf16.mxu1 %v2030_v17  ;;  %v233_v52 = vrot.slane %v231_v44, 7  ;;  %v253_v53 = vshll.u32 %v1726_v37, 16  ;;  %v238_v54 = vrot.slane %v236_v46, 6  ;;  %v241_v55 = vrot.slane %v239_v47, 7 }
  0x18   : > { %v247_v56 = vrot.slane %v245_v48, 7  ;;  %v252_v57 = vrot.slane %v250_v49, 6  ;;  %v228_v58 = vor.u32 %v227_v51, %v224_v50  ;;  %v259_v60 = vshll.u32 %v205_v40, 16 }
  0x19   : > { %1877 = vmatpush3.bf16.msra.mxu0 %v2031_v18  ;;  %v255_v59 = vrot.slane %v253_v53, 7  ;;  %v264_v61 = vshrl.u32 %v1727_v39, 16  ;;  %v242_v63 = vor.u32 %v241_v55, %v238_v54  ;;  %v267_v0 = vshll.u32 %v1727_v39, 16  ;;  %v2050_v53 = vld [vmem:[%s2502_s1 + $0x100] sm:$0xff]   ;;  %v2053_v55 = vld [vmem:[%s2502_s1 + $0x148] sm:$0xff]  }
  0x1a   : > { %1899 = vmatpush3.bf16.msra.mxu1 %v2032_v19  ;;  %1878 = vmatprep.subr.bf16.mxu0 %v2033_v20  ;;  %v273_v1 = vshll.u32 %v213_v41, 16  ;;  %v229_v2 = vrot.slane %v228_v58, 2  ;;  %v261_v7 = vrot.slane %v259_v60, 7  ;;  %v666_v18 = vunpack.c.0.s8 %v665_v10  ;;  %v2052_v58 = vld [vmem:[%s2502_s1 + $0x180] sm:$0xff]   ;;  %v2054_v60 = vld [vmem:[%s2502_s1 + $0x108] sm:$0xff]  }
  0x1b   : > { %1900 = vmatprep.subr.bf16.mxu1 %v2034_v21  ;;  %v256_v3 = vor.u32 %v255_v59, %v252_v57  ;;  %v266_v4 = vrot.slane %v264_v61, 6  ;;  %v243_v6 = vrot.slane %v242_v63, 2  ;;  %v269_v8 = vrot.slane %v267_v0, 7  ;;  %v2057_v61 = vld [vmem:[%s2502_s1 + $0x150] sm:$0xff]   ;;  %v2055_v0 = vld [vmem:[%s2502_s1 + $0x1c8] sm:$0xff]   ;;  %v2066_v10 = vld [vmem:[%s2502_s1 + $0x120] sm:$0xff]  }
  0x1c   : > { %v2091_v11 = vld.sshfl [vmem:[%s2257_s28 + $0x4] sm:$0xf pattern:$0x76325410]  ;;  %v234_v13 = vsel %vm2276_vm9, %v229_v2, %v233_v52  ;;  %v275_v15 = vrot.slane %v273_v1, 7  ;;  %v2058_v2 = vld [vmem:[%s2502_s1 + $0x110] sm:$0xff]  }
  0x1d   : > { %1879 = vmatpush3.bf16.msra.mxu0 %v2035_v22  ;;  %v2092_v12 = vld.sshfl [vmem:[%s2257_s28 + $0xc] sm:$0xf pattern:$0x76325410]  ;;  %v257_v14 = vrot.slane %v256_v3, 2  ;;  %v2291_v16 = vsel %vm2276_vm9, %v243_v6, %v247_v56  ;;  %v270_v17 = vor.u32 %v269_v8, %v266_v4  ;;  %v2061_v3 = vld [vmem:[%s2502_s1 + $0x158] sm:$0xff]  }
  0x1e   : > { %1901 = vmatpush3.bf16.msra.mxu1 %v2036_v23  ;;  %1880 = vmatprep.subr.bf16.mxu0 %v2037_v24  ;;  %v2093_v19 = vld.sshfl [vmem:[%s2257_s28] sm:$0xf pattern:$0x76325410]  ;;  %v680_v21 = vcombine.low %v234_v13, %v2291_v16  ;;  %v736_v38 = vcombine.low %v2091_v11, %v2092_v12  ;;  %v2056_v1 = vld [vmem:[%s2502_s1 + $0x188] sm:$0xff]   ;;  %v2059_v4 = vld [vmem:[%s2502_s1 + $0x1d0] sm:$0xff]  }
  0x1f   : > { %1902 = vmatprep.subr.bf16.mxu1 %v2038_v25  ;;  %v2094_v20 = vld.sshfl [vmem:[%s2257_s28 + $0x8] sm:$0xf pattern:$0x76325410]  ;;  %v2300_v23 = vsel %vm2276_vm9, %v257_v14, %v261_v7  ;;  %v271_v24 = vrot.slane %v270_v17, 2  ;;  %v2303_v25 = vsub.s32 %v666_v18, %v2265_v33  ;;  %v2062_v6 = vld [vmem:[%s2502_s1 + $0x118] sm:$0xff]  }
  0x20   : > { %v1728_v22 = vld.sshfl [vmem:[%s2257_s28] sm:$0x12 pattern:$0x76325410]  ;;  %v678_v43 = vcombine.low %v2093_v19, %v2094_v20  ;;  %1481 = vmatprep.mubr.bf16.mxu1 %v736_v38  ;;  %v2063_v8 = vld [vmem:[%s2502_s1 + $0x1d8] sm:$0xff]   ;;  %v2069_v11 = vld [vmem:[%s2502_s1 + $0x168] sm:$0xff]  }
  0x21   : > { %1881 = vmatpush3.bf16.msra.mxu0 %v2039_v26  ;;  %v1729_v26 = vld.sshfl [vmem:[%s2257_s28 + $0x4] sm:$0x12 pattern:$0x76325410]  ;;  %v688_v34 = vrot.slane %v680_v21, %v2303_v25  ;;  %v2070_v14 = vld [vmem:[%s2502_s1 + $0x128] sm:$0xff]   ;;  %v2074_v19 = vld [vmem:[%s2502_s1 + $0x130] sm:$0xff]  }
  0x22   : > { %1903 = vmatpush3.bf16.msra.mxu1 %v2040_v27  ;;  %1882 = vmatprep.subr.bf16.mxu0 %v2041_v29  ;;  %v292_v27 = vcombine.high %v1728_v22, %v1728_v22  ;;  %v1730_v28 = vld.sshfl [vmem:[%s2257_s28 + $0x8] sm:$0x12 pattern:$0x76325410]  ;;  %v300_v29 = vcombine.high %v1729_v26, %v1729_v26  ;;  %v2065_v7 = vld [vmem:[%s2502_s1 + $0x160] sm:$0xff]   ;;  %v2077_v20 = vld [vmem:[%s2502_s1 + $0x178] sm:$0xff]  }
  0x23   : > { %1904 = vmatprep.subr.bf16.mxu1 %v2042_v30  ;;  %v1732_v30 = vrot.slane %v1728_v22, 9  ;;  %v1731_v35 = vld.sshfl [vmem:[%s2257_s28 + $0xc] sm:$0x12 pattern:$0x76325410]  ;;  %v308_v37 = vcombine.high %v1730_v28, %v1730_v28  ;;  %v1734_v44 = vrot.slane %v1730_v28, 9 }
  0x24   : > { %v316_v39 = vcombine.high %v1731_v35, %v1731_v35  ;;  %v326_v40 = vrot.slane %v292_v27, 7  ;;  %v330_v41 = vrot.slane %v300_v29, 7  ;;  %v1735_v48 = vrot.slane %v1731_v35, 9  ;;  %v2067_v12 = vld [vmem:[%s2502_s1 + $0x1e0] sm:$0xff]   ;;  %v2071_v17 = vld [vmem:[%s2502_s1 + $0x1e8] sm:$0xff]   ;;  %v2076_v28 = vld [vmem:[%s2502_s1 + $0x1b0] sm:$0xff]  }
  0x25   : > { %1883 = vmatpush3.bf16.msra.mxu0 %v2043_v31  ;;  %v1733_v31 = vrot.slane %v1729_v26, 9  ;;  %v2068_v13 = vld [vmem:[%s2502_s1 + $0x1a0] sm:$0xff]   ;;  %v2072_v18 = vld [vmem:[%s2502_s1 + $0x1a8] sm:$0xff]  }
  0x26   : > { %1905 = vmatpush3.bf16.msra.mxu1 %v2044_v32  ;;  %1912 = vmatprep.subr.bf16.mxu0 %v2049_v45  ;;  %v2309_v32 = vsel %vm2276_vm9, %v271_v24, %v275_v15  ;;  %v334_v45 = vrot.slane %v308_v37, 7  ;;  %v327_v46 = vsel %vm2314_vm13, %v1732_v30, %v326_v40  ;;  %v338_v49 = vrot.slane %v316_v39, 7  ;;  %v2073_v15 = vld [vmem:[%s2502_s1 + $0x170] sm:$0xff]   ;;  %v2078_v30 = vld [vmem:[%s2502_s1 + $0x138] sm:$0xff]  }
  0x27   : > { %1934 = vmatprep.subr.bf16.mxu1 %v2051_v5  ;;  %v681_v33 = vcombine.low %v2300_v23, %v2309_v32  ;;  %v2327_v47 = vsel %vm2314_vm13, %v1733_v31, %v330_v41  ;;  %v2060_v5 = vld [vmem:[%s2502_s1 + $0x190] sm:$0xff]   ;;  %v2079_v39 = vld [vmem:[%s2502_s1 + $0x1f8] sm:$0xff]  }
  0x28   : > { %v2332_v51 = vsel %vm2314_vm13, %v1734_v44, %v334_v45  ;;  %v698_v52 = vcombine.low %v327_v46, %v2327_v47  ;;  %v2340_v54 = vsel %vm2314_vm13, %v1735_v48, %v338_v49  ;;  %v1755_v21 = vld.sshfl [vmem:[%s2257_s28 + $0x10] sm:$0x12 pattern:$0x76325410] }
  0x29   : > { %v2321_v42 = vrot.slane %v681_v33, %v2303_v25  ;;  %v699_v56 = vcombine.low %v2332_v51, %v2340_v54  ;;  %v756_v22 = vcombine.low %v2327_v47, %v2332_v51  ;;  %v2075_v24 = vld [vmem:[%s2502_s1 + $0x1f0] sm:$0xff]   ;;  %v482_v26 = vcombine.high %v1755_v21, %v1755_v21 }
  0x2a   : > { %v706_v57 = vrot.slane %v698_v52, %v2303_v25  ;;  %v1759_v27 = vrot.slane %v1755_v21, 9  ;;  %v1747_v29 = vld.sshfl [vmem:[%s2257_s28 + $0x10] sm:$0x13 pattern:$0x76325410]  ;;  %v738_v51 = vcombine.low %v2291_v16, %v2300_v23  ;;  %v2090_v21 = vld [vmem:[%s2502_s1 + $0x238] sm:$0xff]  }
  0x2b   : > { %v696_v50 = vcombine.low %v688_v34, %v2321_v42  ;;  %v2352_v59 = vrot.slane %v699_v56, %v2303_v25  ;;  %v497_v31 = vrot.slane %v482_v26, 7  ;;  %v386_v34 = vcombine.high %v1747_v29, %v1747_v29  ;;  %v1771_v38 = vld.sshfl [vmem:[%s2257_s28 + $0x14] sm:$0x13 pattern:$0x76325410] }
  0x2c   : > { %v430_v35 = vshrl.u32 %v1747_v29, 16  ;;  %v433_v33 = vshll.u32 %v1747_v29, 16  ;;  %v764_v37 = vrot.slane %v756_v22, %v2303_v25  ;;  %v545_v46 = vcombine.high %v1771_v38, %v1771_v38 }
  0x2d   : > { %1440 = vmatprep.mubr.bf16.mxu0 %v696_v50  ;;  %v714_v63 = vcombine.low %v706_v57, %v2352_v59  ;;  %v498_v40 = vsel %vm2314_vm13, %v1759_v27, %v497_v31  ;;  %v439_v44 = vshll.u32 %v386_v34, 16  ;;  %v589_v47 = vshrl.u32 %v1771_v38, 16 }
  0x2e   : > { %1441 = vmatmul.mubr.bf16.vlgmr.msra.gmra.mrb[0].mxu0 %v678_v43  ;;  %v432_v41 = vrot.slane %v430_v35, 6  ;;  %v435_v43 = vrot.slane %v433_v33, 7  ;;  %v757_v45 = vcombine.low %v2340_v54, %v498_v40  ;;  %v592_v48 = vshll.u32 %v1771_v38, 16 }
  0x2f   : > { %1913 = vmatpush3.bf16.msra.mxu0 %v2050_v53  ;;  %1482 = vmatmul.mubr.bf16.vlgmr.msra.gmra.mrb[0].mxu1 %v714_v63  ;;  %v441_v50 = vrot.slane %v439_v44, 7  ;;  %v2080_v53 = vld [vmem:[%s2502_s1 + $0x1b8] sm:$0xff]   ;;  %v591_v54 = vrot.slane %v589_v47, 6  ;;  %v598_v57 = vshll.u32 %v545_v46, 16 }
  0x30   : > { %1914 = vmatprep.subr.bf16.mxu0 %v2053_v55  ;;  %1935 = vmatpush3.bf16.msra.mxu1 %v2052_v58  ;;  %v436_v49 = vor.u32 %v435_v43, %v432_v41  ;;  %v771_v52 = vrot.slane %v757_v45, %v2303_v25  ;;  %v2122_v55 = vmov 0.0   ;;  %v594_v56 = vrot.slane %v592_v48, 7  ;;  %v2095_v58 = vld.sshfl [vmem:[%s2257_s28 + $0x8] sm:$0xf pattern:$0x76325410] }
  0x31   : > { %1936 = vmatprep.subr.bf16.mxu1 %v2055_v0  ;;  %v600_v16 = vrot.slane %v598_v57, 7 }
  0x32   : > { %v772_v63 = vcombine.low %v764_v37, %v771_v52  ;;  %v595_v0 = vor.u32 %v594_v56, %v591_v54 }
  0x33   : > { %1915 = vmatpush3.bf16.msra.mxu0 %v2054_v60  ;;  %v2096_v60 = vld.sshfl [vmem:[%s2257_s28 + $0x10] sm:$0xf pattern:$0x76325410] }
  0x34   : > { %1916 = vmatprep.subr.bf16.mxu0 %v2057_v61  ;;  %1937 = vmatpush3.bf16.msra.mxu1 %v2056_v1  ;;  %v437_v61 = vrot.slane %v436_v49, 2 }
  0x35   : > { %1938 = vmatprep.subr.bf16.mxu1 %v2059_v4  ;;  %1522 = vmatprep.mubr.bf16.mxu0 %v772_v63 }
  0x36   : > { %v442_v23 = vsel %vm2276_vm9, %v437_v61, %v441_v50 }
  0x37   : > { %1917 = vmatpush3.bf16.msra.mxu0 %v2058_v2  ;;  %v739_v1 = vcombine.low %v2309_v32, %v442_v23  ;;  %v746_v2 = vrot.slane %v738_v51, %v2303_v25 }
  0x38   : > { %1918 = vmatprep.subr.bf16.mxu0 %v2061_v3  ;;  %1939 = vmatpush3.bf16.msra.mxu1 %v2060_v5  ;;  %v596_v3 = vrot.slane %v595_v0, 2 }
  0x39   : > { %1940 = vmatprep.subr.bf16.mxu1 %v2063_v8  ;;  %v753_v4 = vrot.slane %v739_v1, %v2303_v25  ;;  %v2081_v8 = vld [vmem:[%s2502_s1 + $0x200] sm:$0xff]  }
  0x3a   : > { %v601_v5 = vsel %vm2276_vm9, %v596_v3, %v600_v16 }
  0x3b   : > { %1919 = vmatpush3.bf16.msra.mxu0 %v2062_v6  ;;  %v1779_v6 = vld.sshfl [vmem:[%s2257_s28 + $0x14] sm:$0x12 pattern:$0x76325410] }
  0x3c   : > { %1920 = vmatprep.subr.bf16.mxu0 %v2065_v7  ;;  %1941 = vmatpush3.bf16.msra.mxu1 %v2064_v9  ;;  %v797_v7 = vcombine.low %v442_v23, %v601_v5  ;;  %v641_v9 = vcombine.high %v1779_v6, %v1779_v6 }
  0x3d   : > { %1942 = vmatprep.subr.bf16.mxu1 %v2067_v12 }
  0x3e   : > { %v811_v12 = vrot.slane %v797_v7, %v2303_v25  ;;  %v656_v32 = vrot.slane %v641_v9, 7 }
  0x3f   : > { %1921 = vmatpush3.bf16.msra.mxu0 %v2066_v10  ;;  %v1783_v10 = vrot.slane %v1779_v6, 9 }
  0x40   : > { %1922 = vmatprep.subr.bf16.mxu0 %v2069_v11  ;;  %1943 = vmatpush3.bf16.msra.mxu1 %v2068_v13  ;;  %v754_v11 = vcombine.low %v746_v2, %v753_v4  ;;  %v794_v13 = vcombine.low %v2095_v58, %v2096_v60 }
  0x41   : > { %1944 = vmatprep.subr.bf16.mxu1 %v2071_v17 }
  0x43   : > { %1923 = vmatpush3.bf16.msra.mxu0 %v2070_v14  ;;  %v812_v14 = vcombine.low %v2321_v42, %v811_v12  ;;  %v2085_v42 = vld [vmem:[%s2502_s1 + $0x210] sm:$0xff]  }
  0x44   : > { %1924 = vmatprep.subr.bf16.mxu0 %v2073_v15  ;;  %1945 = vmatpush3.bf16.msra.mxu1 %v2072_v18  ;;  %v657_v15 = vsel %vm2314_vm13, %v1783_v10, %v656_v32 }
  0x45   : > { %1946 = vmatprep.subr.bf16.mxu1 %v2075_v24  ;;  %v815_v17 = vcombine.low %v498_v40, %v657_v15  ;;  %1563 = vmatprep.mubr.bf16.mxu1 %v812_v14 }
  0x47   : > { %1925 = vmatpush3.bf16.msra.mxu0 %v2074_v19  ;;  %v829_v18 = vrot.slane %v815_v17, %v2303_v25  ;;  %v2088_v25 = vld [vmem:[%s2502_s1 + $0x228] sm:$0xff]  }
  0x48   : > { %1926 = vmatprep.subr.bf16.mxu0 %v2077_v20  ;;  %1947 = vmatpush3.bf16.msra.mxu1 %v2076_v28  ;;  %v2087_v20 = vld [vmem:[%s2502_s1 + $0x220] sm:$0xff]  }
  0x49   : > { %1948 = vmatprep.subr.bf16.mxu1 %v2079_v39  ;;  %v830_v19 = vcombine.low %v2352_v59, %v829_v18  ;;  %v2089_v59 = vld [vmem:[%s2502_s1 + $0x230] sm:$0xff]  }
  0x4b   : > { %1927 = vmatpush3.bf16.msra.mxu0 %v2078_v30 }
  0x4c   : > { %1965 = vmatprep.subr.bf16.mxu0 %v2122_v55  ;;  %1949 = vmatpush3.bf16.msra.mxu1 %v2080_v53 }
  0x4e   : > { %1523 = vmatmul.mubr.bf16.vlgmr.msra.gmra.mrb[4].mxu0 %v754_v11 }
  0x4f   : > { %1966 = vmatpush3.bf16.msra.mxu0 %v2081_v8  ;;  %1981 = vmatprep.mubr.msk.bf16.mxu0 %vm2123_vm14, %v2122_v55 }
  0x50   : > { %1967 = vmatprep.subr.bf16.mxu0 %v2122_v55  ;;  %1564 = vmatmul.mubr.bf16.vlgmr.msra.gmra.mrb[4].mxu1 %v794_v13 }
  0x53   : > { %1968 = vmatpush3.bf16.msra.mxu0 %v2084_v62 }
  0x54   : > { %1969 = vmatprep.subr.bf16.mxu0 %v2122_v55 }
  0x57   : > { %1970 = vmatpush3.bf16.msra.mxu0 %v2085_v42 }
  0x58   : > { %1971 = vmatprep.subr.bf16.mxu0 %v2122_v55 }
  0x5b   : > { %1972 = vmatpush3.bf16.msra.mxu0 %v2086_v36 }
  0x5c   : > { %1973 = vmatprep.subr.bf16.mxu0 %v2122_v55 }
  0x5f   : > { %1974 = vmatpush3.bf16.msra.mxu0 %v2087_v20 }
  0x60   : > { %1975 = vmatprep.subr.bf16.mxu0 %v2122_v55 }
  0x63   : > { %1976 = vmatpush3.bf16.msra.mxu0 %v2088_v25 }
  0x64   : > { %1977 = vmatprep.subr.bf16.mxu0 %v2122_v55 }
  0x67   : > { %1978 = vmatpush3.bf16.msra.mxu0 %v2089_v59 }
  0x68   : > { %1979 = vmatprep.subr.bf16.mxu0 %v2122_v55 }
  0x6b   : > { %1980 = vmatpush3.bf16.msra.mxu0 %v2090_v21 }
  0x6e   : > { %1982 = vmatmul.mubr.bf16.vlgmr.msra.gmra.mrb[8].mxu0 %v830_v19 }
 0x101   : > { %v1884_v22 = vpop.f32.mrb[0].mxu0 }
 0x102   : > { %v1885_v24 = vpop.f32.mrb[1].mxu0  ;;  %v1906_v30 = vpop.f32.mrb[0].mxu1 }
 0x103   : > { %v1886_v26 = vadd.f32 %v1885_v24, %v1884_v22  ;;  %v1887_v27 = vpop.f32.mrb[2].mxu0  ;;  %v1907_v31 = vpop.f32.mrb[1].mxu1 }
 0x104   : > { %v1888_v28 = vpop.f32.mrb[3].mxu0  ;;  %v1908_v34 = vadd.f32 %v1907_v31, %v1906_v30  ;;  %v1909_v35 = vpop.f32.mrb[2].mxu1 }
 0x105   : > { %v1889_v29 = vadd.f32 %v1888_v28, %v1887_v27  ;;  %v1910_v33 = vpop.f32.mrb[3].mxu1 }
 0x106   : > { %v1484_v37 = vadd.f32 %v1908_v34, %v1886_v26  ;;  %v1911_v38 = vadd.f32 %v1910_v33, %v1909_v35 }
 0x108   : > { %v1487_v39 = vadd.f32 %v1911_v38, %v1889_v29 }
 0x121   : > { %v1928_v40 = vpop.f32.mrb[4].mxu0 }
 0x122   : > { %v1929_v41 = vpop.f32.mrb[5].mxu0 }
 0x123   : > { %v1930_v43 = vadd.f32 %v1929_v41, %v1928_v40  ;;  %v1931_v44 = vpop.f32.mrb[6].mxu0  ;;  %v1950_v47 = vpop.f32.mrb[4].mxu1 }
 0x124   : > { %v1932_v45 = vpop.f32.mrb[7].mxu0  ;;  %v1951_v49 = vpop.f32.mrb[5].mxu1 }
 0x125   : > { %v1525_v46 = vadd.f32 %v1930_v43, %v1484_v37  ;;  %v1933_v48 = vadd.f32 %v1932_v45, %v1931_v44  ;;  %v1952_v51 = vadd.f32 %v1951_v49, %v1950_v47  ;;  %v1953_v52 = vpop.f32.mrb[6].mxu1 }
 0x126   : > { %v1954_v53 = vpop.f32.mrb[7].mxu1 }
 0x127   : > { %v1528_v50 = vadd.f32 %v1933_v48, %v1487_v39  ;;  %v1955_v55 = vadd.f32 %v1954_v53, %v1953_v52  ;;  %v1566_v54 = vadd.f32 %v1952_v51, %v1525_v46 }
 0x129   : > { %v1569_v56 = vadd.f32 %v1955_v55, %v1528_v50 }
 0x141   : > { %v1606_v57 = vpop.f32.mrb[8].mxu0 }
 0x142   : > { %v1607_v58 = vadd.f32 %v1606_v57, %v1566_v54  ;;  %v1983_v60 = vpop.f32.mrb[9].mxu0 }
 0x143   : > { %v1609_v61 = vpop.f32.mrb[10].mxu0 }
 0x144   : > { %v1610_v63 = vadd.f32 %v1609_v61, %v1569_v56  ;;  %v1984_v0 = vpop.f32.mrb[11].mxu0 }
 0x146   : > { %v1866_v16 = vpack.c.bf16 %v1610_v63, %v1607_v58 }
 0x148   : > { %1867 = vst [vmem:[%s165_s22] sm:$0xff] %v1866_v16  }
 0x149 PF: > { %s12_s11 = sadd.s32 1, %s2119_s11   ;;  %s2508_s9 = smov %s2115_s10 }
 0x14a   : > { %p9_p5 = scmp.ge.s32.totalorder %s12_s11, 4   ;;  %s2509_s10 = smov %s2511_s12 }
 0x14c   :  { %11 = sbr.rel (!%p9_p5) target bundleno = 2 (0x2), region = 61 }

</bundles_post_ra>
